<compile_context>
chip_gen: v7x
topology: tpu7x:2x2x1
jax: 0.10.0
libtpu: 0.0.40
codegen_flags: <defaults>
</compile_context>

<pallas_src>
import jax
import jax.numpy as jnp
from jax import lax
from jax.experimental import pallas as pl
from jax.experimental.pallas import tpu as pltpu


# ----------------------------------------------------------------------------- #
# Kernel
# ----------------------------------------------------------------------------- #
def _rpn_head_kernel(x_main_ref, x_t0_ref, x_t1_ref, wconv_ref, bconv_ref,
                     whead_ref, bhead_ref, out_ref, xw_ref):
    # x_main_ref : (1, TH, W+2, C)  bf16   padded rows [i*TH, i*TH+TH)
    # x_t0_ref   : (1, 1,  W+2, C)  bf16   padded row   i*TH+TH        (halo)
    # x_t1_ref   : (1, 1,  W+2, C)  bf16   padded row   i*TH+TH+1      (halo)
    # wconv_ref  : (9, C, C)        bf16   3x3 weights, tap-major, [Cin, Cout]
    # bconv_ref  : (1, C)           f32
    # whead_ref  : (C, CP)          bf16   fused [cls | box | zero-pad] head
    # bhead_ref  : (1, CP)          f32
    # out_ref    : (1, TH, W, CP)   f32    lane-dense fused head output
    # xw_ref     : (TH+2, W+2, C)   bf16   VMEM scratch: row tile + 2-row halo
    TH = x_main_ref.shape[1]
    C = x_main_ref.shape[3]
    W = out_ref.shape[2]
    CP = out_ref.shape[3]

    # Restage the halo'd window into one scratch so every tap below is a plain
    # ref-sliced load (small live ranges, no full-image value in vregs).
    xw_ref[0:TH] = x_main_ref[0]
    xw_ref[TH:TH + 1] = x_t0_ref[0]
    xw_ref[TH + 1:TH + 2] = x_t1_ref[0]

    # 3x3 "same" conv as 9 shifted bf16 matmuls accumulated in f32.
    acc = jnp.zeros((TH * W, C), jnp.float32)
    for ky in range(3):
        for kx in range(3):
            patch = xw_ref[ky:ky + TH, kx:kx + W, :].reshape(TH * W, C)
            acc = acc + jnp.dot(patch, wconv_ref[ky * 3 + kx],
                                preferred_element_type=jnp.float32)
    t = jnp.maximum(acc + bconv_ref[...], 0.0).astype(jnp.bfloat16)   # ReLU

    # Fused cls_logits + bbox_pred 1x1 heads: one lane-dense matmul + bias.
    head = jnp.dot(t, whead_ref[...], preferred_element_type=jnp.float32)
    head = head + bhead_ref[...]
    out_ref[0] = head.reshape(TH, W, CP).astype(out_ref.dtype)


# ----------------------------------------------------------------------------- #
# Wrapper
# ----------------------------------------------------------------------------- #
def _round_up(x, m):
    return ((x + m - 1) // m) * m


def _pick_tile_rows(h, cap=64):
    """Largest divisor of h that is <= cap (keeps BlockSpecs exact, bounds VMEM)."""
    best = 1
    for t in range(1, min(h, cap) + 1):
        if h % t == 0:
            best = t
    return best


def rpn_head_single_level(feature_nchw, params, *, tile_rows_cap=64):
    """Run the RPN head on one NCHW feature map. Returns (logits, bbox) in NCHW."""
    wconv = params["wconv"]    # (9, C, C)   bf16
    bconv = params["bconv"]    # (1, C)      f32
    whead = params["whead"]    # (C, CP)     bf16
    bhead = params["bhead"]    # (1, CP)     f32
    A = params["num_anchors"]

    N, C, H, W = feature_nchw.shape
    CP = whead.shape[1]
    Wp = W + 2

    # NCHW -> NHWC bf16, zero-pad spatial by 1 for the 3x3 "same" conv.
    x_nhwc = jnp.transpose(feature_nchw, (0, 2, 3, 1)).astype(jnp.bfloat16)
    x_pad = jnp.pad(x_nhwc, ((0, 0), (1, 1), (1, 1), (0, 0)))   # (N, H+2, W+2, C)

    TH = _pick_tile_rows(H, tile_rows_cap)
    n_tiles = H // TH
    grid = (N, n_tiles)

    out = pl.pallas_call(
        _rpn_head_kernel,
        out_shape=jax.ShapeDtypeStruct((N, H, W, CP), jnp.float32),
        grid_spec=pltpu.PrefetchScalarGridSpec(
            num_scalar_prefetch=0,
            grid=grid,
            in_specs=[
                # main TH-row window of the padded image
                pl.BlockSpec((1, TH, Wp, C), lambda n, i: (n, i, 0, 0)),
                # two 1-row halo inputs (block size 1 => block index == element index)
                pl.BlockSpec((1, 1, Wp, C), lambda n, i: (n, i * TH + TH, 0, 0)),
                pl.BlockSpec((1, 1, Wp, C), lambda n, i: (n, i * TH + TH + 1, 0, 0)),
                # weights / biases, broadcast over the grid
                pl.BlockSpec((9, C, C), lambda n, i: (0, 0, 0)),
                pl.BlockSpec((1, C), lambda n, i: (0, 0)),
                pl.BlockSpec((C, CP), lambda n, i: (0, 0)),
                pl.BlockSpec((1, CP), lambda n, i: (0, 0)),
            ],
            out_specs=pl.BlockSpec((1, TH, W, CP), lambda n, i: (n, i, 0, 0)),
            scratch_shapes=[pltpu.VMEM((TH + 2, Wp, C), jnp.bfloat16)],
        ),
        compiler_params=pltpu.CompilerParams(
            dimension_semantics=("parallel", "parallel"),
            vmem_limit_bytes=48 * 1024 * 1024,
        ),
    )(x_pad, x_pad, x_pad, wconv, bconv, whead, bhead)

    # Split the fused lane-dense output into cls / box, back to NCHW.
    cls_nhwc = out[..., :A]
    box_nhwc = out[..., A:5 * A]
    logits = jnp.transpose(cls_nhwc, (0, 3, 1, 2))
    bbox = jnp.transpose(box_nhwc, (0, 3, 1, 2))
    return logits, bbox


def rpn_head_forward(features, params):
    """features: list of NCHW arrays -> (list of logits, list of bbox_reg), NCHW."""
    logits, bbox_reg = [], []
    for feat in features:
        l, b = rpn_head_single_level(feat, params)
        logits.append(l)
        bbox_reg.append(b)
    return logits, bbox_reg


# ----------------------------------------------------------------------------- #
# Parameter init (matches the module: weights ~ N(0, 0.01), biases = 0)
# ----------------------------------------------------------------------------- #
def init_rpn_head_params(key, in_channels, num_anchors):
    k1, k2, k3 = jax.random.split(key, 3)
    C, A = in_channels, num_anchors
    CP = max(128, _round_up(5 * A, 128))     # lane-dense fused head width

    # conv: PyTorch weight (Cout, Cin, 3, 3) -> tap-major (9, Cin, Cout).
    w_conv_torch = 0.01 * jax.random.normal(k1, (C, C, 3, 3), jnp.float32)
    wconv = jnp.transpose(w_conv_torch, (2, 3, 1, 0)).reshape(9, C, C)
    bconv = jnp.zeros((1, C), jnp.float32)

    # cls_logits: (A, C, 1, 1) -> (C, A); bbox_pred: (4A, C, 1, 1) -> (C, 4A).
    w_cls_torch = 0.01 * jax.random.normal(k2, (A, C, 1, 1), jnp.float32)
    w_box_torch = 0.01 * jax.random.normal(k3, (4 * A, C, 1, 1), jnp.float32)
    wcls = jnp.transpose(w_cls_torch[:, :, 0, 0], (1, 0))
    wbox = jnp.transpose(w_box_torch[:, :, 0, 0], (1, 0))

    # Fused head weight, zero-padded to CP lanes: [cls | box | 0...].
    whead = jnp.zeros((C, CP), jnp.float32)
    whead = whead.at[:, :A].set(wcls).at[:, A:5 * A].set(wbox)
    bhead = jnp.zeros((1, CP), jnp.float32)

    return {
        "wconv": wconv.astype(jnp.bfloat16),
        "bconv": bconv,
        "whead": whead.astype(jnp.bfloat16),
        "bhead": bhead,
        "num_anchors": A,
    }


# ----------------------------------------------------------------------------- #
# Pure-JAX reference (mirrors the kernel's bf16 operand rounding)
# ----------------------------------------------------------------------------- #
def _reference_forward(features, params):
    wconv = params["wconv"].astype(jnp.float32)   # (9, C, C) tap-major [Cin, Cout]
    bconv = params["bconv"]                       # (1, C)
    whead = params["whead"].astype(jnp.float32)   # (C, CP)
    bhead = params["bhead"]                       # (1, CP)
    A = params["num_anchors"]
    C = wconv.shape[1]

    w_conv_oihw = jnp.transpose(wconv.reshape(3, 3, C, C), (3, 2, 0, 1))
    logits, bbox = [], []
    for f in features:
        fb = f.astype(jnp.bfloat16).astype(jnp.float32)
        t = lax.conv_general_dilated(fb, w_conv_oihw, (1, 1), [(1, 1), (1, 1)],
                                     dimension_numbers=("NCHW", "OIHW", "NCHW"))
        t = jnp.maximum(t + bconv.reshape(1, C, 1, 1), 0.0)
        t = t.astype(jnp.bfloat16).astype(jnp.float32)
        tn = jnp.transpose(t, (0, 2, 3, 1))                           # NHWC
        head = jnp.einsum("nhwc,ck->nhwk", tn, whead) + bhead.reshape(1, 1, 1, -1)
        logits.append(jnp.transpose(head[..., :A], (0, 3, 1, 2)))
        bbox.append(jnp.transpose(head[..., A:5 * A], (0, 3, 1, 2)))
    return logits, bbox


# ----------------------------------------------------------------------------- #
if __name__ == "__main__":
    key = jax.random.PRNGKey(0)
    kp, kx1, kx2 = jax.random.split(key, 3)

    in_channels, num_anchors = 4, 3
    params = init_rpn_head_params(kp, in_channels, num_anchors)

    # Two feature-map levels (list input, as in the PyTorch forward).
    feat0 = jax.random.normal(kx1, (2, in_channels, 16, 16), jnp.float32)
    feat1 = jax.random.normal(kx2, (2, in_channels, 8, 8), jnp.float32)
    features = [feat0, feat1]

    logits, bbox_reg = rpn_head_forward(features, params)
    logits = [jax.block_until_ready(l) for l in logits]
    bbox_reg = [jax.block_until_ready(b) for b in bbox_reg]

    # Sanity check against a pure-JAX reference (same bf16-rounded operands).
    ref_logits, ref_bbox = _reference_forward(features, params)
    for got, ref in zip(logits + bbox_reg, ref_logits + ref_bbox):
        assert got.shape == ref.shape, (got.shape, ref.shape)
        assert jnp.allclose(got, ref, atol=1e-4, rtol=1e-3), \
            float(jnp.max(jnp.abs(got - ref)))

    print("KERNEL_OK")
</pallas_src>

<mosaic_0001>
module attributes {stable_mosaic.version = 11 : i64} {
  func.func @_rpn_head_kernel(%arg0: i32, %arg1: i32, %arg2: memref<1x16x18x4xbf16, #tpu.memory_space<vmem>>, %arg3: memref<1x1x18x4xbf16, #tpu.memory_space<vmem>>, %arg4: memref<1x1x18x4xbf16, #tpu.memory_space<vmem>>, %arg5: memref<9x4x4xbf16, #tpu.memory_space<vmem>>, %arg6: memref<1x4xf32, #tpu.memory_space<vmem>>, %arg7: memref<4x128xbf16, #tpu.memory_space<vmem>>, %arg8: memref<1x128xf32, #tpu.memory_space<vmem>>, %arg9: memref<1x16x16x128xf32, #tpu.memory_space<vmem>>, %arg10: memref<18x18x4xbf16, #tpu.memory_space<vmem>>) attributes {dimension_semantics = [#tpu.dimension_semantics<parallel>, #tpu.dimension_semantics<parallel>], iteration_bounds = array<i64: 2, 1>, scalar_prefetch = 0 : i64, scratch_operands = 1 : i64, tpu.core_type = #tpu.core_type<tc>, window_params = [{transform_indices = @transform_0, window_bounds = array<i64: 1, 16, 18, 4>}, {transform_indices = @transform_1, window_bounds = array<i64: 1, 1, 18, 4>}, {transform_indices = @transform_2, window_bounds = array<i64: 1, 1, 18, 4>}, {pipeline_mode = #tpu.pipeline_mode<synchronous>, transform_indices = @transform_3, window_bounds = array<i64: 9, 4, 4>}, {pipeline_mode = #tpu.pipeline_mode<synchronous>, transform_indices = @transform_4, window_bounds = array<i64: 1, 4>}, {pipeline_mode = #tpu.pipeline_mode<synchronous>, transform_indices = @transform_5, window_bounds = array<i64: 4, 128>}, {pipeline_mode = #tpu.pipeline_mode<synchronous>, transform_indices = @transform_6, window_bounds = array<i64: 1, 128>}, {transform_indices = @transform_7, window_bounds = array<i64: 1, 16, 16, 128>}]} {
    %c0 = arith.constant 0 : index
    %c0_0 = arith.constant 0 : index
    %c0_1 = arith.constant 0 : index
    %c0_2 = arith.constant 0 : index
    %0 = vector.load %arg2[%c0, %c0_0, %c0_1, %c0_2] : memref<1x16x18x4xbf16, #tpu.memory_space<vmem>>, vector<1x16x18x4xbf16>
    %1 = vector.shape_cast %0 : vector<1x16x18x4xbf16> to vector<16x18x4xbf16>
    %c0_3 = arith.constant 0 : index
    %c0_4 = arith.constant 0 : index
    %c0_5 = arith.constant 0 : index
    %2 = vector.load %arg10[%c0_3, %c0_4, %c0_5] : memref<18x18x4xbf16, #tpu.memory_space<vmem>>, vector<16x18x4xbf16>
    tpu.vector_store %arg10[%c0_3, %c0_4, %c0_5], %1 {strides = array<i32>} : memref<18x18x4xbf16, #tpu.memory_space<vmem>>, vector<16x18x4xbf16>,
    %c0_6 = arith.constant 0 : index
    %c0_7 = arith.constant 0 : index
    %c0_8 = arith.constant 0 : index
    %c0_9 = arith.constant 0 : index
    %3 = vector.load %arg3[%c0_6, %c0_7, %c0_8, %c0_9] : memref<1x1x18x4xbf16, #tpu.memory_space<vmem>>, vector<1x1x18x4xbf16>
    %4 = vector.shape_cast %3 : vector<1x1x18x4xbf16> to vector<1x18x4xbf16>
    %c16 = arith.constant 16 : index
    %c0_10 = arith.constant 0 : index
    %c0_11 = arith.constant 0 : index
    %5 = vector.load %arg10[%c16, %c0_10, %c0_11] : memref<18x18x4xbf16, #tpu.memory_space<vmem>>, vector<1x18x4xbf16>
    tpu.vector_store %arg10[%c16, %c0_10, %c0_11], %4 {strides = array<i32>} : memref<18x18x4xbf16, #tpu.memory_space<vmem>>, vector<1x18x4xbf16>,
    %c0_12 = arith.constant 0 : index
    %c0_13 = arith.constant 0 : index
    %c0_14 = arith.constant 0 : index
    %c0_15 = arith.constant 0 : index
    %6 = vector.load %arg4[%c0_12, %c0_13, %c0_14, %c0_15] : memref<1x1x18x4xbf16, #tpu.memory_space<vmem>>, vector<1x1x18x4xbf16>
    %7 = vector.shape_cast %6 : vector<1x1x18x4xbf16> to vector<1x18x4xbf16>
    %c17 = arith.constant 17 : index
    %c0_16 = arith.constant 0 : index
    %c0_17 = arith.constant 0 : index
    %8 = vector.load %arg10[%c17, %c0_16, %c0_17] : memref<18x18x4xbf16, #tpu.memory_space<vmem>>, vector<1x18x4xbf16>
    tpu.vector_store %arg10[%c17, %c0_16, %c0_17], %7 {strides = array<i32>} : memref<18x18x4xbf16, #tpu.memory_space<vmem>>, vector<1x18x4xbf16>,
    %cst = arith.constant 0.000000e+00 : f32
    %9 = vector.broadcast %cst : f32 to vector<256x4xf32>
    %c0_18 = arith.constant 0 : index
    %c0_19 = arith.constant 0 : index
    %c0_20 = arith.constant 0 : index
    %10 = vector.load %arg10[%c0_18, %c0_19, %c0_20] : memref<18x18x4xbf16, #tpu.memory_space<vmem>>, vector<16x16x4xbf16>
    %11 = vector.shape_cast %10 : vector<16x16x4xbf16> to vector<256x4xbf16>
    %c0_21 = arith.constant 0 : index
    %c0_22 = arith.constant 0 : index
    %c0_23 = arith.constant 0 : index
    %12 = vector.load %arg5[%c0_21, %c0_22, %c0_23] : memref<9x4x4xbf16, #tpu.memory_space<vmem>>, vector<1x4x4xbf16>
    %13 = vector.shape_cast %12 : vector<1x4x4xbf16> to vector<4x4xbf16>
    %cst_24 = arith.constant dense<0.000000e+00> : vector<256x4xf32>
    %14 = tpu.matmul %11, %13, %cst_24 {dimension_numbers = #tpu.dot_dimension_numbers<[1], [0], [0], [1], [0, 0, 1, 1], [], []>} : vector<256x4xbf16>, vector<4x4xbf16>, vector<256x4xf32> -> vector<256x4xf32>
    %15 = arith.addf %9, %14 : vector<256x4xf32>
    %c0_25 = arith.constant 0 : index
    %c1 = arith.constant 1 : index
    %c0_26 = arith.constant 0 : index
    %16 = vector.load %arg10[%c0_25, %c1, %c0_26] : memref<18x18x4xbf16, #tpu.memory_space<vmem>>, vector<16x16x4xbf16>
    %17 = vector.shape_cast %16 : vector<16x16x4xbf16> to vector<256x4xbf16>
    %c1_27 = arith.constant 1 : index
    %c0_28 = arith.constant 0 : index
    %c0_29 = arith.constant 0 : index
    %18 = vector.load %arg5[%c1_27, %c0_28, %c0_29] : memref<9x4x4xbf16, #tpu.memory_space<vmem>>, vector<1x4x4xbf16>
    %19 = vector.shape_cast %18 : vector<1x4x4xbf16> to vector<4x4xbf16>
    %cst_30 = arith.constant dense<0.000000e+00> : vector<256x4xf32>
    %20 = tpu.matmul %17, %19, %cst_30 {dimension_numbers = #tpu.dot_dimension_numbers<[1], [0], [0], [1], [0, 0, 1, 1], [], []>} : vector<256x4xbf16>, vector<4x4xbf16>, vector<256x4xf32> -> vector<256x4xf32>
    %21 = arith.addf %15, %20 : vector<256x4xf32>
    %c0_31 = arith.constant 0 : index
    %c2 = arith.constant 2 : index
    %c0_32 = arith.constant 0 : index
    %22 = vector.load %arg10[%c0_31, %c2, %c0_32] : memref<18x18x4xbf16, #tpu.memory_space<vmem>>, vector<16x16x4xbf16>
    %23 = vector.shape_cast %22 : vector<16x16x4xbf16> to vector<256x4xbf16>
    %c2_33 = arith.constant 2 : index
    %c0_34 = arith.constant 0 : index
    %c0_35 = arith.constant 0 : index
    %24 = vector.load %arg5[%c2_33, %c0_34, %c0_35] : memref<9x4x4xbf16, #tpu.memory_space<vmem>>, vector<1x4x4xbf16>
    %25 = vector.shape_cast %24 : vector<1x4x4xbf16> to vector<4x4xbf16>
    %cst_36 = arith.constant dense<0.000000e+00> : vector<256x4xf32>
    %26 = tpu.matmul %23, %25, %cst_36 {dimension_numbers = #tpu.dot_dimension_numbers<[1], [0], [0], [1], [0, 0, 1, 1], [], []>} : vector<256x4xbf16>, vector<4x4xbf16>, vector<256x4xf32> -> vector<256x4xf32>
    %27 = arith.addf %21, %26 : vector<256x4xf32>
    %c1_37 = arith.constant 1 : index
    %c0_38 = arith.constant 0 : index
    %c0_39 = arith.constant 0 : index
    %28 = vector.load %arg10[%c1_37, %c0_38, %c0_39] : memref<18x18x4xbf16, #tpu.memory_space<vmem>>, vector<16x16x4xbf16>
    %29 = vector.shape_cast %28 : vector<16x16x4xbf16> to vector<256x4xbf16>
    %c3 = arith.constant 3 : index
    %c0_40 = arith.constant 0 : index
    %c0_41 = arith.constant 0 : index
    %30 = vector.load %arg5[%c3, %c0_40, %c0_41] : memref<9x4x4xbf16, #tpu.memory_space<vmem>>, vector<1x4x4xbf16>
    %31 = vector.shape_cast %30 : vector<1x4x4xbf16> to vector<4x4xbf16>
    %cst_42 = arith.constant dense<0.000000e+00> : vector<256x4xf32>
    %32 = tpu.matmul %29, %31, %cst_42 {dimension_numbers = #tpu.dot_dimension_numbers<[1], [0], [0], [1], [0, 0, 1, 1], [], []>} : vector<256x4xbf16>, vector<4x4xbf16>, vector<256x4xf32> -> vector<256x4xf32>
    %33 = arith.addf %27, %32 : vector<256x4xf32>
    %c1_43 = arith.constant 1 : index
    %c1_44 = arith.constant 1 : index
    %c0_45 = arith.constant 0 : index
    %34 = vector.load %arg10[%c1_43, %c1_44, %c0_45] : memref<18x18x4xbf16, #tpu.memory_space<vmem>>, vector<16x16x4xbf16>
    %35 = vector.shape_cast %34 : vector<16x16x4xbf16> to vector<256x4xbf16>
    %c4 = arith.constant 4 : index
    %c0_46 = arith.constant 0 : index
    %c0_47 = arith.constant 0 : index
    %36 = vector.load %arg5[%c4, %c0_46, %c0_47] : memref<9x4x4xbf16, #tpu.memory_space<vmem>>, vector<1x4x4xbf16>
    %37 = vector.shape_cast %36 : vector<1x4x4xbf16> to vector<4x4xbf16>
    %cst_48 = arith.constant dense<0.000000e+00> : vector<256x4xf32>
    %38 = tpu.matmul %35, %37, %cst_48 {dimension_numbers = #tpu.dot_dimension_numbers<[1], [0], [0], [1], [0, 0, 1, 1], [], []>} : vector<256x4xbf16>, vector<4x4xbf16>, vector<256x4xf32> -> vector<256x4xf32>
    %39 = arith.addf %33, %38 : vector<256x4xf32>
    %c1_49 = arith.constant 1 : index
    %c2_50 = arith.constant 2 : index
    %c0_51 = arith.constant 0 : index
    %40 = vector.load %arg10[%c1_49, %c2_50, %c0_51] : memref<18x18x4xbf16, #tpu.memory_space<vmem>>, vector<16x16x4xbf16>
    %41 = vector.shape_cast %40 : vector<16x16x4xbf16> to vector<256x4xbf16>
    %c5 = arith.constant 5 : index
    %c0_52 = arith.constant 0 : index
    %c0_53 = arith.constant 0 : index
    %42 = vector.load %arg5[%c5, %c0_52, %c0_53] : memref<9x4x4xbf16, #tpu.memory_space<vmem>>, vector<1x4x4xbf16>
    %43 = vector.shape_cast %42 : vector<1x4x4xbf16> to vector<4x4xbf16>
    %cst_54 = arith.constant dense<0.000000e+00> : vector<256x4xf32>
    %44 = tpu.matmul %41, %43, %cst_54 {dimension_numbers = #tpu.dot_dimension_numbers<[1], [0], [0], [1], [0, 0, 1, 1], [], []>} : vector<256x4xbf16>, vector<4x4xbf16>, vector<256x4xf32> -> vector<256x4xf32>
    %45 = arith.addf %39, %44 : vector<256x4xf32>
    %c2_55 = arith.constant 2 : index
    %c0_56 = arith.constant 0 : index
    %c0_57 = arith.constant 0 : index
    %46 = vector.load %arg10[%c2_55, %c0_56, %c0_57] : memref<18x18x4xbf16, #tpu.memory_space<vmem>>, vector<16x16x4xbf16>
    %47 = vector.shape_cast %46 : vector<16x16x4xbf16> to vector<256x4xbf16>
    %c6 = arith.constant 6 : index
    %c0_58 = arith.constant 0 : index
    %c0_59 = arith.constant 0 : index
    %48 = vector.load %arg5[%c6, %c0_58, %c0_59] : memref<9x4x4xbf16, #tpu.memory_space<vmem>>, vector<1x4x4xbf16>
    %49 = vector.shape_cast %48 : vector<1x4x4xbf16> to vector<4x4xbf16>
    %cst_60 = arith.constant dense<0.000000e+00> : vector<256x4xf32>
    %50 = tpu.matmul %47, %49, %cst_60 {dimension_numbers = #tpu.dot_dimension_numbers<[1], [0], [0], [1], [0, 0, 1, 1], [], []>} : vector<256x4xbf16>, vector<4x4xbf16>, vector<256x4xf32> -> vector<256x4xf32>
    %51 = arith.addf %45, %50 : vector<256x4xf32>
    %c2_61 = arith.constant 2 : index
    %c1_62 = arith.constant 1 : index
    %c0_63 = arith.constant 0 : index
    %52 = vector.load %arg10[%c2_61, %c1_62, %c0_63] : memref<18x18x4xbf16, #tpu.memory_space<vmem>>, vector<16x16x4xbf16>
    %53 = vector.shape_cast %52 : vector<16x16x4xbf16> to vector<256x4xbf16>
    %c7 = arith.constant 7 : index
    %c0_64 = arith.constant 0 : index
    %c0_65 = arith.constant 0 : index
    %54 = vector.load %arg5[%c7, %c0_64, %c0_65] : memref<9x4x4xbf16, #tpu.memory_space<vmem>>, vector<1x4x4xbf16>
    %55 = vector.shape_cast %54 : vector<1x4x4xbf16> to vector<4x4xbf16>
    %cst_66 = arith.constant dense<0.000000e+00> : vector<256x4xf32>
    %56 = tpu.matmul %53, %55, %cst_66 {dimension_numbers = #tpu.dot_dimension_numbers<[1], [0], [0], [1], [0, 0, 1, 1], [], []>} : vector<256x4xbf16>, vector<4x4xbf16>, vector<256x4xf32> -> vector<256x4xf32>
    %57 = arith.addf %51, %56 : vector<256x4xf32>
    %c2_67 = arith.constant 2 : index
    %c2_68 = arith.constant 2 : index
    %c0_69 = arith.constant 0 : index
    %58 = vector.load %arg10[%c2_67, %c2_68, %c0_69] : memref<18x18x4xbf16, #tpu.memory_space<vmem>>, vector<16x16x4xbf16>
    %59 = vector.shape_cast %58 : vector<16x16x4xbf16> to vector<256x4xbf16>
    %c8 = arith.constant 8 : index
    %c0_70 = arith.constant 0 : index
    %c0_71 = arith.constant 0 : index
    %60 = vector.load %arg5[%c8, %c0_70, %c0_71] : memref<9x4x4xbf16, #tpu.memory_space<vmem>>, vector<1x4x4xbf16>
    %61 = vector.shape_cast %60 : vector<1x4x4xbf16> to vector<4x4xbf16>
    %cst_72 = arith.constant dense<0.000000e+00> : vector<256x4xf32>
    %62 = tpu.matmul %59, %61, %cst_72 {dimension_numbers = #tpu.dot_dimension_numbers<[1], [0], [0], [1], [0, 0, 1, 1], [], []>} : vector<256x4xbf16>, vector<4x4xbf16>, vector<256x4xf32> -> vector<256x4xf32>
    %63 = arith.addf %57, %62 : vector<256x4xf32>
    %c0_73 = arith.constant 0 : index
    %c0_74 = arith.constant 0 : index
    %64 = vector.load %arg6[%c0_73, %c0_74] : memref<1x4xf32, #tpu.memory_space<vmem>>, vector<1x4xf32>
    %65 = vector.broadcast %64 : vector<1x4xf32> to vector<256x4xf32>
    %66 = arith.addf %63, %65 : vector<256x4xf32>
    %cst_75 = arith.constant 0.000000e+00 : f32
    %67 = vector.broadcast %cst_75 : f32 to vector<256x4xf32>
    %68 = arith.maximumf %66, %67 : vector<256x4xf32>
    %69 = arith.truncf %68 : vector<256x4xf32> to vector<256x4xbf16>
    %c0_76 = arith.constant 0 : index
    %c0_77 = arith.constant 0 : index
    %70 = vector.load %arg7[%c0_76, %c0_77] : memref<4x128xbf16, #tpu.memory_space<vmem>>, vector<4x128xbf16>
    %cst_78 = arith.constant dense<0.000000e+00> : vector<256x128xf32>
    %71 = tpu.matmul %69, %70, %cst_78 {dimension_numbers = #tpu.dot_dimension_numbers<[1], [0], [0], [1], [0, 0, 1, 1], [], []>} : vector<256x4xbf16>, vector<4x128xbf16>, vector<256x128xf32> -> vector<256x128xf32>
    %c0_79 = arith.constant 0 : index
    %c0_80 = arith.constant 0 : index
    %72 = vector.load %arg8[%c0_79, %c0_80] : memref<1x128xf32, #tpu.memory_space<vmem>>, vector<1x128xf32>
    %73 = vector.broadcast %72 : vector<1x128xf32> to vector<256x128xf32>
    %74 = arith.addf %71, %73 : vector<256x128xf32>
    %75 = vector.shape_cast %74 : vector<256x128xf32> to vector<16x16x128xf32>
    %c0_81 = arith.constant 0 : index
    %c0_82 = arith.constant 0 : index
    %c0_83 = arith.constant 0 : index
    %c0_84 = arith.constant 0 : index
    %76 = vector.load %arg9[%c0_81, %c0_82, %c0_83, %c0_84] : memref<1x16x16x128xf32, #tpu.memory_space<vmem>>, vector<1x16x16x128xf32>
    %77 = vector.shape_cast %76 : vector<1x16x16x128xf32> to vector<16x16x128xf32>
    %78 = vector.shape_cast %75 : vector<16x16x128xf32> to vector<1x16x16x128xf32>
    tpu.vector_store %arg9[%c0_81, %c0_82, %c0_83, %c0_84], %78 {strides = array<i32>} : memref<1x16x16x128xf32, #tpu.memory_space<vmem>>, vector<1x16x16x128xf32>,
    return
  }
  func.func @transform_0(%arg0: i32, %arg1: i32) -> (i32, i32, i32, i32) {
    %c0_i32 = arith.constant 0 : i32
    %c0_i32_0 = arith.constant 0 : i32
    %c0_i32_1 = arith.constant 0 : i32
    return %arg0, %arg1, %c0_i32, %c0_i32_0 : i32, i32, i32, i32
  }
  func.func @transform_1(%arg0: i32, %arg1: i32) -> (i32, i32, i32, i32) {
    %c16_i32 = arith.constant 16 : i32
    %0 = arith.muli %arg1, %c16_i32 : i32
    %c16_i32_0 = arith.constant 16 : i32
    %1 = arith.addi %0, %c16_i32_0 : i32
    %c0_i32 = arith.constant 0 : i32
    %c0_i32_1 = arith.constant 0 : i32
    %c0_i32_2 = arith.constant 0 : i32
    return %arg0, %1, %c0_i32, %c0_i32_1 : i32, i32, i32, i32
  }
  func.func @transform_2(%arg0: i32, %arg1: i32) -> (i32, i32, i32, i32) {
    %c16_i32 = arith.constant 16 : i32
    %0 = arith.muli %arg1, %c16_i32 : i32
    %c16_i32_0 = arith.constant 16 : i32
    %1 = arith.addi %0, %c16_i32_0 : i32
    %c1_i32 = arith.constant 1 : i32
    %2 = arith.addi %1, %c1_i32 : i32
    %c0_i32 = arith.constant 0 : i32
    %c0_i32_1 = arith.constant 0 : i32
    %c0_i32_2 = arith.constant 0 : i32
    return %arg0, %2, %c0_i32, %c0_i32_1 : i32, i32, i32, i32
  }
  func.func @transform_3(%arg0: i32, %arg1: i32) -> (i32, i32, i32) {
    %c0_i32 = arith.constant 0 : i32
    %c0_i32_0 = arith.constant 0 : i32
    %c0_i32_1 = arith.constant 0 : i32
    %c0_i32_2 = arith.constant 0 : i32
    return %c0_i32, %c0_i32_0, %c0_i32_1 : i32, i32, i32
  }
  func.func @transform_4(%arg0: i32, %arg1: i32) -> (i32, i32) {
    %c0_i32 = arith.constant 0 : i32
    %c0_i32_0 = arith.constant 0 : i32
    %c0_i32_1 = arith.constant 0 : i32
    return %c0_i32, %c0_i32_0 : i32, i32
  }
  func.func @transform_5(%arg0: i32, %arg1: i32) -> (i32, i32) {
    %c0_i32 = arith.constant 0 : i32
    %c0_i32_0 = arith.constant 0 : i32
    %c0_i32_1 = arith.constant 0 : i32
    return %c0_i32, %c0_i32_0 : i32, i32
  }
  func.func @transform_6(%arg0: i32, %arg1: i32) -> (i32, i32) {
    %c0_i32 = arith.constant 0 : i32
    %c0_i32_0 = arith.constant 0 : i32
    %c0_i32_1 = arith.constant 0 : i32
    return %c0_i32, %c0_i32_0 : i32, i32
  }
  func.func @transform_7(%arg0: i32, %arg1: i32) -> (i32, i32, i32, i32) {
    %c0_i32 = arith.constant 0 : i32
    %c0_i32_0 = arith.constant 0 : i32
    %c0_i32_1 = arith.constant 0 : i32
    return %arg0, %arg1, %c0_i32, %c0_i32_0 : i32, i32, i32, i32
  }
}

</mosaic_0001>

<bundles_post_ra>
// kernel: tpu_custom_call.1
= control target key start
LH: loop header
LB: loop body
LE: loop exit
PB: predicated region body
PF: predicated region fallthrough
CT: control target
= control target key end

     0   :  { %12 = vsyncpa [#allocation4], 0  ;;  %s8881_s0 = inlined_call_operand.vmem [shape: bf16[2,18,18,4], index: 0, kind: input, shape index: {}]   ;;  %s8882_s1 = inlined_call_operand.vmem [shape: bf16[2,18,18,4], index: 1, kind: input, shape index: {}]   ;;  %s8883_s2 = inlined_call_operand.vmem [shape: bf16[2,18,18,4], index: 2, kind: input, shape index: {}]   ;;  %s8884_s3 = inlined_call_operand.vmem [shape: bf16[9,4,4], index: 3, kind: input, shape index: {}]   ;;  %s8885_s4 = inlined_call_operand.vmem [shape: f32[1,4], index: 4, kind: input, shape index: {}]   ;;  %s8886_s5 = inlined_call_operand.vmem [shape: bf16[4,128], index: 5, kind: input, shape index: {}]   ;;  %s8887_s6 = inlined_call_operand.vmem [shape: f32[1,128], index: 6, kind: input, shape index: {}]   ;;  %s8888_s7 = inlined_call_operand.hbm [shape: f32[2,16,16,128], index: 7, kind: output, shape index: {}]  }
   0x1   :  { %14 = vsyncpa [#allocation4 + $0x1], 0  ;;  %s7009_s24 = smov 0   ;;  %s7011_s25 = smov 0  }
   0x2   :  { %s7013_s26 = smov 0   ;;  %s7015_s27 = smov 0  }
   0x3   :  { %s7017_s28 = smov 0   ;;  %s7019_s29 = smov 0  }
   0x4 LB: > { %s5584_s30 = sadd.s32 4294967295, %s6964_s29   ;;  %s5585_s8 = sadd.s32 4294967294, %s6964_s29   ;;  %s6964_s29 = sphi %s7019_s29, %s20_s29   ;;  %s6960_s28 = sphi %s7017_s28, %s8987_s28   ;;  %s6956_s27 = sphi %s7015_s27, %s8986_s27   ;;  %s6952_s26 = sphi %s7013_s26, %s8985_s26   ;;  %s6948_s25 = sphi %s7011_s25, %s8984_s25   ;;  %s6944_s24 = sphi %s7009_s24, %s8983_s24  }
   0x5   : > { %s32_s9 = sadd.s32 1, %s6960_s28  ;;  %s217_s10 = sadd.s32 1, %s6952_s26 }
   0x6   : > { %p34_p0 = scmp.ge.s32.totalorder %s32_s9, 2  ;;  %p227_p1 = scmp.ne.s32.totalorder %s6952_s26, %s6948_s25 }
   0x7   : > { %p228_p2 = scmp.eq.s32.totalorder %s5584_s30, 1  ;;  %p233_p3 = scmp.ne.s32.totalorder %s6948_s25, %s6944_s24 }
   0x8   : > { %s8989_s9 = smov (%p34_p0, %s32_s9), 0  ;;  %p234_p5 = scmp.eq.s32.totalorder %s5585_s8, 1 }
   0x9   : > { %p7049_p4 = por %p228_p2, %p227_p1  ;;  %s212_s12 = ssub.s32 %s6960_s28, %s8989_s9 }
   0xa   : > { %p5588_p6 = scmp.ge.s32.totalorder %s6964_s29, 1  ;;  %p215_p7 = scmp.eq.s32.totalorder %s212_s12, 0 }
   0xb   : > { %p7056_p8 = por %p234_p5, %p233_p3  ;;  %p320_p9 = scmp.lt.s32.totalorder %s6964_s29, 3 }
   0xc   : > { %s7062_s14 = scalar_select %p215_p7, %s6952_s26, %s217_s10  }
   0xd   : > { %p321_p10 = pnand %p5588_p6, %p320_p9 }
   0xf   : > { %324 = sbr.rel (%p321_p10) target bundleno = 905 (0x389), region = 48 }
  0x16   : > { %vm1080_vm0 = vcmask 1041408   ;;  %v5740_v0 = vld [vmem:[%s8884_s3 + $0x8] sm:$0x3]  ;;  %v5593_v1 = vld [vmem:[%s8884_s3 + $0x2] sm:$0x3]  ;;  %p390_p11 = scmp.lt.s32.totalorder %s6956_s27, 1 }
  0x17   : > { %6735 = vmatprep.subr.msk.bf16.mxu0 %vm1080_vm0, %v5740_v0  ;;  %6731 = vmatprep.subr.msk.bf16.mxu1 %vm1080_vm0, %v5593_v1  ;;  %v2884_v2 = vsel %vm1080_vm0, %v5740_v0, 0  ;;  %v1082_v3 = vsel %vm1080_vm0, %v5593_v1, 0  ;;  %v7078_v4 = vld [vmem:[%s8884_s3 + $0xa] sm:$0x3]  ;;  %vm481_vm1 = vcmask 27648   ;;  %vm484_vm2 = vcmask 24576  }
  0x18   : > { %6272 = vmatpush3.bf16.msra.mxu0 %v2884_v2  ;;  %6136 = vmatpush3.bf16.msra.mxu1 %v1082_v3  ;;  %s391_s21 = scalar_select %p390_p11, %s6956_s27, 1  ;;  %vm594_vm3 = vsmask.f32 3328  ;;  %vm595_vm4 = vsmask.f32 7440  ;;  %v8912_v53 = vmov 0 }
  0x19   : > { %6736 = vmatprep.subr.msk.bf16.mxu0 %vm1080_vm0, %v7078_v4  ;;  %vm7148_vm5 = vmor %vm594_vm3, %vm595_vm4  ;;  %vm1031_vm6 = vcmask 31744   ;;  %v7154_v61 = vsel %vm1080_vm0, %v7078_v4, 0  ;;  %vm1585_vm7 = vcmask 1042432   ;;  %vm1586_vm8 = vcmask 1046532   ;;  %s6966_s23 = smov [#allocation3]  }
  0x1a   : > { %s7083_s22 = smul.u32 216, %s391_s21  ;;  %v8913_v53 = vsel %vm7148_vm5, 4294967295, %v8912_v53  ;;  %vm7523_vm9 = vmor %vm1585_vm7, %vm1586_vm8 }
  0x1b   : > { %8914 = vst [vmem:[#allocation6_spill] sm:$0xff] %v8913_v53 }
  0x1c   : > { %s7089_s8 = scalar_lea.vmem %s8881_s0, %s7083_s22  ;;  %s5961_s10 = sadd.s32 192, %s7083_s22 }
  0x1d   : > { %v433_v5 = vld [vmem:[%s7089_s8] sm:$0xf]  ;;  %v434_v6 = vld [vmem:[%s7089_s8 + $0x4] sm:$0xf]  ;;  %v435_v7 = vld [vmem:[%s7089_s8 + $0x8] sm:$0x1]  ;;  %s7303_s16 = scalar_lea.vmem %s8882_s1, %s5961_s10 }
  0x1e   : > { %482 = vst.msk [vmem:[#allocation2] sm:$0xf] %vm481_vm1, %v433_v5  ;;  %483 = vst.msk [vmem:[#allocation2 + $0x4] sm:$0xf] %vm481_vm1, %v434_v6  ;;  %v436_v8 = vld [vmem:[%s7089_s8 + $0xc] sm:$0xf] }
  0x1f   : > { %485 = vst.msk [vmem:[#allocation2 + $0x8] sm:$0x1] %vm484_vm2, %v435_v7  ;;  %v437_v9 = vld [vmem:[%s7089_s8 + $0x10] sm:$0xf]  ;;  %v438_v10 = vld [vmem:[%s7089_s8 + $0x14] sm:$0x1] }
  0x20   : > { %486 = vst.msk [vmem:[#allocation2 + $0xc] sm:$0xf] %vm481_vm1, %v436_v8  ;;  %487 = vst.msk [vmem:[#allocation2 + $0x10] sm:$0xf] %vm481_vm1, %v437_v9  ;;  %v439_v11 = vld [vmem:[%s7089_s8 + $0x18] sm:$0xf] }
  0x21   : > { %488 = vst.msk [vmem:[#allocation2 + $0x14] sm:$0x1] %vm484_vm2, %v438_v10  ;;  %v440_v12 = vld [vmem:[%s7089_s8 + $0x1c] sm:$0xf]  ;;  %v441_v13 = vld [vmem:[%s7089_s8 + $0x20] sm:$0x1] }
  0x22   : > { %489 = vst.msk [vmem:[#allocation2 + $0x18] sm:$0xf] %vm481_vm1, %v439_v11  ;;  %490 = vst.msk [vmem:[#allocation2 + $0x1c] sm:$0xf] %vm481_vm1, %v440_v12  ;;  %v442_v14 = vld [vmem:[%s7089_s8 + $0x24] sm:$0xf] }
  0x23   : > { %491 = vst.msk [vmem:[#allocation2 + $0x20] sm:$0x1] %vm484_vm2, %v441_v13  ;;  %v443_v15 = vld [vmem:[%s7089_s8 + $0x28] sm:$0xf]  ;;  %v444_v16 = vld [vmem:[%s7089_s8 + $0x2c] sm:$0x1] }
  0x24   : > { %492 = vst.msk [vmem:[#allocation2 + $0x24] sm:$0xf] %vm481_vm1, %v442_v14  ;;  %493 = vst.msk [vmem:[#allocation2 + $0x28] sm:$0xf] %vm481_vm1, %v443_v15  ;;  %v445_v17 = vld [vmem:[%s7089_s8 + $0x30] sm:$0xf] }
  0x25   : > { %494 = vst.msk [vmem:[#allocation2 + $0x2c] sm:$0x1] %vm484_vm2, %v444_v16  ;;  %v446_v18 = vld [vmem:[%s7089_s8 + $0x34] sm:$0xf]  ;;  %v447_v19 = vld [vmem:[%s7089_s8 + $0x38] sm:$0x1] }
  0x26   : > { %495 = vst.msk [vmem:[#allocation2 + $0x30] sm:$0xf] %vm481_vm1, %v445_v17  ;;  %496 = vst.msk [vmem:[#allocation2 + $0x34] sm:$0xf] %vm481_vm1, %v446_v18  ;;  %v448_v20 = vld [vmem:[%s7089_s8 + $0x3c] sm:$0xf] }
  0x27   : > { %497 = vst.msk [vmem:[#allocation2 + $0x38] sm:$0x1] %vm484_vm2, %v447_v19  ;;  %v449_v21 = vld [vmem:[%s7089_s8 + $0x40] sm:$0xf]  ;;  %v450_v22 = vld [vmem:[%s7089_s8 + $0x44] sm:$0x1] }
  0x28   : > { %498 = vst.msk [vmem:[#allocation2 + $0x3c] sm:$0xf] %vm481_vm1, %v448_v20  ;;  %499 = vst.msk [vmem:[#allocation2 + $0x40] sm:$0xf] %vm481_vm1, %v449_v21  ;;  %v451_v23 = vld [vmem:[%s7089_s8 + $0x48] sm:$0xf] }
  0x29   : > { %500 = vst.msk [vmem:[#allocation2 + $0x44] sm:$0x1] %vm484_vm2, %v450_v22  ;;  %v452_v24 = vld [vmem:[%s7089_s8 + $0x4c] sm:$0xf]  ;;  %v453_v25 = vld [vmem:[%s7089_s8 + $0x50] sm:$0x1] }
  0x2a   : > { %501 = vst.msk [vmem:[#allocation2 + $0x48] sm:$0xf] %vm481_vm1, %v451_v23  ;;  %502 = vst.msk [vmem:[#allocation2 + $0x4c] sm:$0xf] %vm481_vm1, %v452_v24  ;;  %v454_v26 = vld [vmem:[%s7089_s8 + $0x54] sm:$0xf] }
  0x2b   : > { %503 = vst.msk [vmem:[#allocation2 + $0x50] sm:$0x1] %vm484_vm2, %v453_v25  ;;  %v455_v27 = vld [vmem:[%s7089_s8 + $0x58] sm:$0xf]  ;;  %v456_v28 = vld [vmem:[%s7089_s8 + $0x5c] sm:$0x1] }
  0x2c   : > { %v545_v29 = vld [vmem:[#allocation2] sm:$0xf]  ;;  %v546_v30 = vld [vmem:[#allocation2 + $0x4] sm:$0xf]  ;;  %v578_v31 = vld [vmem:[#allocation2 + $0x8] sm:$0x1] }
  0x2d   : > { %504 = vst.msk [vmem:[#allocation2 + $0x54] sm:$0xf] %vm481_vm1, %v454_v26  ;;  %505 = vst.msk [vmem:[#allocation2 + $0x58] sm:$0xf] %vm481_vm1, %v455_v27  ;;  %v598_v32 = vshrl.u32 %v545_v29, 16  ;;  %v601_v33 = vshll.u32 %v545_v29, 16 }
  0x2e   : > { %506 = vst.msk [vmem:[#allocation2 + $0x5c] sm:$0x1] %vm484_vm2, %v456_v28  ;;  %v607_v34 = vshll.u32 %v546_v30, 16  ;;  %v611_v35 = vshrl.u32 %v546_v30, 16  ;;  %v2353_v36 = vld [vmem:[#allocation2 + $0xc] sm:$0xf] }
  0x2f   : > { %v617_v37 = vshll.u32 %v578_v31, 16  ;;  %v7139_v38 = vld [vmem:[#allocation2 + $0x10] sm:$0xf]  ;;  %v7141_v39 = vld [vmem:[#allocation2 + $0x14] sm:$0x1]  ;;  %v600_v40 = vrot.slane %v598_v32, 4 }
  0x30   : > { %v603_v41 = vrot.slane %v601_v33, 5  ;;  %v609_v42 = vrot.slane %v607_v34, 5  ;;  %v613_v43 = vrot.slane %v611_v35, 4  ;;  %v2402_v45 = vshrl.u32 %v2353_v36, 16  ;;  %v547_v52 = vld [vmem:[#allocation2 + $0xc] sm:$0xf] }
  0x31   : > { %v619_v44 = vrot.slane %v617_v37, 5  ;;  %v2405_v46 = vshll.u32 %v2353_v36, 16  ;;  %v2411_v47 = vshll.u32 %v7139_v38, 16  ;;  %v2415_v50 = vshrl.u32 %v7139_v38, 16  ;;  %v548_v57 = vld [vmem:[#allocation2 + $0x10] sm:$0xf] }
  0x32   : > { %v604_v48 = vor.u32 %v603_v41, %v600_v40  ;;  %v614_v49 = vor.u32 %v613_v43, %v609_v42  ;;  %v2421_v51 = vshll.u32 %v7141_v39, 16  ;;  %v2404_v54 = vrot.slane %v2402_v45, 4  ;;  %v579_v0 = vld [vmem:[#allocation2 + $0x14] sm:$0x1]  ;;  %v2356_v12 = vld [vmem:[#allocation2 + $0x18] sm:$0xf] }
  0x33   : > { %v2407_v55 = vrot.slane %v2405_v46, 5  ;;  %v2413_v56 = vrot.slane %v2411_v47, 5  ;;  %v2417_v60 = vrot.slane %v2415_v50, 4  ;;  %v622_v1 = vshrl.u32 %v547_v52, 16  ;;  %v7160_v16 = vld [vmem:[#allocation2 + $0x1c] sm:$0xf] }
  0x34   : > { %v605_v58 = vrot.slane %v604_v48, 4  ;;  %v615_v59 = vrot.slane %v614_v49, 4  ;;  %v2423_v63 = vrot.slane %v2421_v51, 5  ;;  %v625_v2 = vshll.u32 %v547_v52, 16  ;;  %v7167_v21 = vld [vmem:[#allocation2 + $0x20] sm:$0x1] }
  0x35   : > { %v2408_v62 = vor.u32 %v2407_v55, %v2404_v54  ;;  %v2418_v6 = vor.u32 %v2417_v60, %v2413_v56  ;;  %v631_v7 = vshll.u32 %v548_v57, 16  ;;  %v624_v10 = vrot.slane %v622_v1, 4  ;;  %v549_v34 = vld [vmem:[#allocation2 + $0x18] sm:$0xf]  ;;  %v550_v41 = vld [vmem:[#allocation2 + $0x1c] sm:$0xf] }
  0x36   : > { %v610_v3 = vsel %vm7148_vm5, %v605_v58, %v609_v42  ;;  %v620_v5 = vsel %vm7148_vm5, %v615_v59, %v619_v44  ;;  %v627_v11 = vrot.slane %v625_v2, 5  ;;  %v635_v14 = vshrl.u32 %v548_v57, 16  ;;  %v580_v48 = vld [vmem:[#allocation2 + $0x20] sm:$0x1]  ;;  %s5963_s30 = sadd.s32 204, %s7083_s22  ;;  %s381_s22 = sand.u32 1, %s6948_s25  }
  0x37   : > { %v5594_v8 = vcombine.low %v610_v3, %v620_v5  ;;  %v2409_v9 = vrot.slane %v2408_v62, 4  ;;  %v2419_v4 = vrot.slane %v2418_v6, 4  ;;  %v633_v13 = vrot.slane %v631_v7, 5  ;;  %v2360_v62 = vld [vmem:[#allocation2 + $0x28] sm:$0xf]  ;;  %s428_s10 = scalar_lea.vmem %s8883_s2, %s5963_s30  ;;  %s6890_s30 = sshll.u32 %s6966_s23, 4  ;;  %s6891_s30 = int_to_ptr.vmem [resolvable:$false] %s6890_s30 }
  0x38   : > { %v641_v15 = vshll.u32 %v579_v0, 16  ;;  %v3145_v18 = vrot.slane %v7139_v38, 5  ;;  %v3148_v19 = vrot.slane %v7141_v39, 5  ;;  %v628_v20 = vor.u32 %v627_v11, %v624_v10  ;;  %v2361_v6 = vld [vmem:[#allocation2 + $0x2c] sm:$0x1] }
  0x39   : > { %6137 = vmatprep.mubr.msk.bf16.mxu1 %vm1031_vm6, %v5594_v8  ;;  %v2414_v17 = vsel %vm7148_vm5, %v2409_v9, %v2413_v56  ;;  %v2424_v22 = vsel %vm7148_vm5, %v2419_v4, %v2423_v63  ;;  %v637_v23 = vrot.slane %v635_v14, 4  ;;  %v2426_v25 = vshrl.u32 %v2356_v12, 16  ;;  %v2359_v56 = vld [vmem:[#allocation2 + $0x24] sm:$0xf] }
  0x3a   : > { %v643_v24 = vrot.slane %v641_v15, 5  ;;  %v5741_v26 = vcombine.low %v2414_v17, %v2424_v22  ;;  %v629_v27 = vrot.slane %v628_v20, 4  ;;  %v2429_v28 = vshll.u32 %v2356_v12, 16  ;;  %v551_v4 = vld [vmem:[#allocation2 + $0x24] sm:$0xf] }
  0x3b   : > { %v2435_v29 = vshll.u32 %v7160_v16, 16  ;;  %v638_v30 = vor.u32 %v637_v23, %v633_v13  ;;  %v2428_v31 = vrot.slane %v2426_v25, 4  ;;  %v2439_v32 = vshrl.u32 %v7160_v16, 16  ;;  %v552_v20 = vld [vmem:[#allocation2 + $0x28] sm:$0xf] }
  0x3c   : > { %v2445_v33 = vshll.u32 %v7167_v21, 16  ;;  %6273 = vmatprep.mubr.msk.bf16.mxu0 %vm1031_vm6, %v5741_v26  ;;  %v634_v35 = vsel %vm7148_vm5, %v629_v27, %v633_v13  ;;  %v2431_v36 = vrot.slane %v2429_v28, 5  ;;  %v8889_v40 = vrot.slane %v7160_v16, 5  ;;  %v581_v28 = vld [vmem:[#allocation2 + $0x2c] sm:$0x1] }
  0x3d   : > { %v2437_v37 = vrot.slane %v2435_v29, 5  ;;  %v639_v42 = vrot.slane %v638_v30, 4  ;;  %v2441_v43 = vrot.slane %v2439_v32, 4  ;;  %v3155_v45 = vrot.slane %v7167_v21, 5 }
  0x3e   : > { %v2447_v44 = vrot.slane %v2445_v33, 5  ;;  %v2432_v46 = vor.u32 %v2431_v36, %v2428_v31  ;;  %v7181_v47 = vrot.slane %v8889_v40, 4  ;;  %v646_v49 = vshrl.u32 %v549_v34, 16 }
  0x3f   : > { %v649_v50 = vshll.u32 %v549_v34, 16  ;;  %v644_v51 = vsel %vm7148_vm5, %v639_v42, %v643_v24  ;;  %v2442_v52 = vor.u32 %v2441_v43, %v2437_v37  ;;  %v655_v54 = vshll.u32 %v550_v41, 16  ;;  %v2363_v43 = vld [vmem:[#allocation2 + $0x34] sm:$0xf] }
  0x40   : > { %v659_v55 = vshrl.u32 %v550_v41, 16  ;;  %v5595_v57 = vcombine.low %v634_v35, %v644_v51  ;;  %v2433_v58 = vrot.slane %v2432_v46, 4  ;;  %v648_v59 = vrot.slane %v646_v49, 4  ;;  %v2362_v35 = vld [vmem:[#allocation2 + $0x30] sm:$0xf] }
  0x41   : > { %v651_v60 = vrot.slane %v649_v50, 5  ;;  %v2443_v63 = vrot.slane %v2442_v52, 4  ;;  %v657_v0 = vrot.slane %v655_v54, 5  ;;  %v665_v2 = vshll.u32 %v580_v48, 16  ;;  %v2364_v51 = vld [vmem:[#allocation2 + $0x38] sm:$0x1] }
  0x42   : > { %v661_v1 = vrot.slane %v659_v55, 4  ;;  %6138 = vmatmul.mubr.msk.bf16.vlgmr.msra.gmra.mrb[0].mxu1 %vm1031_vm6, %v5595_v57  ;;  %v2438_v3 = vsel %vm7148_vm5, %v2433_v58, %v2437_v37  ;;  %v2450_v7 = vshrl.u32 %v2359_v56, 16  ;;  %v2453_v8 = vshll.u32 %v2359_v56, 16 }
  0x43   : > { %v652_v5 = vor.u32 %v651_v60, %v648_v59  ;;  %v2448_v9 = vsel %vm7148_vm5, %v2443_v63, %v2447_v44  ;;  %v667_v11 = vrot.slane %v665_v2, 5  ;;  %v2459_v12 = vshll.u32 %v2360_v62, 16  ;;  %v553_v59 = vld [vmem:[#allocation2 + $0x30] sm:$0xf] }
  0x44   : > { %v662_v10 = vor.u32 %v661_v1, %v657_v0  ;;  %v5742_v13 = vcombine.low %v2438_v3, %v2448_v9  ;;  %v2452_v15 = vrot.slane %v2450_v7, 4  ;;  %v2455_v17 = vrot.slane %v2453_v8, 5  ;;  %v554_v1 = vld [vmem:[#allocation2 + $0x34] sm:$0xf]  ;;  %v582_v7 = vld [vmem:[#allocation2 + $0x38] sm:$0x1] }
  0x45   : > { %v653_v14 = vrot.slane %v652_v5, 4  ;;  %v2461_v23 = vrot.slane %v2459_v12, 5  ;;  %v2463_v24 = vshrl.u32 %v2360_v62, 16  ;;  %v2469_v25 = vshll.u32 %v2361_v6, 16  ;;  %v457_v8 = vld [vmem:[%s7089_s8 + $0x60] sm:$0xf] }
  0x46   : > { %v663_v22 = vrot.slane %v662_v10, 4  ;;  %6274 = vmatmul.mubr.msk.bf16.vlgmr.msra.gmra.mrb[0].mxu0 %vm1031_vm6, %v5742_v13  ;;  %v2456_v27 = vor.u32 %v2455_v17, %v2452_v15  ;;  %v670_v29 = vshrl.u32 %v551_v4, 16  ;;  %v673_v30 = vshll.u32 %v551_v4, 16  ;;  %v2365_v4 = vld [vmem:[#allocation2 + $0x3c] sm:$0xf] }
  0x47   : > { %v658_v26 = vsel %vm7148_vm5, %v653_v14, %v657_v0  ;;  %6306 = vmatpush3.bf16.msra.mxu0 %v7154_v61  ;;  %v2465_v32 = vrot.slane %v2463_v24, 4  ;;  %v2471_v33 = vrot.slane %v2469_v25, 5  ;;  %v679_v34 = vshll.u32 %v552_v20, 16  ;;  %v458_v13 = vld [vmem:[%s7089_s8 + $0x64] sm:$0xf] }
  0x48   : > { %v668_v31 = vsel %vm7148_vm5, %v663_v22, %v667_v11  ;;  %v2457_v37 = vrot.slane %v2456_v27, 4  ;;  %v672_v41 = vrot.slane %v670_v29, 4  ;;  %v675_v42 = vrot.slane %v673_v30, 5  ;;  %v459_v14 = vld [vmem:[%s7089_s8 + $0x68] sm:$0x1] }
  0x49   : > { %v5596_v36 = vcombine.low %v658_v26, %v668_v31  ;;  %v2466_v44 = vor.u32 %v2465_v32, %v2461_v23  ;;  %v681_v46 = vrot.slane %v679_v34, 5  ;;  %v683_v48 = vshrl.u32 %v552_v20, 16  ;;  %507 = vst.msk [vmem:[#allocation2 + $0x60] sm:$0xf] %vm481_vm1, %v457_v8  ;;  %508 = vst.msk [vmem:[#allocation2 + $0x64] sm:$0xf] %vm481_vm1, %v458_v13 }
  0x4a   : > { %v689_v49 = vshll.u32 %v581_v28, 16  ;;  %v2462_v61 = vsel %vm7148_vm5, %v2457_v37, %v2461_v23  ;;  %v676_v50 = vor.u32 %v675_v42, %v672_v41  ;;  %v2474_v52 = vshrl.u32 %v2362_v35, 16  ;;  %v2366_v23 = vld [vmem:[#allocation2 + $0x40] sm:$0xf]  ;;  %509 = vst.msk [vmem:[#allocation2 + $0x68] sm:$0x1] %vm484_vm2, %v459_v14 }
  0x4b   : > { %6141 = vmatprep.mubr.msk.bf16.mxu1 %vm1031_vm6, %v5596_v36  ;;  %v2477_v54 = vshll.u32 %v2362_v35, 16  ;;  %v2467_v55 = vrot.slane %v2466_v44, 4  ;;  %v685_v56 = vrot.slane %v683_v48, 4  ;;  %v2483_v58 = vshll.u32 %v2363_v43, 16  ;;  %v460_v24 = vld [vmem:[%s7089_s8 + $0x6c] sm:$0xf] }
  0x4c   : > { %v691_v57 = vrot.slane %v689_v49, 5  ;;  %v677_v60 = vrot.slane %v676_v50, 4  ;;  %v2476_v62 = vrot.slane %v2474_v52, 4  ;;  %v2487_v0 = vshrl.u32 %v2363_v43, 16  ;;  %v461_v29 = vld [vmem:[%s7089_s8 + $0x70] sm:$0xf] }
  0x4d   : > { %v2479_v63 = vrot.slane %v2477_v54, 5  ;;  %v2472_v2 = vsel %vm7148_vm5, %v2467_v55, %v2471_v33  ;;  %v686_v3 = vor.u32 %v685_v56, %v681_v46  ;;  %v2485_v5 = vrot.slane %v2483_v58, 5  ;;  %510 = vst.msk [vmem:[#allocation2 + $0x6c] sm:$0xf] %vm481_vm1, %v460_v24  ;;  %v2367_v34 = vld [vmem:[#allocation2 + $0x44] sm:$0x1] }
  0x4e   : > { %v2493_v6 = vshll.u32 %v2364_v51, 16  ;;  %v5743_v9 = vcombine.low %v2462_v61, %v2472_v2  ;;  %v682_v10 = vsel %vm7148_vm5, %v677_v60, %v681_v46  ;;  %v2489_v12 = vrot.slane %v2487_v0, 4  ;;  %v462_v35 = vld [vmem:[%s7089_s8 + $0x74] sm:$0x1]  ;;  %511 = vst.msk [vmem:[#allocation2 + $0x70] sm:$0xf] %vm481_vm1, %v461_v29 }
  0x4f   : > { %v2480_v11 = vor.u32 %v2479_v63, %v2476_v62  ;;  %v687_v15 = vrot.slane %v686_v3, 4  ;;  %v694_v20 = vshrl.u32 %v553_v59, 16  ;;  %v697_v22 = vshll.u32 %v553_v59, 16  ;;  %v555_v43 = vld [vmem:[#allocation2 + $0x3c] sm:$0xf] }
  0x50   : > { %v2495_v17 = vrot.slane %v2493_v6, 5  ;;  %6277 = vmatprep.mubr.msk.bf16.mxu0 %vm1031_vm6, %v5743_v9  ;;  %v2490_v26 = vor.u32 %v2489_v12, %v2485_v5  ;;  %v703_v27 = vshll.u32 %v554_v1, 16  ;;  %v707_v28 = vshrl.u32 %v554_v1, 16  ;;  %512 = vst.msk [vmem:[#allocation2 + $0x74] sm:$0x1] %vm484_vm2, %v462_v35 }
  0x51   : > { %v2481_v25 = vrot.slane %v2480_v11, 4  ;;  %v692_v30 = vsel %vm7148_vm5, %v687_v15, %v691_v57  ;;  %v696_v31 = vrot.slane %v694_v20, 4  ;;  %v699_v32 = vrot.slane %v697_v22, 5  ;;  %v463_v44 = vld [vmem:[%s7089_s8 + $0x78] sm:$0xf] }
  0x52   : > { %v713_v33 = vshll.u32 %v582_v7, 16  ;;  %v5597_v36 = vcombine.low %v682_v10, %v692_v30  ;;  %v2491_v41 = vrot.slane %v2490_v26, 4  ;;  %v705_v42 = vrot.slane %v703_v27, 5  ;;  %v464_v46 = vld [vmem:[%s7089_s8 + $0x7c] sm:$0xf] }
  0x53   : > { %v2486_v37 = vsel %vm7148_vm5, %v2481_v25, %v2485_v5  ;;  %v700_v48 = vor.u32 %v699_v32, %v696_v31  ;;  %v709_v49 = vrot.slane %v707_v28, 4  ;;  %v2498_v50 = vshrl.u32 %v2365_v4, 16  ;;  %v465_v51 = vld [vmem:[%s7089_s8 + $0x80] sm:$0x1]  ;;  %513 = vst.msk [vmem:[#allocation2 + $0x78] sm:$0xf] %vm481_vm1, %v463_v44 }
  0x54   : > { %v715_v61 = vrot.slane %v713_v33, 5  ;;  %514 = vst.msk [vmem:[#allocation2 + $0x7c] sm:$0xf] %vm481_vm1, %v464_v46  ;;  %6142 = vmatmul.mubr.msk.bf16.gmra.mrb[4].mxu1 %vm1031_vm6, %v5597_v36  ;;  %v2496_v52 = vsel %vm7148_vm5, %v2491_v41, %v2495_v17  ;;  %v2501_v54 = vshll.u32 %v2365_v4, 16  ;;  %v2507_v55 = vshll.u32 %v2366_v23, 16 }
  0x55   : > { %v2511_v56 = vshrl.u32 %v2366_v23, 16  ;;  %515 = vst.msk [vmem:[#allocation2 + $0x80] sm:$0x1] %vm484_vm2, %v465_v51  ;;  %v466_v57 = vld [vmem:[%s7089_s8 + $0x84] sm:$0xf]  ;;  %v5744_v58 = vcombine.low %v2486_v37, %v2496_v52  ;;  %v701_v59 = vrot.slane %v700_v48, 4  ;;  %v710_v60 = vor.u32 %v709_v49, %v705_v42 }
  0x56   : > { %v2500_v62 = vrot.slane %v2498_v50, 4  ;;  %v556_v63 = vld [vmem:[#allocation2 + $0x40] sm:$0xf]  ;;  %516 = vst.msk [vmem:[#allocation2 + $0x84] sm:$0xf] %vm481_vm1, %v466_v57  ;;  %v2503_v0 = vrot.slane %v2501_v54, 5 }
  0x57   : > { %v2509_v1 = vrot.slane %v2507_v55, 5  ;;  %v2513_v2 = vrot.slane %v2511_v56, 4  ;;  %v2517_v3 = vshll.u32 %v2367_v34, 16  ;;  %6278 = vmatmul.mubr.msk.bf16.gmra.mrb[4].mxu0 %vm1031_vm6, %v5744_v58  ;;  %v706_v5 = vsel %vm7148_vm5, %v701_v59, %v705_v42  ;;  %v583_v12 = vld [vmem:[#allocation2 + $0x44] sm:$0x1] }
  0x58   : > { %v711_v6 = vrot.slane %v710_v60, 4  ;;  %v718_v7 = vshrl.u32 %v555_v43, 16  ;;  %v721_v8 = vshll.u32 %v555_v43, 16  ;;  %v2504_v9 = vor.u32 %v2503_v0, %v2500_v62  ;;  %v2368_v13 = vld [vmem:[#allocation2 + $0x48] sm:$0xf] }
  0x59   : > { %v2514_v10 = vor.u32 %v2513_v2, %v2509_v1  ;;  %v2519_v11 = vrot.slane %v2517_v3, 5  ;;  %v727_v4 = vshll.u32 %v556_v63, 16  ;;  %v731_v20 = vshrl.u32 %v556_v63, 16  ;;  %v2369_v22 = vld [vmem:[#allocation2 + $0x4c] sm:$0xf] }
  0x5a   : > { %v716_v14 = vsel %vm7148_vm5, %v711_v6, %v715_v61  ;;  %v720_v15 = vrot.slane %v718_v7, 4  ;;  %v723_v17 = vrot.slane %v721_v8, 5  ;;  %v2505_v24 = vrot.slane %v2504_v9, 4  ;;  %v2370_v33 = vld [vmem:[#allocation2 + $0x50] sm:$0x1] }
  0x5b   : > { %v5598_v23 = vcombine.low %v706_v5, %v716_v14  ;;  %v2515_v25 = vrot.slane %v2514_v10, 4  ;;  %v729_v26 = vrot.slane %v727_v4, 5  ;;  %v733_v28 = vrot.slane %v731_v20, 4  ;;  %v557_v36 = vld [vmem:[#allocation2 + $0x48] sm:$0xf] }
  0x5c   : > { %v724_v27 = vor.u32 %v723_v17, %v720_v15  ;;  %v737_v29 = vshll.u32 %v583_v12, 16  ;;  %v2522_v30 = vshrl.u32 %v2368_v13, 16  ;;  %v2510_v31 = vsel %vm7148_vm5, %v2505_v24, %v2509_v1  ;;  %v558_v44 = vld [vmem:[#allocation2 + $0x4c] sm:$0xf]  ;;  %v584_v54 = vld [vmem:[#allocation2 + $0x50] sm:$0x1] }
  0x5d   : > { %6145 = vmatprep.mubr.msk.bf16.mxu1 %vm1031_vm6, %v5598_v23  ;;  %v2520_v32 = vsel %vm7148_vm5, %v2515_v25, %v2519_v11  ;;  %v2525_v34 = vshll.u32 %v2368_v13, 16  ;;  %v2531_v35 = vshll.u32 %v2369_v22, 16  ;;  %v734_v42 = vor.u32 %v733_v28, %v729_v26  ;;  %v2371_v60 = vld [vmem:[#allocation2 + $0x54] sm:$0xf]  ;;  %v2372_v2 = vld [vmem:[#allocation2 + $0x58] sm:$0xf] }
  0x5e   : > { %v5745_v37 = vcombine.low %v2510_v31, %v2520_v32  ;;  %v725_v41 = vrot.slane %v724_v27, 4  ;;  %v739_v43 = vrot.slane %v737_v29, 5  ;;  %v2524_v46 = vrot.slane %v2522_v30, 4  ;;  %v2373_v8 = vld [vmem:[#allocation2 + $0x5c] sm:$0x1] }
  0x5f   : > { %v2527_v48 = vrot.slane %v2525_v34, 5  ;;  %v2533_v49 = vrot.slane %v2531_v35, 5  ;;  %v2535_v61 = vshrl.u32 %v2369_v22, 16  ;;  %v735_v51 = vrot.slane %v734_v42, 4  ;;  %v467_v9 = vld [vmem:[%s7089_s8 + $0x88] sm:$0xf] }
  0x60   : > { %6281 = vmatprep.mubr.msk.bf16.mxu0 %vm1031_vm6, %v5745_v37  ;;  %v730_v50 = vsel %vm7148_vm5, %v725_v41, %v729_v26  ;;  %v2541_v52 = vshll.u32 %v2370_v33, 16  ;;  %v742_v55 = vshrl.u32 %v557_v36, 16  ;;  %v745_v58 = vshll.u32 %v557_v36, 16  ;;  %v468_v13 = vld [vmem:[%s7089_s8 + $0x8c] sm:$0x1] }
  0x61   : > { %v2528_v56 = vor.u32 %v2527_v48, %v2524_v46  ;;  %v2537_v57 = vrot.slane %v2535_v61, 4  ;;  %v751_v59 = vshll.u32 %v558_v44, 16  ;;  %v740_v62 = vsel %vm7148_vm5, %v735_v51, %v739_v43  ;;  %517 = vst.msk [vmem:[#allocation2 + $0x88] sm:$0xf] %vm481_vm1, %v467_v9  ;;  %v559_v22 = vld [vmem:[#allocation2 + $0x54] sm:$0xf] }
  0x62   : > { %v2543_v63 = vrot.slane %v2541_v52, 5  ;;  %v744_v0 = vrot.slane %v742_v55, 4  ;;  %v755_v1 = vshrl.u32 %v558_v44, 16  ;;  %v5599_v3 = vcombine.low %v730_v50, %v740_v62  ;;  %v560_v23 = vld [vmem:[#allocation2 + $0x58] sm:$0xf] }
  0x63   : > { %v2529_v5 = vrot.slane %v2528_v56, 4  ;;  %v2538_v6 = vor.u32 %v2537_v57, %v2533_v49  ;;  %v747_v7 = vrot.slane %v745_v58, 5  ;;  %v753_v10 = vrot.slane %v751_v59, 5  ;;  %518 = vst.msk [vmem:[#allocation2 + $0x8c] sm:$0x1] %vm484_vm2, %v468_v13 }
  0x64   : > { %v757_v11 = vrot.slane %v755_v1, 4  ;;  %v761_v12 = vshll.u32 %v584_v54, 16  ;;  %v2546_v4 = vshrl.u32 %v2371_v60, 16  ;;  %6146 = vmatmul.mubr.msk.bf16.gmra.mrb[8].mxu1 %vm1031_vm6, %v5599_v3  ;;  %v2549_v20 = vshll.u32 %v2371_v60, 16  ;;  %v469_v28 = vld [vmem:[%s7089_s8 + $0x90] sm:$0xf] }
  0x65   : > { %v2534_v14 = vsel %vm7148_vm5, %v2529_v5, %v2533_v49  ;;  %v2539_v15 = vrot.slane %v2538_v6, 4  ;;  %v748_v17 = vor.u32 %v747_v7, %v744_v0  ;;  %v2555_v27 = vshll.u32 %v2372_v2, 16  ;;  %v585_v33 = vld [vmem:[#allocation2 + $0x5c] sm:$0x1]  ;;  %v470_v34 = vld [vmem:[%s7089_s8 + $0x94] sm:$0xf] }
  0x66   : > { %v758_v24 = vor.u32 %v757_v11, %v753_v10  ;;  %v763_v25 = vrot.slane %v761_v12, 5  ;;  %v2548_v26 = vrot.slane %v2546_v4, 4  ;;  %v2551_v31 = vrot.slane %v2549_v20, 5  ;;  %519 = vst.msk [vmem:[#allocation2 + $0x90] sm:$0xf] %vm481_vm1, %v469_v28 }
  0x67   : > { %v2544_v29 = vsel %vm7148_vm5, %v2539_v15, %v2543_v63  ;;  %v749_v30 = vrot.slane %v748_v17, 4  ;;  %v2559_v32 = vshrl.u32 %v2372_v2, 16  ;;  %v2557_v37 = vrot.slane %v2555_v27, 5  ;;  %v2374_v42 = vld [vmem:[#allocation2 + $0x60] sm:$0xf] }
  0x68   : > { %v5746_v35 = vcombine.low %v2534_v14, %v2544_v29  ;;  %v759_v36 = vrot.slane %v758_v24, 4  ;;  %v2565_v41 = vshll.u32 %v2373_v8, 16  ;;  %v471_v43 = vld [vmem:[%s7089_s8 + $0x98] sm:$0x1]  ;;  %520 = vst.msk [vmem:[#allocation2 + $0x94] sm:$0xf] %vm481_vm1, %v470_v34  ;;  %v2552_v46 = vor.u32 %v2551_v31, %v2548_v26 }
  0x69   : > { %v754_v44 = vsel %vm7148_vm5, %v749_v30, %v753_v10  ;;  %v2561_v48 = vrot.slane %v2559_v32, 4  ;;  %v766_v49 = vshrl.u32 %v559_v22, 16  ;;  %521 = vst.msk [vmem:[#allocation2 + $0x98] sm:$0x1] %vm484_vm2, %v471_v43  ;;  %v472_v61 = vld [vmem:[%s7089_s8 + $0x9c] sm:$0xf] }
  0x6a   : > { %v473_v50 = vld [vmem:[%s7089_s8 + $0xa0] sm:$0xf]  ;;  %6282 = vmatmul.mubr.msk.bf16.gmra.mrb[8].mxu0 %vm1031_vm6, %v5746_v35  ;;  %v764_v51 = vsel %vm7148_vm5, %v759_v36, %v763_v25  ;;  %v2567_v52 = vrot.slane %v2565_v41, 5  ;;  %v769_v54 = vshll.u32 %v559_v22, 16  ;;  %v775_v55 = vshll.u32 %v560_v23, 16 }
  0x6b   : > { %v474_v56 = vld [vmem:[%s7089_s8 + $0xa4] sm:$0x1]  ;;  %522 = vst.msk [vmem:[#allocation2 + $0x9c] sm:$0xf] %vm481_vm1, %v472_v61  ;;  %523 = vst.msk [vmem:[#allocation2 + $0xa0] sm:$0xf] %vm481_vm1, %v473_v50  ;;  %v5600_v57 = vcombine.low %v754_v44, %v764_v51  ;;  %v2562_v59 = vor.u32 %v2561_v48, %v2557_v37 }
  0x6c   : > { %v2553_v58 = vrot.slane %v2552_v46, 4  ;;  %v768_v60 = vrot.slane %v766_v49, 4  ;;  %v2375_v62 = vld [vmem:[#allocation2 + $0x64] sm:$0xf]  ;;  %524 = vst.msk [vmem:[#allocation2 + $0xa4] sm:$0x1] %vm484_vm2, %v474_v56 }
  0x6d   : > { %v771_v63 = vrot.slane %v769_v54, 5  ;;  %v777_v0 = vrot.slane %v775_v55, 5  ;;  %v779_v1 = vshrl.u32 %v560_v23, 16  ;;  %v785_v2 = vshll.u32 %v585_v33, 16  ;;  %6149 = vmatprep.mubr.msk.bf16.mxu1 %vm1031_vm6, %v5600_v57  ;;  %v561_v8 = vld [vmem:[#allocation2 + $0x60] sm:$0xf] }
  0x6e   : > { %v2558_v3 = vsel %vm7148_vm5, %v2553_v58, %v2557_v37  ;;  %v2563_v5 = vrot.slane %v2562_v59, 4  ;;  %v2570_v6 = vshrl.u32 %v2374_v42, 16  ;;  %v2573_v7 = vshll.u32 %v2374_v42, 16  ;;  %v2376_v12 = vld [vmem:[#allocation2 + $0x68] sm:$0x1] }
  0x6f   : > { %v772_v9 = vor.u32 %v771_v63, %v768_v60  ;;  %v781_v10 = vrot.slane %v779_v1, 4  ;;  %v787_v11 = vrot.slane %v785_v2, 5  ;;  %v2579_v4 = vshll.u32 %v2375_v62, 16  ;;  %v562_v20 = vld [vmem:[#allocation2 + $0x64] sm:$0xf] }
  0x70   : > { %v2568_v13 = vsel %vm7148_vm5, %v2563_v5, %v2567_v52  ;;  %v2572_v14 = vrot.slane %v2570_v6, 4  ;;  %v2575_v15 = vrot.slane %v2573_v7, 5  ;;  %v2583_v17 = vshrl.u32 %v2375_v62, 16  ;;  %v586_v32 = vld [vmem:[#allocation2 + $0x68] sm:$0x1] }
  0x71   : > { %v5747_v22 = vcombine.low %v2558_v3, %v2568_v13  ;;  %v773_v23 = vrot.slane %v772_v9, 4  ;;  %v782_v24 = vor.u32 %v781_v10, %v777_v0  ;;  %v2581_v25 = vrot.slane %v2579_v4, 5  ;;  %v2377_v42 = vld [vmem:[#allocation2 + $0x6c] sm:$0xf]  ;;  %v7282_v49 = vld [vmem:[#allocation2 + $0x70] sm:$0xf] }
  0x72   : > { %v2576_v26 = vor.u32 %v2575_v15, %v2572_v14  ;;  %v2585_v27 = vrot.slane %v2583_v17, 4  ;;  %v2589_v28 = vshll.u32 %v2376_v12, 16  ;;  %v790_v29 = vshrl.u32 %v561_v8, 16  ;;  %v7286_v54 = vld [vmem:[#allocation2 + $0x74] sm:$0x1] }
  0x73   : > { %6285 = vmatprep.mubr.msk.bf16.mxu0 %vm1031_vm6, %v5747_v22  ;;  %v778_v30 = vsel %vm7148_vm5, %v773_v23, %v777_v0  ;;  %v783_v31 = vrot.slane %v782_v24, 4  ;;  %v793_v33 = vshll.u32 %v561_v8, 16  ;;  %v799_v34 = vshll.u32 %v562_v20, 16  ;;  %v563_v59 = vld [vmem:[#allocation2 + $0x6c] sm:$0xf] }
  0x74   : > { %v2577_v35 = vrot.slane %v2576_v26, 4  ;;  %v2586_v36 = vor.u32 %v2585_v27, %v2581_v25  ;;  %v2591_v37 = vrot.slane %v2589_v28, 5  ;;  %v792_v41 = vrot.slane %v790_v29, 4  ;;  %v564_v1 = vld [vmem:[#allocation2 + $0x70] sm:$0xf] }
  0x75   : > { %v788_v43 = vsel %vm7148_vm5, %v783_v31, %v787_v11  ;;  %v795_v44 = vrot.slane %v793_v33, 5  ;;  %v801_v46 = vrot.slane %v799_v34, 5  ;;  %v803_v48 = vshrl.u32 %v562_v20, 16  ;;  %v475_v7 = vld [vmem:[%s7089_s8 + $0xa8] sm:$0xf] }
  0x76   : > { %v5601_v61 = vcombine.low %v778_v30, %v788_v43  ;;  %v2582_v50 = vsel %vm7148_vm5, %v2577_v35, %v2581_v25  ;;  %v2587_v51 = vrot.slane %v2586_v36, 4  ;;  %v809_v52 = vshll.u32 %v586_v32, 16  ;;  %v476_v8 = vld [vmem:[%s7089_s8 + $0xac] sm:$0xf]  ;;  %v587_v4 = vld [vmem:[#allocation2 + $0x74] sm:$0x1] }
  0x77   : > { %v796_v55 = vor.u32 %v795_v44, %v792_v41  ;;  %v805_v56 = vrot.slane %v803_v48, 4  ;;  %v2594_v57 = vshrl.u32 %v2377_v42, 16  ;;  %v2597_v58 = vshll.u32 %v2377_v42, 16  ;;  %v2380_v13 = vld [vmem:[#allocation2 + $0x78] sm:$0xf] }
  0x78   : > { %6150 = vmatmul.mubr.msk.bf16.gmra.mrb[12].mxu1 %vm1031_vm6, %v5601_v61  ;;  %v2592_v60 = vsel %vm7148_vm5, %v2587_v51, %v2591_v37  ;;  %v811_v62 = vrot.slane %v809_v52, 5  ;;  %v2603_v63 = vshll.u32 %v7282_v49, 16  ;;  %v2607_v0 = vshrl.u32 %v7282_v49, 16  ;;  %v477_v14 = vld [vmem:[%s7089_s8 + $0xb0] sm:$0x1] }
  0x79   : > { %v5748_v2 = vcombine.low %v2582_v50, %v2592_v60  ;;  %v797_v3 = vrot.slane %v796_v55, 4  ;;  %v806_v5 = vor.u32 %v805_v56, %v801_v46  ;;  %v2596_v6 = vrot.slane %v2594_v57, 4  ;;  %525 = vst.msk [vmem:[#allocation2 + $0xa8] sm:$0xf] %vm481_vm1, %v475_v7  ;;  %526 = vst.msk [vmem:[#allocation2 + $0xac] sm:$0xf] %vm481_vm1, %v476_v8 }
  0x7a   : > { %v2599_v9 = vrot.slane %v2597_v58, 5  ;;  %v2605_v10 = vrot.slane %v2603_v63, 5  ;;  %v2609_v11 = vrot.slane %v2607_v0, 4  ;;  %v2613_v12 = vshll.u32 %v7286_v54, 16  ;;  %v7308_v23 = vld [vmem:[#allocation2 + $0x7c] sm:$0xf] }
  0x7b   : > { %6286 = vmatmul.mubr.msk.bf16.gmra.mrb[12].mxu0 %vm1031_vm6, %v5748_v2  ;;  %v802_v15 = vsel %vm7148_vm5, %v797_v3, %v801_v46  ;;  %v807_v17 = vrot.slane %v806_v5, 4  ;;  %v814_v20 = vshrl.u32 %v563_v59, 16  ;;  %v817_v22 = vshll.u32 %v563_v59, 16  ;;  %527 = vst.msk [vmem:[#allocation2 + $0xb0] sm:$0x1] %vm484_vm2, %v477_v14 }
  0x7c   : > { %v478_v24 = vld [vmem:[%s7089_s8 + $0xb4] sm:$0xf]  ;;  %v2600_v25 = vor.u32 %v2599_v9, %v2596_v6  ;;  %v2610_v26 = vor.u32 %v2609_v11, %v2605_v10  ;;  %v2615_v27 = vrot.slane %v2613_v12, 5  ;;  %v823_v28 = vshll.u32 %v564_v1, 16  ;;  %v479_v29 = vld [vmem:[%s7089_s8 + $0xb8] sm:$0xf] }
  0x7d   : > { %v480_v30 = vld [vmem:[%s7089_s8 + $0xbc] sm:$0x1]  ;;  %528 = vst.msk [vmem:[#allocation2 + $0xb4] sm:$0xf] %vm481_vm1, %v478_v24  ;;  %v812_v31 = vsel %vm7148_vm5, %v807_v17, %v811_v62  ;;  %v816_v32 = vrot.slane %v814_v20, 4  ;;  %v819_v33 = vrot.slane %v817_v22, 5 }
  0x7e   : > { %v827_v34 = vshrl.u32 %v564_v1, 16  ;;  %529 = vst.msk [vmem:[#allocation2 + $0xb8] sm:$0xf] %vm481_vm1, %v479_v29  ;;  %v531_v35 = vld [vmem:[%s7303_s16] sm:$0xf]  ;;  %v5602_v36 = vcombine.low %v802_v15, %v812_v31  ;;  %v2601_v37 = vrot.slane %v2600_v25, 4 }
  0x7f   : > { %530 = vst.msk [vmem:[#allocation2 + $0xbc] sm:$0x1] %vm484_vm2, %v480_v30  ;;  %v2611_v41 = vrot.slane %v2610_v26, 4  ;;  %v825_v42 = vrot.slane %v823_v28, 5  ;;  %v7320_v43 = vld [vmem:[#allocation2 + $0x80] sm:$0x1]  ;;  %v820_v46 = vor.u32 %v819_v33, %v816_v32 }
  0x80   : > { %v532_v44 = vld [vmem:[%s7303_s16 + $0x4] sm:$0xf]  ;;  %535 = vst.msk [vmem:[#allocation2 + $0xc0] sm:$0xf] %vm481_vm1, %v531_v35  ;;  %v829_v48 = vrot.slane %v827_v34, 4  ;;  %v833_v61 = vshll.u32 %v587_v4, 16  ;;  %6153 = vmatprep.mubr.msk.bf16.mxu1 %vm1031_vm6, %v5602_v36  ;;  %v2606_v52 = vsel %vm7148_vm5, %v2601_v37, %v2605_v10 }
  0x81   : > { %v2618_v50 = vshrl.u32 %v2380_v13, 16  ;;  %v533_v51 = vld [vmem:[%s7303_s16 + $0x8] sm:$0x1]  ;;  %536 = vst.msk [vmem:[#allocation2 + $0xc4] sm:$0xf] %vm481_vm1, %v532_v44  ;;  %v2616_v55 = vsel %vm7148_vm5, %v2611_v41, %v2615_v27  ;;  %v2621_v56 = vshll.u32 %v2380_v13, 16 }
  0x82   : > { %v2627_v57 = vshll.u32 %v7308_v23, 16  ;;  %v7332_v58 = vld [vmem:[#allocation2 + $0x78] sm:$0xf]  ;;  %537 = vst.msk [vmem:[#allocation2 + $0xc8] sm:$0x1] %vm484_vm2, %v533_v51  ;;  %v5749_v60 = vcombine.low %v2606_v52, %v2616_v55  ;;  %v821_v62 = vrot.slane %v820_v46, 4  ;;  %v830_v63 = vor.u32 %v829_v48, %v825_v42 }
  0x83   : > { %v7338_v59 = vld [vmem:[%s8884_s3] sm:$0x3]  ;;  %v835_v0 = vrot.slane %v833_v61, 5  ;;  %v7340_v1 = vld [vmem:[#allocation2 + $0x7c] sm:$0xf]  ;;  %v2620_v2 = vrot.slane %v2618_v50, 4 }
  0x84   : > { %6732 = vmatprep.subr.msk.bf16.mxu1 %vm1080_vm0, %v7338_v59  ;;  %v2623_v3 = vrot.slane %v2621_v56, 5  ;;  %v2629_v5 = vrot.slane %v2627_v57, 5  ;;  %v2631_v6 = vshrl.u32 %v7308_v23, 16  ;;  %6289 = vmatprep.mubr.msk.bf16.mxu0 %vm1031_vm6, %v5749_v60  ;;  %v826_v7 = vsel %vm7148_vm5, %v821_v62, %v825_v42  ;;  %v588_v10 = vld [vmem:[#allocation2 + $0x80] sm:$0x1]  ;;  %s5589_s8 = sshll.u32 %s381_s22, 8 }
  0x85   : > { %v831_v8 = vrot.slane %v830_v63, 4  ;;  %v2637_v9 = vshll.u32 %v7320_v43, 16  ;;  %v838_v11 = vshrl.u32 %v7332_v58, 16  ;;  %v841_v13 = vshll.u32 %v7332_v58, 16  ;;  %v2383_v15 = vld [vmem:[#allocation2 + $0x84] sm:$0xf] }
  0x86   : > { %v2624_v12 = vor.u32 %v2623_v3, %v2620_v2  ;;  %v2633_v4 = vrot.slane %v2631_v6, 4  ;;  %v847_v14 = vshll.u32 %v7340_v1, 16  ;;  %v851_v24 = vshrl.u32 %v7340_v1, 16  ;;  %v7355_v29 = vld [vmem:[#allocation2 + $0x88] sm:$0xf]  ;;  %s8760_s15 = scalar_lea.vmem [#allocation3], %s5589_s8 }
  0x87   : > { %v836_v17 = vsel %vm7148_vm5, %v831_v8, %v835_v0  ;;  %v2639_v20 = vrot.slane %v2637_v9, 5  ;;  %v840_v22 = vrot.slane %v838_v11, 4  ;;  %v843_v28 = vrot.slane %v841_v13, 5  ;;  %v7360_v37 = vld [vmem:[#allocation2 + $0x8c] sm:$0x1]  ;;  %s5964_s16 = sshll.u32 %s6956_s27, 12 }
  0x88   : > { %v5603_v25 = vcombine.low %v826_v7, %v836_v17  ;;  %v2625_v26 = vrot.slane %v2624_v12, 4  ;;  %v2634_v27 = vor.u32 %v2633_v4, %v2629_v5  ;;  %v849_v30 = vrot.slane %v847_v14, 5  ;;  %v7363_v61 = vld [vmem:[#allocation2 + $0x84] sm:$0xf]  ;;  %v7368_v56 = vld [vmem:[#allocation2 + $0x88] sm:$0xf]  ;;  %s8825_s20 = scalar_lea.hbm %s8888_s7, %s5964_s16 }
  0x89   : > { %v853_v31 = vrot.slane %v851_v24, 4  ;;  %v857_v32 = vshll.u32 %v588_v10, 16  ;;  %v2642_v33 = vshrl.u32 %v2383_v15, 16  ;;  %v844_v36 = vor.u32 %v843_v28, %v840_v22  ;;  %v7377_v7 = vld [vmem:[%s8884_s3 + $0xc] sm:$0x3]  ;;  %s5460_s17 = sshll.u32 %s8760_s15, 4  ;;  %s8827_s17 = int_to_ptr.vmem [resolvable:$true] %s5460_s17 }
  0x8a   : > { %6154 = vmatmul.mubr.msk.bf16.gmra.mrb[16].mxu1 %vm1031_vm6, %v5603_v25  ;;  %v2630_v34 = vsel %vm7148_vm5, %v2625_v26, %v2629_v5  ;;  %v2635_v35 = vrot.slane %v2634_v27, 4  ;;  %v2645_v41 = vshll.u32 %v2383_v15, 16  ;;  %v2651_v48 = vshll.u32 %v7355_v29, 16  ;;  %v589_v5 = vld [vmem:[#allocation2 + $0x8c] sm:$0x1]  ;;  %6737 = vmatprep.subr.msk.bf16.mxu0 %vm1080_vm0, %v7377_v7  ;;  %s8835_s27 = scalar_lea.sflag [#allocation4], %s381_s22  ;;  %p6893_p1 = scmp.lt.s32.totalorder %s8827_s17, %s6891_s30 }
  0x8b   : > { %v854_v42 = vor.u32 %v853_v31, %v849_v30  ;;  %v859_v44 = vrot.slane %v857_v32, 5  ;;  %v2644_v46 = vrot.slane %v2642_v33, 4  ;;  %v845_v51 = vrot.slane %v844_v36, 4  ;;  %v2386_v12 = vld [vmem:[#allocation2 + $0x90] sm:$0xf]  ;;  %s6886_s21 = scalar_lea.vmem %s8827_s17, 4096 }
  0x8c   : > { %v2640_v50 = vsel %vm7148_vm5, %v2635_v35, %v2639_v20  ;;  %v2647_v52 = vrot.slane %v2645_v41, 5  ;;  %v2655_v55 = vshrl.u32 %v7355_v29, 16  ;;  %v2653_v62 = vrot.slane %v2651_v48, 5  ;;  %v7386_v17 = vld [vmem:[#allocation2 + $0x94] sm:$0xf]  ;;  %p6887_p12 = scmp.ne.s32.totalorder %s8827_s17, %s6886_s21  ;;  %s6892_s8 = scalar_lea.vmem %s6891_s30, 8192 }
  0x8d   : > { %v5750_v57 = vcombine.low %v2630_v34, %v2640_v50  ;;  %v855_v60 = vrot.slane %v854_v42, 4  ;;  %v2661_v63 = vshll.u32 %v7360_v37, 16  ;;  %v850_v0 = vsel %vm7148_vm5, %v845_v51, %v849_v30  ;;  %v7392_v28 = vld [vmem:[#allocation2 + $0x98] sm:$0x1]  ;;  %v7395_v36 = vld [vmem:[#allocation2 + $0x90] sm:$0xf]  ;;  %p6894_p2 = scmp.lt.s32.totalorder %s6892_s8, %s6886_s21 }
  0x8e   : > { %v2648_v2 = vor.u32 %v2647_v52, %v2644_v46  ;;  %v2657_v3 = vrot.slane %v2655_v55, 4  ;;  %v862_v6 = vshrl.u32 %v7363_v61, 16  ;;  %v865_v10 = vshll.u32 %v7363_v61, 16  ;;  %v7400_v48 = vld [vmem:[#allocation2 + $0x94] sm:$0xf]  ;;  %p6888_p13 = pnand %p6887_p12, %p7049_p4 }
  0x8f   : > { %6290 = vmatmul.mubr.msk.bf16.gmra.mrb[16].mxu0 %vm1031_vm6, %v5750_v57  ;;  %v860_v8 = vsel %vm7148_vm5, %v855_v60, %v859_v44  ;;  %v2663_v9 = vrot.slane %v2661_v63, 5  ;;  %v871_v11 = vshll.u32 %v7368_v56, 16  ;;  %v875_v24 = vshrl.u32 %v7368_v56, 16  ;;  %p6895_p3 = por %p6894_p2, %p6893_p1 }
  0x90   : > { %v5604_v4 = vcombine.low %v850_v0, %v860_v8  ;;  %v2649_v13 = vrot.slane %v2648_v2, 4  ;;  %v2658_v14 = vor.u32 %v2657_v3, %v2653_v62  ;;  %v864_v15 = vrot.slane %v862_v6, 4  ;;  %v590_v3 = vld [vmem:[#allocation2 + $0x98] sm:$0x1]  ;;  %p6889_p0 = pneg %p6888_p13 }
  0x91   : > { %v867_v20 = vrot.slane %v865_v10, 5  ;;  %v873_v22 = vrot.slane %v871_v11, 5  ;;  %v881_v25 = vshll.u32 %v589_v5, 16  ;;  %v2666_v30 = vshrl.u32 %v2386_v12, 16 }
  0x92   : > { %6157 = vmatprep.mubr.msk.bf16.mxu1 %vm1031_vm6, %v5604_v4  ;;  %v2654_v26 = vsel %vm7148_vm5, %v2649_v13, %v2653_v62  ;;  %v2659_v27 = vrot.slane %v2658_v14, 4  ;;  %v2669_v31 = vshll.u32 %v2386_v12, 16  ;;  %v877_v33 = vrot.slane %v875_v24, 4  ;;  %v2389_v12 = vld [vmem:[#allocation2 + $0x9c] sm:$0xf]  ;;  %p6896_p5 = pnand %p6895_p3, %p6889_p0 }
  0x93   : > { %v868_v32 = vor.u32 %v867_v20, %v864_v15  ;;  %v883_v34 = vrot.slane %v881_v25, 5  ;;  %v2675_v35 = vshll.u32 %v7386_v17, 16  ;;  %v2668_v42 = vrot.slane %v2666_v30, 4  ;;  %v7412_v20 = vld [vmem:[#allocation2 + $0xa0] sm:$0xf] }
  0x94   : > { %v2664_v41 = vsel %vm7148_vm5, %v2659_v27, %v2663_v9  ;;  %v2671_v44 = vrot.slane %v2669_v31, 5  ;;  %v2679_v46 = vshrl.u32 %v7386_v17, 16  ;;  %v878_v52 = vor.u32 %v877_v33, %v873_v22  ;;  %v7416_v27 = vld [vmem:[#allocation2 + $0xa4] sm:$0x1] }
  0x95   : > { %v5751_v50 = vcombine.low %v2654_v26, %v2664_v41  ;;  %v869_v51 = vrot.slane %v868_v32, 4  ;;  %v2677_v55 = vrot.slane %v2675_v35, 5  ;;  %v2685_v62 = vshll.u32 %v7392_v28, 16  ;;  %v7418_v35 = vld [vmem:[#allocation2 + $0x9c] sm:$0xf] }
  0x96   : > { %v2672_v57 = vor.u32 %v2671_v44, %v2668_v42  ;;  %v2681_v60 = vrot.slane %v2679_v46, 4  ;;  %v886_v63 = vshrl.u32 %v7395_v36, 16  ;;  %v879_v2 = vrot.slane %v878_v52, 4  ;;  %v7425_v46 = vld [vmem:[#allocation2 + $0xa0] sm:$0xf] }
  0x97   : > { %6293 = vmatprep.mubr.msk.bf16.mxu0 %vm1031_vm6, %v5751_v50  ;;  %v874_v0 = vsel %vm7148_vm5, %v869_v51, %v873_v22  ;;  %v889_v5 = vshll.u32 %v7395_v36, 16  ;;  %v895_v6 = vshll.u32 %v7400_v48, 16  ;;  %v2687_v10 = vrot.slane %v2685_v62, 5 }
  0x98   : > { %v2673_v8 = vrot.slane %v2672_v57, 4  ;;  %v2682_v9 = vor.u32 %v2681_v60, %v2677_v55  ;;  %v888_v11 = vrot.slane %v886_v63, 4  ;;  %v884_v4 = vsel %vm7148_vm5, %v879_v2, %v883_v34 }
  0x99   : > { %v891_v13 = vrot.slane %v889_v5, 5  ;;  %v897_v14 = vrot.slane %v895_v6, 5  ;;  %v899_v15 = vshrl.u32 %v7400_v48, 16  ;;  %v5605_v22 = vcombine.low %v874_v0, %v884_v4  ;;  %v591_v0 = vld [vmem:[#allocation2 + $0xa4] sm:$0x1] }
  0x9a   : > { %v2678_v24 = vsel %vm7148_vm5, %v2673_v8, %v2677_v55  ;;  %v2683_v25 = vrot.slane %v2682_v9, 4  ;;  %v905_v26 = vshll.u32 %v590_v3, 16  ;;  %v2690_v32 = vshrl.u32 %v2389_v12, 16  ;;  %v2392_v8 = vld [vmem:[#allocation2 + $0xa8] sm:$0xf] }
  0x9b   : > { %v892_v30 = vor.u32 %v891_v13, %v888_v11  ;;  %v901_v31 = vrot.slane %v899_v15, 4  ;;  %v2693_v33 = vshll.u32 %v2389_v12, 16  ;;  %6158 = vmatmul.mubr.msk.bf16.gmra.mrb[20].mxu1 %vm1031_vm6, %v5605_v22  ;;  %v2699_v42 = vshll.u32 %v7412_v20, 16 }
  0x9c   : > { %v2688_v34 = vsel %vm7148_vm5, %v2683_v25, %v2687_v10  ;;  %v907_v41 = vrot.slane %v905_v26, 5  ;;  %v2703_v44 = vshrl.u32 %v7412_v20, 16  ;;  %v2692_v55 = vrot.slane %v2690_v32, 4 }
  0x9d   : > { %v5752_v50 = vcombine.low %v2678_v24, %v2688_v34  ;;  %v893_v51 = vrot.slane %v892_v30, 4  ;;  %v902_v52 = vor.u32 %v901_v31, %v897_v14  ;;  %v2695_v57 = vrot.slane %v2693_v33, 5  ;;  %v7437_v24 = vld [vmem:[#allocation2 + $0xac] sm:$0xf]  ;;  %v7439_v31 = vld [vmem:[#allocation2 + $0xb0] sm:$0x1] }
  0x9e   : > { %v2701_v60 = vrot.slane %v2699_v42, 5  ;;  %v2705_v62 = vrot.slane %v2703_v44, 4  ;;  %v2709_v63 = vshll.u32 %v7416_v27, 16  ;;  %v910_v5 = vshrl.u32 %v7418_v35, 16 }
  0x9f   : > { %6294 = vmatmul.mubr.msk.bf16.gmra.mrb[20].mxu0 %vm1031_vm6, %v5752_v50  ;;  %v898_v2 = vsel %vm7148_vm5, %v893_v51, %v897_v14  ;;  %v903_v3 = vrot.slane %v902_v52, 4  ;;  %v913_v6 = vshll.u32 %v7418_v35, 16  ;;  %v2696_v9 = vor.u32 %v2695_v57, %v2692_v55  ;;  %v7447_v52 = vld [vmem:[#allocation2 + $0xa8] sm:$0xf] }
  0xa0   : > { %v2706_v10 = vor.u32 %v2705_v62, %v2701_v60  ;;  %v2711_v11 = vrot.slane %v2709_v63, 5  ;;  %v919_v12 = vshll.u32 %v7425_v46, 16  ;;  %v912_v13 = vrot.slane %v910_v5, 4 }
  0xa1   : > { %v908_v4 = vsel %vm7148_vm5, %v903_v3, %v907_v41  ;;  %v915_v15 = vrot.slane %v913_v6, 5  ;;  %v923_v22 = vshrl.u32 %v7425_v46, 16  ;;  %v2697_v25 = vrot.slane %v2696_v9, 4  ;;  %v2395_v9 = vld [vmem:[#allocation2 + $0xb4] sm:$0xf] }
  0xa2   : > { %v5606_v14 = vcombine.low %v898_v2, %v908_v4  ;;  %v2707_v26 = vrot.slane %v2706_v10, 4  ;;  %v921_v30 = vrot.slane %v919_v12, 5  ;;  %v929_v34 = vshll.u32 %v591_v0, 16  ;;  %v7449_v2 = vld [vmem:[#allocation2 + $0xac] sm:$0xf] }
  0xa3   : > { %v916_v32 = vor.u32 %v915_v15, %v912_v13  ;;  %v925_v33 = vrot.slane %v923_v22, 4  ;;  %v2714_v42 = vshrl.u32 %v2392_v8, 16  ;;  %v2702_v41 = vsel %vm7148_vm5, %v2697_v25, %v2701_v60  ;;  %v7452_v60 = vld [vmem:[#allocation2 + $0xb0] sm:$0x1] }
  0xa4   : > { %6161 = vmatprep.mubr.msk.bf16.mxu1 %vm1031_vm6, %v5606_v14  ;;  %v2712_v44 = vsel %vm7148_vm5, %v2707_v26, %v2711_v11  ;;  %v2717_v50 = vshll.u32 %v2392_v8, 16  ;;  %v2723_v51 = vshll.u32 %v7437_v24, 16  ;;  %v931_v63 = vrot.slane %v929_v34, 5  ;;  %8915 = vst [vmem:[#allocation7_spill] sm:$0xff] %v7452_v60  ;;  %v7461_v14 = vld [vmem:[#allocation2 + $0xb8] sm:$0xf] }
  0xa5   : > { %v5753_v55 = vcombine.low %v2702_v41, %v2712_v44  ;;  %v917_v57 = vrot.slane %v916_v32, 4  ;;  %v926_v62 = vor.u32 %v925_v33, %v921_v30  ;;  %v2716_v0 = vrot.slane %v2714_v42, 4  ;;  %v7466_v44 = vld [vmem:[#allocation2 + $0xbc] sm:$0x1] }
  0xa6   : > { %v2719_v3 = vrot.slane %v2717_v50, 5  ;;  %v2725_v5 = vrot.slane %v2723_v51, 5  ;;  %v2727_v6 = vshrl.u32 %v7437_v24, 16  ;;  %v2733_v11 = vshll.u32 %v7439_v31, 16 }
  0xa7   : > { %6297 = vmatprep.mubr.msk.bf16.mxu0 %vm1031_vm6, %v5753_v55  ;;  %v922_v8 = vsel %vm7148_vm5, %v917_v57, %v921_v30  ;;  %v927_v10 = vrot.slane %v926_v62, 4  ;;  %v934_v12 = vshrl.u32 %v7447_v52, 16  ;;  %v937_v15 = vshll.u32 %v7447_v52, 16  ;;  %v7469_v62 = vld [vmem:[#allocation2 + $0xb4] sm:$0xf] }
  0xa8   : > { %v2720_v4 = vor.u32 %v2719_v3, %v2716_v0  ;;  %v2729_v13 = vrot.slane %v2727_v6, 4  ;;  %v943_v22 = vshll.u32 %v7449_v2, 16  ;;  %v2735_v26 = vrot.slane %v2733_v11, 5  ;;  %8916 = vst [vmem:[#allocation8_spill] sm:$0xff] %v7469_v62 }
  0xa9   : > { %v932_v25 = vsel %vm7148_vm5, %v927_v10, %v931_v63  ;;  %v936_v32 = vrot.slane %v934_v12, 4  ;;  %v947_v30 = vshrl.u32 %v7449_v2, 16  ;;  %v939_v41 = vrot.slane %v937_v15, 5 }
  0xaa   : > { %v5607_v33 = vcombine.low %v922_v8, %v932_v25  ;;  %v2721_v34 = vrot.slane %v2720_v4, 4  ;;  %v2730_v42 = vor.u32 %v2729_v13, %v2725_v5  ;;  %v945_v50 = vrot.slane %v943_v22, 5  ;;  %v7474_v8 = vld [vmem:[#allocation2 + $0xb8] sm:$0xf] }
  0xab   : > { %v949_v51 = vrot.slane %v947_v30, 4  ;;  %v953_v55 = vshll.u32 %v7452_v60, 16  ;;  %v2738_v57 = vshrl.u32 %v2395_v9, 16  ;;  %v940_v3 = vor.u32 %v939_v41, %v936_v32  ;;  %8917 = vst [vmem:[#allocation9_spill] sm:$0xff] %v7474_v8  ;;  %v7480_v30 = vld [vmem:[#allocation2 + $0xbc] sm:$0x1] }
  0xac   : > { %6162 = vmatmul.mubr.msk.bf16.gmra.mrb[24].mxu1 %vm1031_vm6, %v5607_v33  ;;  %v2726_v63 = vsel %vm7148_vm5, %v2721_v34, %v2725_v5  ;;  %v2731_v0 = vrot.slane %v2730_v42, 4  ;;  %v2741_v6 = vshll.u32 %v2395_v9, 16  ;;  %v2747_v4 = vshll.u32 %v7461_v14, 16  ;;  %8918 = vst [vmem:[#allocation10_spill] sm:$0xff] %v7480_v30  ;;  %v2398_v34 = vld [vmem:[#allocation2 + $0xc0] sm:$0xf] }
  0xad   : > { %v950_v10 = vor.u32 %v949_v51, %v945_v50  ;;  %v955_v11 = vrot.slane %v953_v55, 5  ;;  %v2740_v12 = vrot.slane %v2738_v57, 4  ;;  %v941_v15 = vrot.slane %v940_v3, 4  ;;  %v7491_v3 = vld [vmem:[#allocation2 + $0xc4] sm:$0xf] }
  0xae   : > { %v2736_v13 = vsel %vm7148_vm5, %v2731_v0, %v2735_v26  ;;  %v2743_v22 = vrot.slane %v2741_v6, 5  ;;  %v2751_v25 = vshrl.u32 %v7461_v14, 16  ;;  %v2749_v32 = vrot.slane %v2747_v4, 5  ;;  %v7615_v60 = vld [vmem:[#allocation2 + $0x58] sm:$0xf] }
  0xaf   : > { %v5754_v5 = vcombine.low %v2726_v63, %v2736_v13  ;;  %v951_v33 = vrot.slane %v950_v10, 4  ;;  %v2757_v9 = vshll.u32 %v7466_v44, 16  ;;  %v946_v42 = vsel %vm7148_vm5, %v941_v15, %v945_v50 }
  0xb0   : > { %v2744_v41 = vor.u32 %v2743_v22, %v2740_v12  ;;  %v2753_v51 = vrot.slane %v2751_v25, 4  ;;  %v958_v55 = vshrl.u32 %v7469_v62, 16  ;;  %v961_v63 = vshll.u32 %v7469_v62, 16  ;;  %v7495_v25 = vld [vmem:[#allocation2 + $0xc8] sm:$0x1] }
  0xb1   : > { %6298 = vmatmul.mubr.msk.bf16.gmra.mrb[24].mxu0 %vm1031_vm6, %v5754_v5  ;;  %v956_v26 = vsel %vm7148_vm5, %v951_v33, %v955_v11  ;;  %v2759_v57 = vrot.slane %v2757_v9, 5  ;;  %v967_v0 = vshll.u32 %v7474_v8, 16  ;;  %v971_v15 = vshrl.u32 %v7474_v8, 16 }
  0xb2   : > { %v5608_v6 = vcombine.low %v946_v42, %v956_v26  ;;  %v2745_v10 = vrot.slane %v2744_v41, 4  ;;  %v2754_v4 = vor.u32 %v2753_v51, %v2749_v32  ;;  %v960_v50 = vrot.slane %v958_v55, 4 }
  0xb3   : > { %v963_v12 = vrot.slane %v961_v63, 5  ;;  %v969_v13 = vrot.slane %v967_v0, 5  ;;  %v977_v22 = vshll.u32 %v7480_v30, 16  ;;  %v2762_v33 = vshrl.u32 %v2398_v34, 16 }
  0xb4   : > { %6165 = vmatprep.mubr.msk.bf16.mxu1 %vm1031_vm6, %v5608_v6  ;;  %v2750_v11 = vsel %vm7148_vm5, %v2745_v10, %v2749_v32  ;;  %v2755_v5 = vrot.slane %v2754_v4, 4  ;;  %v2765_v9 = vshll.u32 %v2398_v34, 16  ;;  %v973_v41 = vrot.slane %v971_v15, 4  ;;  %v3079_v6 = vld [vmem:[#allocation2 + $0xc] sm:$0xe] }
  0xb5   : > { %v964_v42 = vor.u32 %v963_v12, %v960_v50  ;;  %v979_v51 = vrot.slane %v977_v22, 5  ;;  %v2771_v55 = vshll.u32 %v7491_v3, 16  ;;  %v2764_v63 = vrot.slane %v2762_v33, 4  ;;  %v7507_v32 = vld [vmem:[%s8884_s3 + $0x4] sm:$0x3] }
  0xb6   : > { %v2760_v26 = vsel %vm7148_vm5, %v2755_v5, %v2759_v57  ;;  %v2767_v0 = vrot.slane %v2765_v9, 5  ;;  %v2775_v40 = vshrl.u32 %v7491_v3, 16  ;;  %v974_v4 = vor.u32 %v973_v41, %v969_v13  ;;  %v3080_v5 = vld [vmem:[#allocation2 + $0x18] sm:$0xe] }
  0xb7   : > { %v5755_v34 = vcombine.low %v2750_v11, %v2760_v26  ;;  %v965_v10 = vrot.slane %v964_v42, 4  ;;  %v2773_v50 = vrot.slane %v2771_v55, 5  ;;  %v2781_v22 = vshll.u32 %v7495_v25, 16  ;;  %v7520_v55 = vld [vmem:[#allocation2 + $0x4] sm:$0xf] }
  0xb8   : > { %v2768_v12 = vor.u32 %v2767_v0, %v2764_v63  ;;  %v2777_v15 = vrot.slane %v2775_v40, 4  ;;  %v1374_v57 = vsel %vm1080_vm0, %v7338_v59, 0  ;;  %v975_v9 = vrot.slane %v974_v4, 4  ;;  %v6833_v59 = vld [vmem:[#allocation2] sm:$0xf] }
  0xb9   : > { %6301 = vmatprep.mubr.msk.bf16.mxu0 %vm1031_vm6, %v5755_v34  ;;  %v970_v33 = vsel %vm7148_vm5, %v965_v10, %v969_v13  ;;  %6170 = vmatpush3.bf16.msra.mxu1 %v1374_v57  ;;  %v2783_v41 = vrot.slane %v2781_v22, 5  ;;  %v5626_v26 = vcombine.low %v6833_v59, %v7520_v55  ;;  %v5773_v63 = vrot.slane %v3079_v6, 9 }
  0xba   : > { %v2769_v11 = vrot.slane %v2768_v12, 4  ;;  %v2778_v42 = vor.u32 %v2777_v15, %v2773_v50  ;;  %6733 = vmatprep.subr.msk.bf16.mxu1 %vm1080_vm0, %v7507_v32  ;;  %v980_v40 = vsel %vm7148_vm5, %v975_v9, %v979_v51  ;;  %v3147_v0 = vrot.slane %v3145_v18, 4  ;;  %v3081_v12 = vld [vmem:[#allocation2 + $0x24] sm:$0xe] }
  0xbb   : > { %v5609_v34 = vcombine.low %v970_v33, %v980_v40  ;;  %v5774_v4 = vrot.slane %v3080_v5, 9  ;;  %v3146_v15 = vsel %vm7523_vm9, %v5773_v63, %v3145_v18  ;;  %v3156_v22 = vsel %vm7523_vm9, %v7181_v47, %v3155_v45  ;;  %v538_v18 = vld [vmem:[%s428_s10] sm:$0xf]  ;;  %v539_v5 = vld [vmem:[%s428_s10 + $0x4] sm:$0xf] }
  0xbc   : > { %v2774_v51 = vsel %vm7148_vm5, %v2769_v11, %v2773_v50  ;;  %v2779_v10 = vrot.slane %v2778_v42, 4  ;;  %v3149_v6 = vsel %vm7523_vm9, %v3147_v0, %v3148_v19  ;;  %v8921_v57 = vrot.slane %v7160_v16, 5  ;;  %v540_v19 = vld [vmem:[%s428_s10 + $0x8] sm:$0x1]  ;;  %542 = vst.msk [vmem:[#allocation2 + $0xcc] sm:$0xf] %vm481_vm1, %v538_v18 }
  0xbd   : > { %6166 = vmatmul.mubr.msk.bf16.gmra.mrb[28].mxu1 %vm1031_vm6, %v5609_v34  ;;  %v5790_v38 = vcombine.low %v3146_v15, %v3149_v6  ;;  %v5775_v9 = vrot.slane %v3081_v12, 9  ;;  %v6835_v45 = vld [vmem:[#allocation2 + $0x28] sm:$0xf]  ;;  %543 = vst.msk [vmem:[#allocation2 + $0xd0] sm:$0xf] %vm481_vm1, %v539_v5  ;;  %v8924_v8 = vrot.slane %v7282_v49, 5 }
  0xbe   : > { %v2784_v50 = vsel %vm7148_vm5, %v2779_v10, %v2783_v41  ;;  %v3153_v39 = vsel %vm7523_vm9, %v5774_v4, %v8921_v57  ;;  %6171 = vmatprep.mubr.msk.bf16.mxu1 %vm1031_vm6, %v5626_v26  ;;  %v3159_v47 = vrot.slane %v6835_v45, 5  ;;  %544 = vst.msk [vmem:[#allocation2 + $0xd4] sm:$0x1] %vm484_vm2, %v540_v19  ;;  %v6836_v16 = vld [vmem:[#allocation2 + $0x2c] sm:$0x1]  ;;  %v3713_v45 = vsel %vm1080_vm0, %v7377_v7, 0 }
  0xbf   : > { %v5756_v33 = vcombine.low %v2774_v51, %v2784_v50  ;;  %v5791_v21 = vcombine.low %v3153_v39, %v3156_v22  ;;  %v3162_v11 = vrot.slane %v6836_v16, 5  ;;  %v6837_v41 = vld [vmem:[#allocation2 + $0xc] sm:$0xf]  ;;  %v7560_v40 = vld [vmem:[#allocation2 + $0x10] sm:$0xf] }
  0xc0   : > { %v3161_v42 = vrot.slane %v3159_v47, 4  ;;  %v5627_v59 = vcombine.low %v6837_v41, %v7560_v40  ;;  %v3082_v26 = vld [vmem:[#allocation2 + $0x30] sm:$0xe]  ;;  %v6839_v63 = vld [vmem:[#allocation2 + $0x34] sm:$0xf]  ;;  %v3160_v4 = vsel %vm7523_vm9, %v5775_v9, %v3159_v47 }
  0xc1   : > { %6302 = vmatmul.mubr.msk.bf16.gmra.mrb[28].mxu0 %vm1031_vm6, %v5756_v33  ;;  %v3166_v0 = vrot.slane %v6839_v63, 5  ;;  %v6840_v34 = vld [vmem:[#allocation2 + $0x18] sm:$0xf]  ;;  %v7563_v51 = vld [vmem:[#allocation2 + $0x1c] sm:$0xf]  ;;  %v5776_v50 = vrot.slane %v3082_v26, 9 }
  0xc2   : > { %6307 = vmatprep.mubr.msk.bf16.mxu0 %vm1031_vm6, %v5790_v38  ;;  %v5628_v10 = vcombine.low %v6840_v34, %v7563_v51  ;;  %v3163_v12 = vsel %vm7523_vm9, %v3161_v42, %v3162_v11  ;;  %v6842_v15 = vld [vmem:[#allocation2 + $0x40] sm:$0xf]  ;;  %v3083_v22 = vld [vmem:[#allocation2 + $0x3c] sm:$0xe]  ;;  %v3084_v38 = vld [vmem:[#allocation2 + $0x48] sm:$0xe] }
  0xc3   : > { %v3173_v6 = vrot.slane %v6842_v15, 5  ;;  %v5792_v57 = vcombine.low %v3160_v4, %v3163_v12  ;;  %v3168_v39 = vrot.slane %v3166_v0, 4  ;;  %v6843_v18 = vld [vmem:[#allocation2 + $0x38] sm:$0x1]  ;;  %v6844_v19 = vld [vmem:[#allocation2 + $0x4c] sm:$0xf]  ;;  %v3167_v7 = vsel %vm7523_vm9, %v5776_v50, %v3166_v0 }
  0xc4   : > { %v3169_v5 = vrot.slane %v6843_v18, 5  ;;  %v3180_v33 = vrot.slane %v6844_v19, 5  ;;  %v5777_v9 = vrot.slane %v3083_v22, 9  ;;  %v6845_v16 = vld [vmem:[#allocation2 + $0x44] sm:$0x1]  ;;  %v5778_v12 = vrot.slane %v3084_v38, 9 }
  0xc5   : > { %6172 = vmatmul.mubr.msk.bf16.vlgmr.msra.gmra.mrb[0].mxu1 %vm1031_vm6, %v5627_v59  ;;  %v3175_v47 = vrot.slane %v3173_v6, 4  ;;  %v3176_v11 = vrot.slane %v6845_v16, 5  ;;  %v3085_v42 = vld [vmem:[#allocation2 + $0x54] sm:$0xe]  ;;  %v7577_v41 = vld [vmem:[%s8884_s3 + $0xe] sm:$0x3] }
  0xc6   : > { %6175 = vmatprep.mubr.msk.bf16.mxu1 %vm1031_vm6, %v5628_v10  ;;  %8922 = vst [vmem:[#allocation11_spill] sm:$0xff] %v7577_v41  ;;  %v6846_v59 = vld [vmem:[#allocation2 + $0x24] sm:$0xf]  ;;  %v7580_v26 = vld [vmem:[#allocation2 + $0x28] sm:$0xf]  ;;  %v3170_v4 = vsel %vm7523_vm9, %v3168_v39, %v3169_v5  ;;  %v3182_v15 = vrot.slane %v3180_v33, 4  ;;  %v3174_v0 = vsel %vm7523_vm9, %v5777_v9, %v3173_v6  ;;  %v3181_v30 = vsel %vm7523_vm9, %v5778_v12, %v3180_v33 }
  0xc7   : > { %v5629_v63 = vcombine.low %v6846_v59, %v7580_v26  ;;  %v6848_v34 = vld [vmem:[#allocation2 + $0x58] sm:$0xf]  ;;  %v6849_v22 = vld [vmem:[#allocation2 + $0x50] sm:$0x1]  ;;  %v7588_v19 = vld [vmem:[#allocation2 + $0x34] sm:$0xf]  ;;  %v3177_v50 = vsel %vm7523_vm9, %v3175_v47, %v3176_v11  ;;  %v5793_v59 = vcombine.low %v3167_v7, %v3170_v4 }
  0xc8   : > { %v3187_v10 = vrot.slane %v6848_v34, 5  ;;  %v6850_v18 = vld [vmem:[#allocation2 + $0x30] sm:$0xf]  ;;  %v7597_v38 = vld [vmem:[#allocation2 + $0x40] sm:$0xf] }
  0xc9   : > { %6308 = vmatmul.mubr.msk.bf16.vlgmr.msra.gmra.mrb[0].mxu0 %vm1031_vm6, %v5791_v21  ;;  %v3183_v21 = vrot.slane %v6849_v22, 5  ;;  %v5630_v16 = vcombine.low %v6850_v18, %v7588_v19  ;;  %v3090_v5 = vld [vmem:[#allocation2 + $0x90] sm:$0xe]  ;;  %v6854_v34 = vld [vmem:[#allocation2 + $0x48] sm:$0xf] }
  0xca   : > { %6340 = vmatpush3.bf16.msra.mxu0 %v3713_v45  ;;  %6311 = vmatprep.mubr.msk.bf16.mxu0 %vm1031_vm6, %v5792_v57  ;;  %v5779_v45 = vrot.slane %v3085_v42, 9  ;;  %v6852_v57 = vld [vmem:[#allocation2 + $0x3c] sm:$0xf]  ;;  %v7600_v22 = vld [vmem:[#allocation2 + $0x4c] sm:$0xf]  ;;  %v3189_v6 = vrot.slane %v3187_v10, 4  ;;  %v5794_v42 = vcombine.low %v3174_v0, %v3177_v50 }
  0xcb   : > { %6738 = vmatprep.subr.msk.bf16.mxu0 %vm1080_vm0, %v7577_v41  ;;  %v5631_v39 = vcombine.low %v6852_v57, %v7597_v38  ;;  %8923 = vst [vmem:[#allocation12_spill] sm:$0xff] %v7600_v22  ;;  %v5632_v18 = vcombine.low %v6854_v34, %v7600_v22  ;;  %v6856_v9 = vld [vmem:[#allocation2 + $0x5c] sm:$0x1]  ;;  %v3086_v47 = vld [vmem:[#allocation2 + $0x60] sm:$0xe]  ;;  %v3184_v7 = vsel %vm7523_vm9, %v3182_v15, %v3183_v21  ;;  %v5784_v33 = vrot.slane %v3090_v5, 9 }
  0xcc   : > { %v3190_v53 = vrot.slane %v6856_v9, 5  ;;  %v7603_v11 = vld [vmem:[#allocation2 + $0x6c] sm:$0xe]  ;;  %v6857_v4 = vld [vmem:[#allocation2 + $0x64] sm:$0xf]  ;;  %v3188_v34 = vsel %vm7523_vm9, %v5779_v45, %v3187_v10  ;;  %v5780_v50 = vrot.slane %v3086_v47, 9 }
  0xcd   : > { %6176 = vmatmul.mubr.msk.bf16.gmra.mrb[4].mxu1 %vm1031_vm6, %v5629_v63  ;;  %v3194_v57 = vrot.slane %v6857_v4, 5  ;;  %v7613_v9 = vld [vmem:[#allocation2 + $0x54] sm:$0xf]  ;;  %v3091_v12 = vld [vmem:[#allocation2 + $0x9c] sm:$0xe]  ;;  %v5781_v45 = vrot.slane %v7603_v11, 9  ;;  %v5795_v63 = vcombine.low %v3181_v30, %v3184_v7 }
  0xce   : > { %6179 = vmatprep.mubr.msk.bf16.mxu1 %vm1031_vm6, %v5630_v16  ;;  %v6860_v15 = vld [vmem:[#allocation2 + $0x68] sm:$0x1]  ;;  %v7620_v4 = vld [vmem:[#allocation2 + $0x60] sm:$0xf]  ;;  %v7622_v16 = vld [vmem:[#allocation2 + $0x64] sm:$0xf]  ;;  %v3191_v5 = vsel %vm7523_vm9, %v3189_v6, %v3190_v53 }
  0xcf   : > { %v3197_v21 = vrot.slane %v6860_v15, 5  ;;  %v3092_v22 = vld [vmem:[#allocation2 + $0xa8] sm:$0xe]  ;;  %v3222_v47 = vrot.slane %v7386_v17, 5  ;;  %v3225_v15 = vrot.slane %v7392_v28, 5  ;;  %v3196_v41 = vrot.slane %v3194_v57, 4 }
  0xd0   : > { %v3093_v0 = vld [vmem:[#allocation2 + $0xb4] sm:$0xe]  ;;  %v5785_v62 = vrot.slane %v3091_v12, 9  ;;  %v3229_v10 = vrot.slane %v7412_v20, 5  ;;  %v3232_v11 = vrot.slane %v7416_v27, 5  ;;  %v3204_v30 = vrot.slane %v7286_v54, 5 }
  0xd1   : > { %6312 = vmatmul.mubr.msk.bf16.gmra.mrb[4].mxu0 %vm1031_vm6, %v5793_v59  ;;  %v3203_v59 = vrot.slane %v8924_v8, 4  ;;  %v7640_v53 = vsel %vm7523_vm9, %v5784_v33, %v3222_v47  ;;  %v3224_v17 = vrot.slane %v3222_v47, 4  ;;  %v3236_v20 = vrot.slane %v7437_v24, 5  ;;  %v3094_v7 = vld [vmem:[#allocation2 + $0xc0] sm:$0xe] }
  0xd2   : > { %6315 = vmatprep.mubr.msk.bf16.mxu0 %vm1031_vm6, %v5794_v42  ;;  %v7644_v28 = vsel %vm7523_vm9, %v5785_v62, %v3229_v10  ;;  %v3231_v6 = vrot.slane %v3229_v10, 4  ;;  %v5786_v42 = vrot.slane %v3092_v22, 9  ;;  %v5796_v27 = vcombine.low %v3188_v34, %v3191_v5 }
  0xd3   : > { %v7649_v8 = vsel %vm7523_vm9, %v3224_v17, %v3225_v15  ;;  %v3239_v54 = vrot.slane %v7439_v31, 5  ;;  %v5787_v12 = vrot.slane %v3093_v0, 9  ;;  %v3238_v22 = vrot.slane %v3236_v20, 4 }
  0xd4   : > { %v5801_v33 = vcombine.low %v7640_v53, %v7649_v8  ;;  %v7657_v62 = vsel %vm7523_vm9, %v3231_v6, %v3232_v11  ;;  %v7661_v24 = vsel %vm7523_vm9, %v5786_v42, %v3236_v20  ;;  %v3195_v31 = vsel %vm7523_vm9, %v5780_v50, %v3194_v57  ;;  %v3088_v50 = vld [vmem:[#allocation2 + $0x78] sm:$0xe]  ;;  %v1540_v8 = vld [vmem:[#allocation2 + $0x24] sm:$0xe] }
  0xd5   : > { %6180 = vmatmul.mubr.msk.bf16.gmra.mrb[8].mxu1 %vm1031_vm6, %v5631_v39  ;;  %v5802_v39 = vcombine.low %v7644_v28, %v7657_v62  ;;  %v3243_v34 = vrot.slane %v7461_v14, 5  ;;  %v3246_v0 = vrot.slane %v7466_v44, 5  ;;  %v7672_v10 = vsel %vm7523_vm9, %v3238_v22, %v3239_v54  ;;  %v1539_v53 = vld [vmem:[#allocation2 + $0x18] sm:$0xe] }
  0xd6   : > { %6183 = vmatprep.mubr.msk.bf16.mxu1 %vm1031_vm6, %v5632_v18  ;;  %v5788_v5 = vrot.slane %v3094_v7, 9  ;;  %v3250_v47 = vrot.slane %v7491_v3, 5  ;;  %v3253_v15 = vrot.slane %v7495_v25, 5  ;;  %v7679_v18 = vld [vmem:[%s8884_s3 + $0x6] sm:$0x3]  ;;  %v5803_v14 = vcombine.low %v7661_v24, %v7672_v10 }
  0xd7   : > { %v7686_v44 = vsel %vm7523_vm9, %v5787_v12, %v3243_v34  ;;  %v3245_v57 = vrot.slane %v3243_v34, 4  ;;  %v1799_v3 = vsel %vm1080_vm0, %v7507_v32, 0  ;;  %v3198_v25 = vsel %vm7523_vm9, %v3196_v41, %v3197_v21  ;;  %v6868_v24 = vld [vmem:[#allocation2 + $0x2c] sm:$0x1] }
  0xd8   : > { %v3208_v11 = vrot.slane %v7308_v23, 5  ;;  %v3252_v17 = vrot.slane %v3250_v47, 4  ;;  %6204 = vmatpush3.bf16.msra.mxu1 %v1799_v3  ;;  %v8925_v28 = vrot.slane %v7282_v49, 5  ;;  %v3205_v32 = vsel %vm7523_vm9, %v3203_v59, %v3204_v30  ;;  %v3089_v23 = vld [vmem:[#allocation2 + $0x84] sm:$0xe] }
  0xd9   : > { %6316 = vmatmul.mubr.msk.bf16.gmra.mrb[8].mxu0 %vm1031_vm6, %v5795_v63  ;;  %v7696_v63 = vsel %vm7523_vm9, %v5788_v5, %v3250_v47  ;;  %v3215_v42 = vrot.slane %v7355_v29, 5  ;;  %v7707_v41 = vsel %vm7523_vm9, %v3245_v57, %v3246_v0  ;;  %6734 = vmatprep.subr.msk.bf16.mxu1 %vm1080_vm0, %v7679_v18  ;;  %v5782_v20 = vrot.slane %v3088_v50, 9  ;;  %v1537_v3 = vld [vmem:[#allocation2] sm:$0xe] }
  0xda   : > { %6319 = vmatprep.mubr.msk.bf16.mxu0 %vm1031_vm6, %v5796_v27  ;;  %v3202_v6 = vsel %vm7523_vm9, %v5781_v45, %v8925_v28  ;;  %v5804_v21 = vcombine.low %v7686_v44, %v7707_v41  ;;  %v7715_v49 = vsel %vm7523_vm9, %v3252_v17, %v3253_v15  ;;  %v5797_v45 = vcombine.low %v3195_v31, %v3198_v25  ;;  %v7731_v31 = vld [vmem:[#allocation2 + $0x70] sm:$0xf] }
  0xdb   : > { %v5805_v29 = vcombine.low %v7696_v63, %v7715_v49  ;;  %v8926_v59 = vcombine.low %v7613_v9, %v7615_v60  ;;  %v5798_v30 = vcombine.low %v3202_v6, %v3205_v32  ;;  %v3210_v7 = vrot.slane %v3208_v11, 4  ;;  %v6863_v9 = vld [vmem:[#allocation2 + $0x6c] sm:$0xf]  ;;  %v1541_v6 = vld [vmem:[#allocation2 + $0x30] sm:$0xe] }
  0xdc   : > { %v3211_v27 = vrot.slane %v7320_v43, 5  ;;  %v8927_v54 = vcombine.low %v7620_v4, %v7622_v16  ;;  %v5783_v12 = vrot.slane %v3089_v23, 9  ;;  %v3217_v62 = vrot.slane %v3215_v42, 4  ;;  %v6867_v23 = vld [vmem:[#allocation2 + $0x20] sm:$0x1] }
  0xdd   : > { %6184 = vmatmul.mubr.msk.bf16.gmra.mrb[12].mxu1 %vm1031_vm6, %v8926_v59  ;;  %v3218_v22 = vrot.slane %v7360_v37, 5  ;;  %v5635_v34 = vcombine.low %v6863_v9, %v7731_v31  ;;  %v3209_v43 = vsel %vm7523_vm9, %v5782_v20, %v3208_v11  ;;  %v5636_v0 = vcombine.low %v7332_v58, %v7340_v1  ;;  %v1538_v11 = vld [vmem:[#allocation2 + $0xc] sm:$0xe]  ;;  %v1542_v20 = vld [vmem:[#allocation2 + $0x3c] sm:$0xe] }
  0xde   : > { %6187 = vmatprep.mubr.msk.bf16.mxu1 %vm1031_vm6, %v8927_v54  ;;  %v3212_v4 = vsel %vm7523_vm9, %v3210_v7, %v3211_v27  ;;  %v3216_v37 = vsel %vm7523_vm9, %v5783_v12, %v3215_v42  ;;  %v5637_v57 = vcombine.low %v7363_v61, %v7368_v56  ;;  %v5638_v58 = vcombine.low %v7395_v36, %v7400_v48  ;;  %v6865_v56 = vld [vmem:[#allocation2 + $0x8] sm:$0x1] }
  0xdf   : > { %v3219_v5 = vsel %vm7523_vm9, %v3217_v62, %v3218_v22  ;;  %v5799_v47 = vcombine.low %v3209_v43, %v3212_v4  ;;  %v1590_v1 = vrot.slane %v7520_v55, 5  ;;  %v5639_v61 = vcombine.low %v7418_v35, %v7425_v46  ;;  %v6869_v62 = vld [vmem:[#allocation2 + $0x38] sm:$0x1]  ;;  %v6870_v43 = vld [vmem:[#allocation2 + $0x44] sm:$0x1] }
  0xe0   : > { %v5800_v15 = vcombine.low %v3216_v37, %v3219_v5  ;;  %v1593_v25 = vrot.slane %v6865_v56, 5  ;;  %v5640_v36 = vcombine.low %v7447_v52, %v7449_v2  ;;  %v5658_v48 = vrot.slane %v1537_v3, 9 }
  0xe1   : > { %6320 = vmatmul.mubr.msk.bf16.gmra.mrb[12].mxu0 %vm1031_vm6, %v5797_v45  ;;  %v1592_v50 = vrot.slane %v1590_v1, 4  ;;  %v1597_v55 = vrot.slane %v7560_v40, 5  ;;  %v1604_v17 = vrot.slane %v7563_v51, 5  ;;  %v1611_v52 = vrot.slane %v7580_v26, 5  ;;  %v6866_v40 = vld [vmem:[#allocation2 + $0x14] sm:$0x1] }
  0xe2   : > { %6323 = vmatprep.mubr.msk.bf16.mxu0 %vm1031_vm6, %v5798_v30  ;;  %v1591_v35 = vsel %vm7523_vm9, %v5658_v48, %v1590_v1  ;;  %v5659_v28 = vrot.slane %v1538_v11, 9  ;;  %v5660_v32 = vrot.slane %v1539_v53, 9  ;;  %v1607_v45 = vrot.slane %v6867_v23, 5  ;;  %v8928_v26 = vld [vmem:[#allocation9_spill] sm:$0xff]  ;;  %v8930_v1 = vld [vmem:[#allocation11_spill] sm:$0xff]  ;;  %v8931_v48 = vld [vmem:[#allocation12_spill] sm:$0xff] }
  0xe3   : > { %v1594_v46 = vsel %vm7523_vm9, %v1592_v50, %v1593_v25  ;;  %v1599_v51 = vrot.slane %v1597_v55, 4  ;;  %v1606_v42 = vrot.slane %v1604_v17, 4  ;;  %v1625_v59 = vrot.slane %v7597_v38, 5  ;;  %v1544_v25 = vld [vmem:[#allocation2 + $0x54] sm:$0xe] }
  0xe4   : > { %v5675_v7 = vcombine.low %v1591_v35, %v1594_v46  ;;  %v5661_v27 = vrot.slane %v1540_v8, 9  ;;  %v1614_v10 = vrot.slane %v6868_v24, 5  ;;  %v5662_v54 = vrot.slane %v1541_v6, 9  ;;  %v1545_v11 = vld [vmem:[#allocation2 + $0x60] sm:$0xe] }
  0xe5   : > { %6188 = vmatmul.mubr.msk.bf16.gmra.mrb[16].mxu1 %vm1031_vm6, %v5635_v34  ;;  %v1621_v22 = vrot.slane %v6869_v62, 5  ;;  %v1598_v38 = vsel %vm7523_vm9, %v5659_v28, %v1597_v55  ;;  %v5663_v41 = vrot.slane %v1542_v20, 9  ;;  %v1608_v9 = vsel %vm7523_vm9, %v1606_v42, %v1607_v45  ;;  %v6871_v46 = vld [vmem:[#allocation2 + $0x50] sm:$0x1]  ;;  %v1548_v6 = vld [vmem:[#allocation2 + $0x84] sm:$0xe] }
  0xe6   : > { %6191 = vmatprep.mubr.msk.bf16.mxu1 %vm1031_vm6, %v5636_v0  ;;  %v1627_v34 = vrot.slane %v1625_v59, 4  ;;  %v1628_v4 = vrot.slane %v6870_v43, 5  ;;  %v6801_v0 = vld [vmem:[#allocation2 + $0x18] sm:$0xff]   ;;  %v7797_v37 = vsel %vm7523_vm9, %v5661_v27, %v1611_v52  ;;  %v7813_v3 = vsel %vm1080_vm0, %v8930_v1, 0  ;;  %v6802_v45 = vld [vmem:[#allocation2 + $0x24] sm:$0xff]  }
  0xe7   : > { %v7817_v56 = vsel %vm7523_vm9, %v5663_v41, %v1625_v59  ;;  %v1632_v50 = vrot.slane %v8931_v48, 5  ;;  %v1639_v55 = vrot.slane %v7615_v60, 5  ;;  %v1653_v35 = vrot.slane %v7731_v31, 5  ;;  %v6803_v31 = vld [vmem:[#allocation2 + $0x30] sm:$0xff]   ;;  %v1550_v41 = vld [vmem:[#allocation2 + $0x9c] sm:$0xe] }
  0xe8   : > { %v1635_v8 = vrot.slane %v6871_v46, 5  ;;  %v2158_v23 = vsel %vm1080_vm0, %v7679_v18, 0  ;;  %v3908_v48 = vld [vmem:[#allocation2 + $0x18] sm:$0xf] }
  0xe9   : > { %6324 = vmatmul.mubr.msk.bf16.gmra.mrb[16].mxu0 %vm1031_vm6, %v5799_v47  ;;  %v1634_v20 = vrot.slane %v1632_v50, 4  ;;  %v1641_v59 = vrot.slane %v1639_v55, 4  ;;  %v1655_v24 = vrot.slane %v1653_v35, 4 }
  0xea   : > { %6327 = vmatprep.mubr.msk.bf16.mxu0 %vm1031_vm6, %v5800_v15 }
  0xed   : > { %6192 = vmatmul.mubr.msk.bf16.gmra.mrb[20].mxu1 %vm1031_vm6, %v5637_v57  ;;  %v1543_v57 = vld [vmem:[#allocation2 + $0x48] sm:$0xe] }
  0xee   : > { %6195 = vmatprep.mubr.msk.bf16.mxu1 %vm1031_vm6, %v5638_v58  ;;  %v5664_v49 = vrot.slane %v1543_v57, 9  ;;  %v7853_v57 = vld [vmem:[%s8884_s3 + $0x10] sm:$0x3] }
  0xf0   : > { %v7844_v18 = vsel %vm7523_vm9, %v5664_v49, %v1632_v50  ;;  %v3909_v49 = vld [vmem:[#allocation2 + $0x1c] sm:$0xf] }
  0xf1   : > { %6328 = vmatmul.mubr.msk.bf16.gmra.mrb[20].mxu0 %vm1031_vm6, %v5801_v33  ;;  %v1618_v33 = vrot.slane %v7588_v19, 5  ;;  %v8929_v19 = vld [vmem:[#allocation8_spill] sm:$0xff] }
  0xf2   : > { %6331 = vmatprep.mubr.msk.bf16.mxu0 %vm1031_vm6, %v5802_v39  ;;  %v1600_v39 = vrot.slane %v6866_v40, 5  ;;  %v5641_v30 = vcombine.low %v8929_v19, %v8928_v26  ;;  %v1547_v40 = vld [vmem:[#allocation2 + $0x78] sm:$0xe] }
  0xf3   : > { %v1620_v12 = vrot.slane %v1618_v33, 4  ;;  %v7805_v47 = vsel %vm7523_vm9, %v5662_v54, %v1618_v33  ;;  %v6872_v33 = vld [vmem:[#allocation2 + $0x5c] sm:$0x1]  ;;  %v5668_v54 = vrot.slane %v1547_v40, 9  ;;  %v3957_v40 = vshrl.u32 %v3908_v48, 16 }
  0xf4   : > { %v1601_v44 = vsel %vm7523_vm9, %v1599_v51, %v1600_v39  ;;  %v1642_v60 = vrot.slane %v6872_v33, 5  ;;  %v6873_v39 = vld [vmem:[#allocation2 + $0x7c] sm:$0xf]  ;;  %v5666_v51 = vrot.slane %v1545_v11, 9 }
  0xf5   : > { %6196 = vmatmul.mubr.msk.bf16.gmra.mrb[24].mxu1 %vm1031_vm6, %v5639_v61  ;;  %v7809_v15 = vsel %vm7523_vm9, %v1620_v12, %v1621_v22  ;;  %v5676_v58 = vcombine.low %v1598_v38, %v1601_v44  ;;  %v1549_v12 = vld [vmem:[#allocation2 + $0x90] sm:$0xe]  ;;  %v6877_v22 = vld [vmem:[#allocation2 + $0x80] sm:$0x1]  ;;  %v5669_v44 = vrot.slane %v1548_v6, 9 }
  0xf6   : > { %6199 = vmatprep.mubr.msk.bf16.mxu1 %vm1031_vm6, %v5640_v36  ;;  %v7825_v36 = vsel %vm7523_vm9, %v1627_v34, %v1628_v4  ;;  %v5679_v63 = vcombine.low %v7805_v47, %v7809_v15  ;;  %v1663_v38 = vrot.slane %v6877_v22, 5  ;;  %v6878_v34 = vld [vmem:[#allocation2 + $0x8c] sm:$0x1]  ;;  %v6879_v4 = vld [vmem:[#allocation2 + $0x94] sm:$0xf]  ;;  %v7862_v1 = vsel %vm7523_vm9, %v1641_v59, %v1642_v60 }
  0xf7   : > { %v5680_v28 = vcombine.low %v7817_v56, %v7825_v36  ;;  %v1670_v43 = vrot.slane %v6878_v34, 5  ;;  %v7900_v60 = vld [vmem:[#allocation2 + $0xa8] sm:$0xe]  ;;  %v6881_v59 = vld [vmem:[#allocation2 + $0xa0] sm:$0xf]  ;;  %v3959_v15 = vrot.slane %v3957_v40, 4 }
  0xf8   : > { %v6807_v40 = vld [vmem:[#allocation2 + $0x60] sm:$0xff]  }
  0xf9   : > { %6332 = vmatmul.mubr.msk.bf16.gmra.mrb[24].mxu0 %vm1031_vm6, %v5803_v14  ;;  %v1613_v14 = vrot.slane %v1611_v52, 4  ;;  %v5665_v52 = vrot.slane %v1544_v25, 9 }
  0xfa   : > { %6335 = vmatprep.mubr.msk.bf16.mxu0 %vm1031_vm6, %v5804_v21  ;;  %v1605_v21 = vsel %vm7523_vm9, %v5660_v32, %v1604_v17  ;;  %v1646_v17 = vrot.slane %v7622_v16, 5  ;;  %v1660_v16 = vrot.slane %v6873_v39, 5  ;;  %v6874_v32 = vld [vmem:[#allocation2 + $0x88] sm:$0xf]  ;;  %v3960_v39 = vshll.u32 %v3908_v48, 16 }
  0xfb   : > { %v7801_v5 = vsel %vm7523_vm9, %v1613_v14, %v1614_v10  ;;  %v5677_v61 = vcombine.low %v1605_v21, %v1608_v9  ;;  %v1667_v42 = vrot.slane %v6874_v32, 5  ;;  %v6876_v10 = vld [vmem:[#allocation2 + $0x74] sm:$0x1]  ;;  %v7848_v21 = vsel %vm7523_vm9, %v5665_v52, %v1639_v55 }
  0xfc   : > { %v5678_v53 = vcombine.low %v7797_v37, %v7801_v5  ;;  %v1648_v19 = vrot.slane %v1646_v17, 4  ;;  %v1656_v14 = vrot.slane %v6876_v10, 5  ;;  %v1662_v62 = vrot.slane %v1660_v16, 4  ;;  %v3914_v10 = vld [vmem:[#allocation2 + $0x30] sm:$0xf] }
  0xfd   : > { %6200 = vmatmul.mubr.msk.bf16.gmra.mrb[28].mxu1 %vm1031_vm6, %v5641_v30  ;;  %v6875_v30 = vld [vmem:[#allocation2 + $0x68] sm:$0x1]  ;;  %v1669_v9 = vrot.slane %v1667_v42, 4  ;;  %v7884_v11 = vsel %vm7523_vm9, %v5668_v54, %v1660_v16  ;;  %v6804_v16 = vld [vmem:[#allocation2 + $0x3c] sm:$0xff]   ;;  %v5682_v6 = vcombine.low %v7848_v21, %v7862_v1  ;;  %v3966_v32 = vshll.u32 %v3909_v49, 16 }
  0xfe   : > { %6205 = vmatprep.mubr.msk.bf16.mxu1 %vm1031_vm6, %v5675_v7  ;;  %v1649_v7 = vrot.slane %v6875_v30, 5  ;;  %v7880_v55 = vsel %vm7523_vm9, %v1655_v24, %v1656_v14  ;;  %v3911_v30 = vld [vmem:[#allocation2 + $0x24] sm:$0xf]  ;;  %v3912_v24 = vld [vmem:[#allocation2 + $0x28] sm:$0xf]  ;;  %v4008_v34 = vshll.u32 %v3914_v10, 16 }
  0xff   : > { %v7898_v52 = vsel %vm7523_vm9, %v1669_v9, %v1670_v43  ;;  %v7935_v54 = vld [vmem:[#allocation2 + $0x34] sm:$0xf]  ;;  %v3981_v22 = vshrl.u32 %v3911_v30, 16  ;;  %v4005_v9 = vshrl.u32 %v3914_v10, 16  ;;  %v1688_v48 = vrot.slane %v7449_v2, 5 }
 0x100   : > { %v7870_v25 = vsel %vm7523_vm9, %v1648_v19, %v1649_v7  ;;  %v1681_v19 = vrot.slane %v6881_v59, 5  ;;  %v7953_v2 = vld [vmem:[#allocation2 + $0x2c] sm:$0x1]  ;;  %v7962_v10 = vld [vmem:[#allocation2 + $0x38] sm:$0x1] }
 0x101   : > { %6336 = vmatmul.mubr.msk.bf16.gmra.mrb[28].mxu0 %vm1031_vm6, %v5805_v29  ;;  %v1546_v29 = vld [vmem:[#allocation2 + $0x6c] sm:$0xe]  ;;  %8933 = vst [vmem:[#allocation9_spill] sm:$0xff] %v7953_v2  ;;  %v1690_v36 = vrot.slane %v1688_v48, 4  ;;  %v8012_v21 = vld [vmem:[#allocation2 + $0x44] sm:$0x1] }
 0x102   : > { %6341 = vmatprep.mubr.msk.bf16.mxu0 %vm1031_vm6, %v6801_v0  ;;  %v5667_v27 = vrot.slane %v1546_v29, 9  ;;  %v1674_v0 = vrot.slane %v6879_v4, 5  ;;  %v7888_v29 = vsel %vm7523_vm9, %v1662_v62, %v1663_v38  ;;  %v3984_v38 = vshll.u32 %v3911_v30, 16 }
 0x103   : > { %v5685_v37 = vcombine.low %v7884_v11, %v7888_v29  ;;  %v1683_v4 = vrot.slane %v1681_v19, 4  ;;  %v4010_v30 = vrot.slane %v4008_v34, 5  ;;  %v8082_v29 = vld [vmem:[#allocation2 + $0x5c] sm:$0x1] }
 0x104   : > { %v7876_v50 = vsel %vm7523_vm9, %v5667_v27, %v1653_v35  ;;  %v6880_v35 = vld [vmem:[#allocation2 + $0x98] sm:$0x1]  ;;  %v1676_v33 = vrot.slane %v1674_v0, 4  ;;  %v5672_v27 = vrot.slane %v7900_v60, 9  ;;  %v6808_v60 = vld [vmem:[#allocation2 + $0x6c] sm:$0xff]  }
 0x105   : > { %6206 = vmatmul.mubr.msk.bf16.vlgmr.msra.gmra.mrb[0].mxu1 %vm1031_vm6, %v5676_v58  ;;  %v7858_v58 = vsel %vm7523_vm9, %v1634_v20, %v1635_v8  ;;  %v1677_v46 = vrot.slane %v6880_v35, 5  ;;  %v5671_v8 = vrot.slane %v1550_v41, 9  ;;  %v3994_v41 = vshrl.u32 %v3912_v24, 16  ;;  %v1552_v35 = vld [vmem:[#allocation2 + $0xb4] sm:$0xe] }
 0x106   : > { %6209 = vmatprep.mubr.msk.bf16.mxu1 %vm1031_vm6, %v5677_v61  ;;  %6238 = vmatpush3.bf16.msra.mxu1 %v2158_v23  ;;  %v7866_v61 = vsel %vm7523_vm9, %v5666_v51, %v1646_v17  ;;  %v5670_v17 = vrot.slane %v1549_v12, 9  ;;  %v5681_v51 = vcombine.low %v7844_v18, %v7858_v58  ;;  %v6805_v23 = vld [vmem:[#allocation2 + $0x48] sm:$0xff]   ;;  %v3910_v12 = vld [vmem:[#allocation2 + $0x20] sm:$0x1]  ;;  %v7938_v18 = vrot.slane %v3966_v32, 5 }
 0x107   : > { %v7929_v14 = vsel %vm7523_vm9, %v1676_v33, %v1677_v46  ;;  %v7933_v47 = vsel %vm7523_vm9, %v5671_v8, %v1681_v19  ;;  %v4018_v58 = vshrl.u32 %v7935_v54, 16  ;;  %v1695_v46 = vrot.slane %v8928_v26, 5  ;;  %v6806_v33 = vld [vmem:[#allocation2 + $0x54] sm:$0xff]  }
 0x108   : > { %v7916_v20 = vsel %vm7523_vm9, %v5670_v17, %v1674_v0  ;;  %v4014_v0 = vshll.u32 %v7935_v54, 16  ;;  %v8932_v17 = vld [vmem:[#allocation7_spill] sm:$0xff]  ;;  %v3976_v8 = vshll.u32 %v3910_v12, 16  ;;  %v3983_v32 = vrot.slane %v3981_v22, 4 }
 0x109   : > { %6342 = vmatmul.mubr.msk.bf16.vlgmr.msra.gmra.mrb[0].mxu0 %vm1031_vm6, %v6802_v45  ;;  %v5683_v45 = vcombine.low %v7866_v61, %v7870_v25  ;;  %v5687_v43 = vcombine.low %v7916_v20, %v7929_v14  ;;  %v3996_v19 = vrot.slane %v3994_v41, 4  ;;  %v4007_v26 = vrot.slane %v4005_v9, 4  ;;  %v7967_v12 = vld [vmem:[#allocation2 + $0x40] sm:$0xf] }
 0x10a   : > { %6374 = vmatpush3.bf16.msra.mxu0 %v7813_v3  ;;  %6345 = vmatprep.mubr.msk.bf16.mxu0 %vm1031_vm6, %v6803_v31  ;;  %v7892_v3 = vsel %vm7523_vm9, %v5669_v44, %v1667_v42  ;;  %v3970_v42 = vshrl.u32 %v3909_v49, 16  ;;  %v5684_v31 = vcombine.low %v7876_v50, %v7880_v55  ;;  %v3990_v44 = vshll.u32 %v3912_v24, 16  ;;  %v8125_v20 = vld [vmem:[#allocation2 + $0x80] sm:$0x1] }
 0x10b   : > { %6739 = vmatprep.subr.msk.bf16.mxu0 %vm1080_vm0, %v7853_v57  ;;  %v5686_v5 = vcombine.low %v7892_v3, %v7898_v52  ;;  %v1691_v49 = vrot.slane %v8932_v17, 5  ;;  %v5673_v24 = vrot.slane %v1552_v35, 9  ;;  %v4020_v56 = vrot.slane %v4018_v58, 4 }
 0x10c   : > { %v3972_v62 = vrot.slane %v3970_v42, 4  ;;  %v3986_v42 = vrot.slane %v3984_v38, 5  ;;  %v7955_v59 = vrot.slane %v3990_v44, 5  ;;  %v3978_v44 = vrot.slane %v3976_v8, 5 }
 0x10d   : > { %6210 = vmatmul.mubr.msk.bf16.gmra.mrb[4].mxu1 %vm1031_vm6, %v5678_v53  ;;  %v6882_v53 = vld [vmem:[#allocation2 + $0xa4] sm:$0x1]  ;;  %v4024_v17 = vshll.u32 %v7962_v10, 16  ;;  %v4038_v35 = vshll.u32 %v7967_v12, 16  ;;  %v7984_v8 = vsel %vm7523_vm9, %v5673_v24, %v1695_v46 }
 0x10e   : > { %6213 = vmatprep.mubr.msk.bf16.mxu1 %vm1031_vm6, %v5679_v63  ;;  %v1684_v7 = vrot.slane %v6882_v53, 5  ;;  %v3962_v63 = vrot.slane %v3960_v39, 5  ;;  %v3987_v9 = vor.u32 %v3986_v42, %v3983_v32  ;;  %v3997_v34 = vor.u32 %v3996_v19, %v7955_v59  ;;  %v6809_v19 = vld [vmem:[#allocation2 + $0x78] sm:$0xff]  }
 0x110   : > { %v3963_v39 = vor.u32 %v3962_v63, %v3959_v15  ;;  %v7960_v53 = vsel %vm7523_vm9, %v1683_v4, %v1684_v7  ;;  %v7964_v15 = vrot.slane %v4014_v0, 5  ;;  %v4000_v7 = vshll.u32 %v7953_v2, 16  ;;  %v8120_v2 = vld [vmem:[#allocation2 + $0x74] sm:$0x1] }
 0x111   : > { %6346 = vmatmul.mubr.msk.bf16.gmra.mrb[4].mxu0 %vm1031_vm6, %v6804_v16  ;;  %v3973_v16 = vor.u32 %v3972_v62, %v7938_v18  ;;  %v4011_v4 = vor.u32 %v4010_v30, %v4007_v26  ;;  %v7977_v0 = vsel %vm7523_vm9, %v5672_v27, %v1688_v48  ;;  %v7989_v27 = vsel %vm7523_vm9, %v1690_v36, %v1691_v49 }
 0x112   : > { %6349 = vmatprep.mubr.msk.bf16.mxu0 %vm1031_vm6, %v6805_v23  ;;  %v3917_v23 = vld [vmem:[#allocation2 + $0x3c] sm:$0xf]  ;;  %v3964_v38 = vrot.slane %v3963_v39, 4  ;;  %v4021_v58 = vor.u32 %v4020_v56, %v7964_v15  ;;  %v4042_v39 = vshrl.u32 %v7967_v12, 16  ;;  %v3988_v26 = vrot.slane %v3987_v9, 4 }
 0x113   : > { %v4029_v62 = vshrl.u32 %v3917_v23, 16  ;;  %v4032_v22 = vshll.u32 %v3917_v23, 16  ;;  %v3974_v41 = vrot.slane %v3973_v16, 4  ;;  %v3920_v16 = vld [vmem:[#allocation2 + $0x48] sm:$0xf]  ;;  %v3998_v30 = vrot.slane %v3997_v34, 4 }
 0x114   : > { %v3969_v42 = vsel %vm7148_vm5, %v3964_v38, %v7938_v18  ;;  %v7998_v23 = vld [vmem:[#allocation2 + $0x4c] sm:$0xf]  ;;  %v4012_v24 = vrot.slane %v4011_v4, 4  ;;  %v4022_v18 = vrot.slane %v4021_v58, 4  ;;  %v4026_v56 = vrot.slane %v4024_v17, 5 }
 0x115   : > { %6214 = vmatmul.mubr.msk.bf16.gmra.mrb[8].mxu1 %vm1031_vm6, %v5680_v28  ;;  %v8934_v28 = vld [vmem:[#allocation10_spill] sm:$0xff]  ;;  %v3979_v49 = vsel %vm7148_vm5, %v3974_v41, %v3978_v44  ;;  %v8010_v36 = vrot.slane %v4038_v35, 5  ;;  %v3993_v38 = vsel %vm7148_vm5, %v3988_v26, %v7955_v59  ;;  %v8035_v41 = vld [vmem:[#allocation2 + $0x50] sm:$0x1]  ;;  %v3923_v9 = vld [vmem:[#allocation2 + $0x54] sm:$0xf] }
 0x116   : > { %6217 = vmatprep.mubr.msk.bf16.mxu1 %vm1031_vm6, %v5681_v51  ;;  %v1698_v63 = vrot.slane %v8934_v28, 5  ;;  %v1697_v51 = vrot.slane %v1695_v46, 4  ;;  %v4002_v46 = vrot.slane %v4000_v7, 5  ;;  %v4053_v28 = vshrl.u32 %v3920_v16, 16  ;;  %v8045_v17 = vld [vmem:[#allocation2 + $0x58] sm:$0xf] }
 0x117   : > { %v8033_v7 = vsel %vm1080_vm0, %v7853_v57, 0  ;;  %v4017_v34 = vsel %vm7148_vm5, %v4012_v24, %v7964_v15  ;;  %v4027_v4 = vsel %vm7148_vm5, %v4022_v18, %v4026_v56  ;;  %v4048_v58 = vshll.u32 %v8012_v21, 16  ;;  %v3926_v35 = vld [vmem:[#allocation2 + $0x60] sm:$0xf]  ;;  %v6810_v15 = vld [vmem:[#allocation2 + $0x84] sm:$0xff]  }
 0x118   : > { %v7993_v48 = vsel %vm7523_vm9, %v1697_v51, %v1698_v63  ;;  %v4056_v63 = vshll.u32 %v3920_v16, 16  ;;  %v8024_v51 = vcombine.low %v3969_v42, %v3979_v49  ;;  %v4003_v44 = vsel %vm7148_vm5, %v3998_v30, %v4002_v46  ;;  %8936 = vst [vmem:[#allocation8_spill] sm:$0xff] %v8033_v7  ;;  %v8052_v16 = vld [vmem:[#allocation2 + $0x64] sm:$0xf]  ;;  %v6811_v49 = vld [vmem:[#allocation2 + $0x90] sm:$0xff]  }
 0x119   : > { %6350 = vmatmul.mubr.msk.bf16.gmra.mrb[8].mxu0 %vm1031_vm6, %v6806_v33  ;;  %v4031_v33 = vrot.slane %v4029_v62, 4  ;;  %v4062_v62 = vshll.u32 %v7998_v23, 16  ;;  %v8043_v59 = vrot.slane %v4053_v28, 4  ;;  %v4072_v42 = vshll.u32 %v8035_v41, 16 }
 0x11a   : > { %6353 = vmatprep.mubr.msk.bf16.mxu0 %vm1031_vm6, %v6807_v40  ;;  %v4034_v40 = vrot.slane %v4032_v22, 5  ;;  %v4077_v46 = vshrl.u32 %v3923_v9, 16  ;;  %v4086_v26 = vshll.u32 %v8045_v17, 16  ;;  %v4090_v30 = vshrl.u32 %v8045_v17, 16 }
 0x11b   : > { %v4101_v24 = vshrl.u32 %v3926_v35, 16  ;;  %v4104_v18 = vshll.u32 %v3926_v35, 16  ;;  %v8067_v56 = vcombine.low %v3993_v38, %v4003_v44  ;;  %v8069_v28 = vrot.slane %v4048_v58, 5  ;;  %v8094_v35 = vld [vmem:[#allocation2 + $0x7c] sm:$0xf] }
 0x11c   : > { %v4035_v1 = vor.u32 %v4034_v40, %v4031_v33  ;;  %v4058_v40 = vrot.slane %v4056_v63, 5  ;;  %v4110_v50 = vshll.u32 %v8052_v16, 16  ;;  %v4114_v55 = vshrl.u32 %v8052_v16, 16  ;;  %v8084_v63 = vld [vmem:[#allocation2 + $0x70] sm:$0xf] }
 0x11d   : > { %6218 = vmatmul.mubr.msk.bf16.gmra.mrb[12].mxu1 %vm1031_vm6, %v5682_v6  ;;  %v4044_v6 = vrot.slane %v4042_v39, 4  ;;  %v8050_v39 = vrot.slane %v4062_v62, 5  ;;  %v4079_v38 = vrot.slane %v4077_v46, 4  ;;  %v4103_v58 = vrot.slane %v4101_v24, 4 }
 0x11e   : > { %6221 = vmatprep.mubr.msk.bf16.mxu1 %vm1031_vm6, %v5683_v45  ;;  %v4066_v45 = vshrl.u32 %v7998_v23, 16  ;;  %v8047_v33 = vrot.slane %v4035_v1, 4  ;;  %v4059_v11 = vor.u32 %v4058_v40, %v8043_v59  ;;  %v4106_v59 = vrot.slane %v4104_v18, 5 }
 0x11f   : > { %v4045_v57 = vor.u32 %v4044_v6, %v8010_v36  ;;  %v8098_v40 = vrot.slane %v4110_v50, 5  ;;  %v4134_v46 = vshll.u32 %v8084_v63, 16  ;;  %v4096_v24 = vshll.u32 %v8082_v29, 16 }
 0x120   : > { %v4158_v18 = vshll.u32 %v8094_v35, 16  ;;  %v4162_v50 = vshrl.u32 %v8094_v35, 16  ;;  %v4107_v1 = vor.u32 %v4106_v59, %v4103_v58  ;;  %v3935_v58 = vld [vmem:[#allocation2 + $0x84] sm:$0xf] }
 0x121   : > { %6354 = vmatmul.mubr.msk.bf16.gmra.mrb[12].mxu0 %vm1031_vm6, %v6808_v60  ;;  %v8054_v60 = vrot.slane %v4066_v45, 4  ;;  %v8079_v6 = vrot.slane %v4045_v57, 4  ;;  %v8089_v45 = vrot.slane %v4072_v42, 5  ;;  %v8096_v57 = vld [vmem:[#allocation2 + $0x68] sm:$0x1] }
 0x122   : > { %6357 = vmatprep.mubr.msk.bf16.mxu0 %vm1031_vm6, %v6809_v19  ;;  %v4080_v19 = vshll.u32 %v3923_v9, 16  ;;  %v3932_v9 = vld [vmem:[#allocation2 + $0x78] sm:$0xf]  ;;  %v4120_v61 = vshll.u32 %v8096_v57, 16  ;;  %v8127_v14 = vrot.slane %v4158_v18, 5  ;;  %v4168_v18 = vshll.u32 %v8125_v20, 16 }
 0x123   : > { %v4069_v62 = vor.u32 %v8054_v60, %v8050_v39  ;;  %v4149_v25 = vshrl.u32 %v3932_v9, 16 }
 0x124   : > { %v4082_v44 = vrot.slane %v4080_v19, 5  ;;  %v4138_v19 = vshrl.u32 %v8084_v63, 16 }
 0x125   : > { %6222 = vmatmul.mubr.msk.bf16.gmra.mrb[16].mxu1 %vm1031_vm6, %v5684_v31  ;;  %v8073_v31 = vcombine.low %v4017_v34, %v4027_v4  ;;  %v8092_v34 = vrot.slane %v4086_v26, 5  ;;  %v4092_v4 = vrot.slane %v4090_v30, 4  ;;  %v6812_v26 = vld [vmem:[#allocation2 + $0x9c] sm:$0xff]   ;;  %v4060_v30 = vrot.slane %v4059_v11, 4 }
 0x126   : > { %6225 = vmatprep.mubr.msk.bf16.mxu1 %vm1031_vm6, %v5685_v37  ;;  %v3929_v37 = vld [vmem:[#allocation2 + $0x6c] sm:$0xf]  ;;  %v4070_v59 = vrot.slane %v4069_v62, 4 }
 0x127   : > { %8937 = vst [vmem:[#allocation11_spill] sm:$0xff] %v8073_v31  ;;  %v4125_v60 = vshrl.u32 %v3929_v37, 16  ;;  %v4128_v42 = vshll.u32 %v3929_v37, 16  ;;  %v4083_v37 = vor.u32 %v4082_v44, %v4079_v38  ;;  %v4140_v38 = vrot.slane %v4138_v19, 4 }
 0x128   : > { %v4151_v44 = vrot.slane %v4149_v25, 4  ;;  %v4098_v31 = vrot.slane %v4096_v24, 5  ;;  %v4144_v19 = vshll.u32 %v8120_v2, 16 }
 0x129   : > { %6358 = vmatmul.mubr.msk.bf16.gmra.mrb[16].mxu0 %vm1031_vm6, %v6810_v15  ;;  %v4116_v15 = vrot.slane %v4114_v55, 4  ;;  %v6813_v55 = vld [vmem:[#allocation2 + $0xa8] sm:$0xff]   ;;  %v4127_v3 = vrot.slane %v4125_v60, 4  ;;  %v4130_v52 = vrot.slane %v4128_v42, 5  ;;  %v4084_v11 = vrot.slane %v4083_v37, 4 }
 0x12a   : > { %6361 = vmatprep.mubr.msk.bf16.mxu0 %vm1031_vm6, %v6811_v49  ;;  %v4152_v49 = vshll.u32 %v3932_v9, 16  ;;  %v4093_v9 = vor.u32 %v4092_v4, %v8092_v34  ;;  %v4108_v60 = vrot.slane %v4107_v1, 4  ;;  %v4122_v42 = vrot.slane %v4120_v61, 5 }
 0x12b   : > { %v4117_v22 = vor.u32 %v4116_v15, %v8098_v40  ;;  %v4131_v25 = vor.u32 %v4130_v52, %v4127_v3  ;;  %v4075_v3 = vsel %vm7148_vm5, %v4070_v59, %v8089_v45  ;;  %v8164_v45 = vrot.slane %v4144_v19, 5 }
 0x12c   : > { %v4154_v4 = vrot.slane %v4152_v49, 5  ;;  %v4094_v15 = vrot.slane %v4093_v9, 4  ;;  %v4173_v49 = vshrl.u32 %v3935_v58, 16  ;;  %v8938_v9 = vcombine.low %v7933_v47, %v7960_v53 }
 0x12d   : > { %6226 = vmatmul.mubr.msk.bf16.gmra.mrb[20].mxu1 %vm1031_vm6, %v5686_v5  ;;  %v8122_v5 = vrot.slane %v4134_v46, 5  ;;  %v8130_v46 = vld [vmem:[#allocation2 + $0x88] sm:$0xf]  ;;  %v4118_v62 = vrot.slane %v4117_v22, 4  ;;  %v6815_v22 = vld [vmem:[#allocation2 + $0xc0] sm:$0xff]   ;;  %v4113_v52 = vsel %vm7148_vm5, %v4108_v60, %v8098_v40  ;;  %v8939_v47 = vcombine.low %v7977_v0, %v7989_v27 }
 0x12e   : > { %6229 = vmatprep.mubr.msk.bf16.mxu1 %vm1031_vm6, %v5687_v43  ;;  %v4164_v43 = vrot.slane %v4162_v50, 4  ;;  %v4155_v7 = vor.u32 %v4154_v4, %v4151_v44  ;;  %v6814_v50 = vld [vmem:[#allocation2 + $0xb4] sm:$0xff]   ;;  %v4182_v1 = vshll.u32 %v8130_v46, 16  ;;  %v4186_v37 = vshrl.u32 %v8130_v46, 16  ;;  %v3938_v4 = vld [vmem:[#allocation2 + $0x90] sm:$0xf] }
 0x12f   : > { %v4141_v24 = vor.u32 %v4140_v38, %v8122_v5  ;;  %v8156_v38 = vld [vmem:[#allocation2 + $0x8c] sm:$0x1]  ;;  %v8162_v53 = vrot.slane %v4131_v25, 4  ;;  %v4175_v44 = vrot.slane %v4173_v49, 4  ;;  %v8172_v59 = vrot.slane %v4168_v18, 5 }
 0x130   : > { %v4165_v61 = vor.u32 %v4164_v43, %v8127_v14  ;;  %v8170_v40 = vrot.slane %v4155_v7, 4  ;;  %v8174_v43 = vld [vmem:[#allocation2 + $0x94] sm:$0xf]  ;;  %v8179_v27 = vrot.slane %v4182_v1, 5  ;;  %v8940_v7 = vsel %vm7148_vm5, %v8079_v6, %v8069_v28  ;;  %v6816_v1 = vld [vmem:[#allocation2 + $0xcc] sm:$0xff]  }
 0x131   : > { %6362 = vmatmul.mubr.msk.bf16.gmra.mrb[20].mxu0 %vm1031_vm6, %v6812_v26  ;;  %v4176_v26 = vshll.u32 %v3935_v58, 16  ;;  %v8168_v58 = vrot.slane %v4141_v24, 4  ;;  %v8941_v60 = vsel %vm7148_vm5, %v8047_v33, %v8010_v36  ;;  %v4197_v19 = vshrl.u32 %v3938_v4, 16  ;;  %v6822_v36 = vld [vmem:[#allocation2 + $0x48] sm:$0xff]   ;;  %v8381_v33 = vld [vmem:[#allocation2 + $0xbc] sm:$0x1] }
 0x132   : > { %6365 = vmatprep.mubr.msk.bf16.mxu0 %vm1031_vm6, %v6813_v55  ;;  %v4065_v55 = vsel %vm7148_vm5, %v4060_v30, %v8050_v39  ;;  %v4089_v39 = vsel %vm7148_vm5, %v4084_v11, %v8092_v34  ;;  %v4099_v30 = vsel %vm7148_vm5, %v4094_v15, %v4098_v31  ;;  %v4123_v31 = vsel %vm7148_vm5, %v4118_v62, %v4122_v42  ;;  %v6817_v62 = vld [vmem:[#allocation2 + $0xc] sm:$0xff]  }
 0x133   : > { %v4178_v34 = vrot.slane %v4176_v26, 5  ;;  %v8177_v0 = vrot.slane %v4165_v61, 4  ;;  %v8181_v11 = vrot.slane %v4186_v37, 4  ;;  %v4192_v15 = vshll.u32 %v8156_v38, 16  ;;  %v4636_v26 = vld [vmem:[#allocation2 + $0x30] sm:$0xe] }
 0x134   : > { %v8195_v42 = vcombine.low %v8941_v60, %v8940_v7  ;;  %v8197_v25 = vcombine.low %v4065_v55, %v4075_v3  ;;  %v4200_v49 = vshll.u32 %v3938_v4, 16  ;;  %v8199_v24 = vcombine.low %v4089_v39, %v4099_v30  ;;  %v4637_v61 = vld [vmem:[#allocation2 + $0x3c] sm:$0xe] }
 0x135   : > { %6230 = vmatmul.mubr.msk.bf16.gmra.mrb[24].mxu1 %vm1031_vm6, %v8938_v9  ;;  %v8201_v18 = vcombine.low %v4113_v52, %v4123_v31  ;;  %v4206_v28 = vshll.u32 %v8174_v43, 16  ;;  %v4210_v55 = vshrl.u32 %v8174_v43, 16  ;;  %v5890_v3 = vrot.slane %v4636_v26, 9  ;;  %v8397_v9 = vld [vmem:[#allocation2 + $0xc8] sm:$0x1] }
 0x136   : > { %6233 = vmatprep.mubr.msk.bf16.mxu1 %vm1031_vm6, %v8939_v47  ;;  %v8942_v39 = vcombine.low %v7984_v8, %v7993_v48  ;;  %v8229_v30 = vrot.slane %v4197_v19, 4  ;;  %v8231_v52 = vrot.slane %v4200_v49, 5  ;;  %v4714_v47 = vrot.slane %v7935_v54, 5  ;;  %v4639_v48 = vld [vmem:[#allocation2 + $0x54] sm:$0xe] }
 0x137   : > { %v8238_v31 = vrot.slane %v4206_v28, 5  ;;  %v4721_v8 = vrot.slane %v7967_v12, 5  ;;  %v8241_v7 = vrot.slane %v4210_v55, 4  ;;  %v4728_v12 = vrot.slane %v7998_v23, 5 }
 0x138   : > { %v8245_v60 = vsel %vm7523_vm9, %v5890_v3, %v4714_v47  ;;  %v4716_v54 = vrot.slane %v4714_v47, 4  ;;  %v5893_v28 = vrot.slane %v4639_v48, 9  ;;  %v4735_v55 = vrot.slane %v8045_v17, 5  ;;  %v4641_v47 = vld [vmem:[#allocation2 + $0x6c] sm:$0xe] }
 0x139   : > { %6366 = vmatmul.mubr.msk.bf16.gmra.mrb[24].mxu0 %vm1031_vm6, %v6814_v50  ;;  %v4179_v50 = vor.u32 %v4178_v34, %v4175_v44  ;;  %v4717_v44 = vrot.slane %v7962_v10, 5  ;;  %v4638_v34 = vld [vmem:[#allocation2 + $0x48] sm:$0xe]  ;;  %v4724_v10 = vrot.slane %v8012_v21, 5  ;;  %v4723_v49 = vrot.slane %v4721_v8, 4 }
 0x13a   : > { %6369 = vmatprep.mubr.msk.bf16.mxu0 %vm1031_vm6, %v6815_v22  ;;  %v8223_v22 = vrot.slane %v4192_v15, 5  ;;  %v5891_v15 = vrot.slane %v4637_v61, 9  ;;  %v5892_v26 = vrot.slane %v4638_v34, 9  ;;  %v4731_v21 = vrot.slane %v8035_v41, 5  ;;  %v4640_v61 = vld [vmem:[#allocation2 + $0x60] sm:$0xe] }
 0x13b   : > { %v8236_v4 = vrot.slane %v4179_v50, 4  ;;  %v8258_v50 = vsel %vm7523_vm9, %v4716_v54, %v4717_v44  ;;  %v8266_v23 = vsel %vm7523_vm9, %v4723_v49, %v4724_v10  ;;  %v8276_v17 = vsel %vm7523_vm9, %v5893_v28, %v4735_v55  ;;  %v4642_v10 = vld [vmem:[#allocation2 + $0x78] sm:$0xe]  ;;  %v8344_v49 = vld [vmem:[#allocation2 + $0xa4] sm:$0x1] }
 0x13c   : > { %v8251_v19 = vsel %vm7523_vm9, %v5891_v15, %v4721_v8  ;;  %v4737_v44 = vrot.slane %v4735_v55, 4  ;;  %v4738_v34 = vrot.slane %v8082_v29, 5  ;;  %v5894_v8 = vrot.slane %v4640_v61, 9 }
 0x13d   : > { %6234 = vmatmul.mubr.msk.bf16.gmra.mrb[28].mxu1 %vm1031_vm6, %v8942_v39  ;;  %v4730_v39 = vrot.slane %v4728_v12, 4  ;;  %v4742_v48 = vrot.slane %v8052_v16, 5  ;;  %v4745_v54 = vrot.slane %v8096_v57, 5  ;;  %v5895_v29 = vrot.slane %v4641_v47, 9  ;;  %v4646_v16 = vld [vmem:[#allocation2 + $0xa8] sm:$0xe] }
 0x13e   : > { %6239 = vmatprep.mubr.msk.bf16.mxu1 %vm1031_vm6, %v6817_v62  ;;  %v6818_v62 = vld [vmem:[#allocation2 + $0x18] sm:$0xff]   ;;  %v4752_v28 = vrot.slane %v8120_v2, 5  ;;  %v4759_v47 = vrot.slane %v8125_v20, 5  ;;  %v4763_v2 = vrot.slane %v8130_v46, 5  ;;  %v5900_v3 = vrot.slane %v4646_v16, 9 }
 0x13f   : > { %v8281_v15 = vsel %vm7523_vm9, %v4730_v39, %v4731_v21  ;;  %v4643_v21 = vld [vmem:[#allocation2 + $0x84] sm:$0xe]  ;;  %v8298_v57 = vsel %vm7523_vm9, %v5894_v8, %v4742_v48  ;;  %v5896_v39 = vrot.slane %v4642_v10, 9  ;;  %v8943_v8 = vld [vmem:[#allocation8_spill] sm:$0xff]  ;;  %v6820_v10 = vld [vmem:[#allocation2 + $0x30] sm:$0xff]  }
 0x140   : > { %v8414_v16 = vld [vmem:[#allocation2 + $0xd4] sm:$0x1] }
 0x141   : > { %6370 = vmatmul.mubr.msk.bf16.gmra.mrb[28].mxu0 %vm1031_vm6, %v6816_v1  ;;  %v6819_v1 = vld [vmem:[#allocation2 + $0x24] sm:$0xff]  }
 0x142   : > { %6375 = vmatprep.mubr.msk.bf16.mxu0 %vm1031_vm6, %v8024_v51  ;;  %v8270_v51 = vsel %vm7523_vm9, %v5892_v26, %v4728_v12  ;;  %v8290_v26 = vsel %vm7523_vm9, %v4737_v44, %v4738_v34  ;;  %v4749_v12 = vrot.slane %v8084_v63, 5  ;;  %v4756_v63 = vrot.slane %v8094_v35, 5  ;;  %v4644_v34 = vld [vmem:[#allocation2 + $0x90] sm:$0xe]  ;;  %v6821_v35 = vld [vmem:[#allocation2 + $0x3c] sm:$0xff]  }
 0x143   : > { %v5897_v44 = vrot.slane %v4643_v21, 9  ;;  %v8329_v21 = vld [vmem:[#allocation2 + $0xa0] sm:$0xf]  ;;  %v8964_v13 = vcombine.low %v8276_v17, %v8290_v26 }
 0x144   : > { %v8303_v55 = vsel %vm7523_vm9, %v5895_v29, %v4749_v12  ;;  %v4751_v61 = vrot.slane %v4749_v12, 4  ;;  %v8325_v20 = vsel %vm7523_vm9, %v5896_v39, %v4756_v63  ;;  %v4758_v46 = vrot.slane %v4756_v63, 4  ;;  %v4645_v29 = vld [vmem:[#allocation2 + $0x9c] sm:$0xe]  ;;  %v8327_v12 = vld [vmem:[#allocation2 + $0x98] sm:$0x1] }
 0x145   : > { %6240 = vmatmul.mubr.msk.bf16.vlgmr.msra.gmra.mrb[0].mxu1 %vm1031_vm6, %v6818_v62  ;;  %v4744_v62 = vrot.slane %v4742_v48, 4  ;;  %v8944_v48 = vld [vmem:[#allocation11_spill] sm:$0xff]  ;;  %8945 = vst [vmem:[#allocation12_spill] sm:$0xff] %v8325_v20  ;;  %v5898_v39 = vrot.slane %v4644_v34, 9  ;;  %v4770_v63 = vrot.slane %v8174_v43, 5  ;;  %v4808_v20 = vrot.slane %v8414_v16, 5 }
 0x146   : > { %6243 = vmatprep.mubr.msk.bf16.mxu1 %vm1031_vm6, %v6819_v1  ;;  %v8354_v34 = vld [vmem:[#allocation2 + $0xac] sm:$0xf]  ;;  %v8356_v43 = vld [vmem:[#allocation2 + $0xb8] sm:$0xf]  ;;  %v5191_v17 = vld [vmem:[%s8886_s5] sm:$0x3] }
 0x147   : > { %v8310_v1 = vsel %vm7523_vm9, %v4744_v62, %v4745_v54  ;;  %v8321_v54 = vsel %vm7523_vm9, %v4751_v61, %v4752_v28  ;;  %v4766_v28 = vrot.slane %v8156_v38, 5  ;;  %v8340_v61 = vsel %vm7523_vm9, %v4758_v46, %v4759_v47  ;;  %v4647_v47 = vld [vmem:[#allocation2 + $0xb4] sm:$0xe]  ;;  %6740 = vmatprep.subr.msk.bf16.mxu1 %vm1080_vm0, %v5191_v17 }
 0x148   : > { %8947 = vst [vmem:[#allocation10_spill] sm:$0xff] %v8340_v61  ;;  %v5899_v38 = vrot.slane %v4645_v29, 9  ;;  %v8362_v62 = vsel %vm7523_vm9, %v5898_v39, %v4770_v63  ;;  %v4772_v41 = vrot.slane %v4770_v63, 4  ;;  %v8366_v29 = vld [vmem:[#allocation2 + $0xb0] sm:$0x1]  ;;  %v4784_v6 = vrot.slane %v8354_v34, 5 }
 0x149   : > { %6376 = vmatmul.mubr.msk.bf16.vlgmr.msra.gmra.mrb[0].mxu0 %vm1031_vm6, %v8067_v56  ;;  %v4773_v56 = vrot.slane %v8327_v12, 5  ;;  %8949 = vst [vmem:[#allocation8_spill] sm:$0xff] %v8362_v62  ;;  %v4787_v39 = vrot.slane %v8366_v29, 5  ;;  %v5901_v63 = vrot.slane %v4647_v47, 9  ;;  %v4791_v37 = vrot.slane %v8356_v43, 5 }
 0x14a   : > { %6408 = vmatpush3.bf16.msra.mxu0 %v8943_v8  ;;  %6379 = vmatprep.mubr.msk.bf16.mxu0 %vm1031_vm6, %v8944_v48  ;;  %v8335_v8 = vsel %vm7523_vm9, %v5897_v44, %v4763_v2  ;;  %v4765_v48 = vrot.slane %v4763_v2, 4  ;;  %v4777_v2 = vrot.slane %v8329_v21, 5  ;;  %v4649_v47 = vld [vmem:[#allocation2 + $0xcc] sm:$0xe]  ;;  %v3944_v61 = vld [vmem:[#allocation2 + $0xa8] sm:$0xf] }
 0x14b   : > { %8946 = vst [vmem:[#allocation7_spill] sm:$0xff] %v8335_v8  ;;  %v8375_v46 = vsel %vm7523_vm9, %v4772_v41, %v4773_v56  ;;  %v8391_v56 = vsel %vm7523_vm9, %v5900_v3, %v4784_v6  ;;  %v4794_v3 = vrot.slane %v8381_v33, 5  ;;  %v4801_v8 = vrot.slane %v8397_v9, 5 }
 0x14c   : > { %v8350_v44 = vsel %vm7523_vm9, %v4765_v48, %v4766_v28  ;;  %v4780_v48 = vrot.slane %v8344_v49, 5  ;;  %v4779_v28 = vrot.slane %v4777_v2, 4  ;;  %8951 = vst [vmem:[#allocation13_spill] sm:$0xff] %v8375_v46  ;;  %v6823_v46 = vld [vmem:[#allocation2 + $0x54] sm:$0xff]  }
 0x14d   : > { %8948 = vst [vmem:[#allocation6_spill] sm:$0xff] %v8350_v44  ;;  %6244 = vmatmul.mubr.msk.bf16.gmra.mrb[4].mxu1 %vm1031_vm6, %v6820_v10  ;;  %v8370_v10 = vsel %vm7523_vm9, %v5899_v38, %v4777_v2  ;;  %v3941_v38 = vld [vmem:[#allocation2 + $0x9c] sm:$0xf]  ;;  %v4786_v2 = vrot.slane %v4784_v6, 4  ;;  %v8406_v6 = vld [vmem:[#allocation2 + $0xd0] sm:$0xf] }
 0x14e   : > { %6247 = vmatprep.mubr.msk.bf16.mxu1 %vm1031_vm6, %v6821_v35  ;;  %8950 = vst [vmem:[#allocation11_spill] sm:$0xff] %v8370_v10  ;;  %v4648_v35 = vld [vmem:[#allocation2 + $0xc0] sm:$0xe]  ;;  %v8387_v41 = vsel %vm7523_vm9, %v4779_v28, %v4780_v48  ;;  %v8403_v48 = vsel %vm7523_vm9, %v5901_v63, %v4791_v37  ;;  %v4793_v28 = vrot.slane %v4791_v37, 4  ;;  %v4805_v10 = vrot.slane %v8406_v6, 5 }
 0x14f   : > { %8952 = vst [vmem:[#allocation14_spill] sm:$0xff] %v8387_v41  ;;  %v5902_v62 = vrot.slane %v4648_v35, 9  ;;  %v5903_v41 = vrot.slane %v4649_v47, 9  ;;  %v4221_v63 = vshrl.u32 %v3941_v38, 16 }
 0x150   : > { %v8420_v37 = vsel %vm7523_vm9, %v4793_v28, %v4794_v3  ;;  %v4807_v28 = vrot.slane %v4805_v10, 4  ;;  %v8955_v3 = vor.u32 %v8181_v11, %v8179_v27  ;;  %v4203_v11 = vor.u32 %v8231_v52, %v8229_v30 }
 0x151   : > { %6380 = vmatmul.mubr.msk.bf16.gmra.mrb[4].mxu0 %vm1031_vm6, %v8195_v42  ;;  %v8395_v42 = vld [vmem:[#allocation2 + $0xc4] sm:$0xf]  ;;  %8954 = vst [vmem:[#allocation16_spill] sm:$0xff] %v8420_v37  ;;  %v8433_v47 = vsel %vm7523_vm9, %v5903_v41, %v4805_v10  ;;  %v4248_v37 = vshll.u32 %v3944_v61, 16  ;;  %v8956_v30 = vsel %vm7148_vm5, %v8168_v58, %v8164_v45  ;;  %v8957_v52 = vsel %vm7148_vm5, %v8162_v53, %v8122_v5 }
 0x152   : > { %6383 = vmatprep.mubr.msk.bf16.mxu0 %vm1031_vm6, %v8197_v25  ;;  %v8410_v25 = vsel %vm7523_vm9, %v4786_v2, %v4787_v39  ;;  %v4798_v44 = vrot.slane %v8395_v42, 5  ;;  %v4190_v39 = vrot.slane %v8955_v3, 4  ;;  %v6824_v10 = vld [vmem:[#allocation2 + $0x60] sm:$0xff]   ;;  %v8958_v5 = vsel %vm7148_vm5, %v8177_v0, %v8172_v59 }
 0x153   : > { %8953 = vst [vmem:[#allocation15_spill] sm:$0xff] %v8410_v25  ;;  %v4224_v25 = vshll.u32 %v3941_v38, 16  ;;  %v4245_v38 = vshrl.u32 %v3944_v61, 16  ;;  %v4250_v58 = vrot.slane %v4248_v37, 5  ;;  %v8959_v53 = vsel %vm7148_vm5, %v8170_v40, %v8127_v14  ;;  %v8970_v26 = vld [vmem:[#allocation7_spill] sm:$0xff] }
 0x154   : > { %v8427_v35 = vsel %vm7523_vm9, %v5902_v62, %v4798_v44  ;;  %v4800_v2 = vrot.slane %v4798_v44, 4  ;;  %v4230_v62 = vshll.u32 %v8329_v21, 16  ;;  %v4234_v44 = vshrl.u32 %v8329_v21, 16 }
 0x155   : > { %6248 = vmatmul.mubr.msk.bf16.gmra.mrb[8].mxu1 %vm1031_vm6, %v6822_v36  ;;  %v4254_v21 = vshll.u32 %v8354_v34, 16  ;;  %v4247_v45 = vrot.slane %v4245_v38, 4  ;;  %v4240_v38 = vshll.u32 %v8344_v49, 16  ;;  %v4264_v14 = vshll.u32 %v8366_v29, 16  ;;  %v6826_v49 = vld [vmem:[#allocation2 + $0x78] sm:$0xff]  }
 0x156   : > { %6251 = vmatprep.mubr.msk.bf16.mxu1 %vm1031_vm6, %v6823_v46  ;;  %v8443_v36 = vsel %vm7523_vm9, %v4800_v2, %v4801_v8  ;;  %v8449_v46 = vsel %vm7523_vm9, %v4807_v28, %v4808_v20  ;;  %v4258_v8 = vshrl.u32 %v8354_v34, 16  ;;  %v4213_v20 = vor.u32 %v8241_v7, %v8238_v31 }
 0x157   : > { %v5919_v41 = vcombine.low %v8427_v35, %v8443_v36  ;;  %v5920_v61 = vcombine.low %v8433_v47, %v8449_v46  ;;  %v4216_v2 = vshll.u32 %v8327_v12, 16  ;;  %v4226_v28 = vrot.slane %v4224_v25, 5 }
 0x158   : > { %v5863_v34 = vcombine.low %v8957_v52, %v8956_v30  ;;  %v4185_v7 = vsel %vm7148_vm5, %v8236_v4, %v8179_v27  ;;  %v4195_v12 = vsel %vm7148_vm5, %v4190_v39, %v8223_v22  ;;  %v8481_v25 = vrot.slane %v4230_v62, 5  ;;  %v3947_v39 = vld [vmem:[#allocation2 + $0xb4] sm:$0xf]  ;;  %v6827_v52 = vld [vmem:[#allocation2 + $0x84] sm:$0xff]  }
 0x159   : > { %6384 = vmatmul.mubr.msk.bf16.gmra.mrb[8].mxu0 %vm1031_vm6, %v8199_v24  ;;  %v4223_v24 = vrot.slane %v4221_v63, 4  ;;  %v4236_v63 = vrot.slane %v4234_v44, 4  ;;  %v5864_v27 = vcombine.low %v8959_v53, %v8958_v5  ;;  %v4204_v4 = vrot.slane %v4203_v11, 4  ;;  %v3950_v11 = vld [vmem:[#allocation2 + $0xc0] sm:$0xf] }
 0x15a   : > { %6387 = vmatprep.mubr.msk.bf16.mxu0 %vm1031_vm6, %v8201_v18  ;;  %v6825_v18 = vld [vmem:[#allocation2 + $0x6c] sm:$0xff]   ;;  %v8493_v3 = vrot.slane %v4254_v21, 5  ;;  %v4260_v22 = vrot.slane %v4258_v8, 4  ;;  %v4214_v62 = vrot.slane %v4213_v20, 4  ;;  %v4218_v37 = vrot.slane %v4216_v2, 5 }
 0x15b   : > { %v4227_v44 = vor.u32 %v4226_v28, %v4223_v24  ;;  %v5865_v59 = vcombine.low %v4185_v7, %v4195_v12  ;;  %v4237_v0 = vor.u32 %v4236_v63, %v8481_v25  ;;  %v4251_v30 = vor.u32 %v4250_v58, %v4247_v45 }
 0x15c   : > { %v4269_v40 = vshrl.u32 %v3947_v39, 16  ;;  %v4261_v21 = vor.u32 %v4260_v22, %v8493_v3  ;;  %v4272_v8 = vshll.u32 %v3947_v39, 16  ;;  %v4282_v20 = vshrl.u32 %v8356_v43, 16 }
 0x15d   : > { %6252 = vmatmul.mubr.msk.bf16.gmra.mrb[12].mxu1 %vm1031_vm6, %v6824_v10  ;;  %v4278_v10 = vshll.u32 %v8356_v43, 16  ;;  %v4209_v2 = vsel %vm7148_vm5, %v4204_v4, %v8238_v31  ;;  %v4219_v29 = vsel %vm7148_vm5, %v4214_v62, %v4218_v37  ;;  %v4228_v24 = vrot.slane %v4227_v44, 4  ;;  %v3953_v44 = vld [vmem:[#allocation2 + $0xcc] sm:$0xf] }
 0x15e   : > { %6255 = vmatprep.mubr.msk.bf16.mxu1 %vm1031_vm6, %v6825_v18  ;;  %v4242_v28 = vrot.slane %v4240_v38, 5  ;;  %v4296_v18 = vshll.u32 %v3950_v11, 16  ;;  %v4302_v7 = vshll.u32 %v8395_v42, 16  ;;  %v4306_v12 = vshrl.u32 %v8395_v42, 16 }
 0x15f   : > { %v4238_v43 = vrot.slane %v4237_v0, 4  ;;  %v4252_v63 = vrot.slane %v4251_v30, 4  ;;  %v4266_v45 = vrot.slane %v4264_v14, 5  ;;  %v4271_v58 = vrot.slane %v4269_v40, 4 }
 0x160   : > { %v4262_v5 = vrot.slane %v4261_v21, 4  ;;  %v4274_v53 = vrot.slane %v4272_v8, 5  ;;  %v4284_v31 = vrot.slane %v4282_v20, 4  ;;  %v5866_v4 = vcombine.low %v4209_v2, %v4219_v29  ;;  %v6828_v21 = vld [vmem:[#allocation2 + $0x90] sm:$0xff]   ;;  %v6829_v20 = vld [vmem:[#allocation2 + $0x9c] sm:$0xff]  }
 0x161   : > { %6388 = vmatmul.mubr.msk.bf16.gmra.mrb[12].mxu0 %vm1031_vm6, %v5863_v34  ;;  %v4293_v34 = vshrl.u32 %v3950_v11, 16  ;;  %v4298_v39 = vrot.slane %v4296_v18, 5  ;;  %v4304_v62 = vrot.slane %v4302_v7, 5  ;;  %v4308_v37 = vrot.slane %v4306_v12, 4 }
 0x162   : > { %6391 = vmatprep.mubr.msk.bf16.mxu0 %vm1031_vm6, %v5864_v27  ;;  %v4280_v27 = vrot.slane %v4278_v10, 5  ;;  %v4233_v42 = vsel %vm7148_vm5, %v4228_v24, %v8481_v25  ;;  %v4243_v38 = vsel %vm7148_vm5, %v4238_v43, %v4242_v28  ;;  %v4288_v0 = vshll.u32 %v8381_v33, 16 }
 0x163   : > { %v4295_v22 = vrot.slane %v4293_v34, 4  ;;  %v4257_v30 = vsel %vm7148_vm5, %v4252_v63, %v8493_v3  ;;  %v4267_v14 = vsel %vm7148_vm5, %v4262_v5, %v4266_v45  ;;  %v4275_v40 = vor.u32 %v4274_v53, %v4271_v58  ;;  %v6830_v45 = vld [vmem:[#allocation2 + $0xa8] sm:$0xff]  }
 0x164   : > { %v4285_v11 = vor.u32 %v4284_v31, %v4280_v27  ;;  %v4317_v25 = vshrl.u32 %v3953_v44, 16  ;;  %v4320_v8 = vshll.u32 %v3953_v44, 16  ;;  %v4326_v10 = vshll.u32 %v8406_v6, 16 }
 0x165   : > { %6256 = vmatmul.mubr.msk.bf16.gmra.mrb[16].mxu1 %vm1031_vm6, %v6826_v49  ;;  %v4330_v33 = vshrl.u32 %v8406_v6, 16  ;;  %v4309_v49 = vor.u32 %v4308_v37, %v4304_v62  ;;  %v4312_v2 = vshll.u32 %v8397_v9, 16  ;;  %v5867_v3 = vcombine.low %v4233_v42, %v4243_v38  ;;  %v6883_v37 = vld [vmem:[#allocation2 + $0x1c] sm:$0xf] }
 0x166   : > { %6259 = vmatprep.mubr.msk.bf16.mxu1 %vm1031_vm6, %v6827_v52  ;;  %v5868_v29 = vcombine.low %v4257_v30, %v4267_v14  ;;  %v4276_v24 = vrot.slane %v4275_v40, 4  ;;  %v4286_v28 = vrot.slane %v4285_v11, 4  ;;  %v4290_v52 = vrot.slane %v4288_v0, 5  ;;  %v6884_v11 = vld [vmem:[#allocation2 + $0x20] sm:$0x1] }
 0x167   : > { %v4319_v34 = vrot.slane %v4317_v25, 4  ;;  %v4322_v18 = vrot.slane %v4320_v8, 5  ;;  %v4328_v7 = vrot.slane %v4326_v10, 5  ;;  %v4332_v12 = vrot.slane %v4330_v33, 4  ;;  %v6885_v10 = vld [vmem:[#allocation2 + $0x28] sm:$0xf] }
 0x168   : > { %v4310_v6 = vrot.slane %v4309_v49, 4  ;;  %v4314_v63 = vrot.slane %v4312_v2, 5  ;;  %v4281_v9 = vsel %vm7148_vm5, %v4276_v24, %v4280_v27  ;;  %v4291_v58 = vsel %vm7148_vm5, %v4286_v28, %v4290_v52  ;;  %v4634_v27 = vld [vmem:[#allocation2 + $0x18] sm:$0xe]  ;;  %v4635_v49 = vld [vmem:[#allocation2 + $0x24] sm:$0xe] }
 0x169   : > { %6392 = vmatmul.mubr.msk.bf16.gmra.mrb[16].mxu0 %vm1031_vm6, %v5865_v59  ;;  %v4299_v59 = vor.u32 %v4298_v39, %v4295_v22  ;;  %v4323_v5 = vor.u32 %v4322_v18, %v4319_v34  ;;  %v4333_v53 = vor.u32 %v4332_v12, %v4328_v7  ;;  %v4336_v31 = vshll.u32 %v8414_v16, 16  ;;  %v8960_v28 = vld [vmem:[#allocation9_spill] sm:$0xff] }
 0x16a   : > { %6395 = vmatprep.mubr.msk.bf16.mxu0 %vm1031_vm6, %v5866_v4  ;;  %v6831_v4 = vld [vmem:[#allocation2 + $0xb4] sm:$0xff]   ;;  %v4315_v39 = vsel %vm7148_vm5, %v4310_v6, %v4314_v63  ;;  %v4700_v44 = vrot.slane %v6883_v37, 5  ;;  %v5869_v42 = vcombine.low %v4281_v9, %v4291_v58  ;;  %v5888_v16 = vrot.slane %v4634_v27, 9  ;;  %v8976_v63 = vld [vmem:[#allocation11_spill] sm:$0xff] }
 0x16b   : > { %v4300_v43 = vrot.slane %v4299_v59, 4  ;;  %v4324_v0 = vrot.slane %v4323_v5, 4  ;;  %v4334_v30 = vrot.slane %v4333_v53, 4  ;;  %v4338_v14 = vrot.slane %v4336_v31, 5  ;;  %v8977_v9 = vld [vmem:[#allocation14_spill] sm:$0xff]  ;;  %v8979_v58 = vld [vmem:[#allocation15_spill] sm:$0xff] }
 0x16c   : > { %v4702_v40 = vrot.slane %v4700_v44, 4  ;;  %v4707_v33 = vrot.slane %v6885_v10, 5  ;;  %v4710_v52 = vrot.slane %v8960_v28, 5  ;;  %v8962_v12 = vcombine.low %v8251_v19, %v8266_v23  ;;  %v8968_v23 = vld [vmem:[#allocation10_spill] sm:$0xff]  ;;  %v8981_v53 = vld [vmem:[#allocation16_spill] sm:$0xff] }
 0x16d   : > { %6260 = vmatmul.mubr.msk.bf16.gmra.mrb[20].mxu1 %vm1031_vm6, %v6828_v21  ;;  %v4305_v22 = vsel %vm7148_vm5, %v4300_v43, %v4304_v62  ;;  %v4703_v21 = vrot.slane %v6884_v11, 5  ;;  %v6832_v62 = vld [vmem:[#allocation2 + $0xc0] sm:$0xff]   ;;  %v4329_v25 = vsel %vm7148_vm5, %v4324_v0, %v4328_v7  ;;  %v4339_v8 = vsel %vm7148_vm5, %v4334_v30, %v4338_v14 }
 0x16e   : > { %6263 = vmatprep.mubr.msk.bf16.mxu1 %vm1031_vm6, %v6829_v20  ;;  %v5870_v38 = vcombine.low %v4305_v22, %v4315_v39  ;;  %v4701_v20 = vsel %vm7523_vm9, %v5888_v16, %v4700_v44  ;;  %v5871_v2 = vcombine.low %v4329_v25, %v4339_v8  ;;  %v4709_v24 = vrot.slane %v4707_v33, 4 }
 0x16f   : > { %v4704_v59 = vsel %vm7523_vm9, %v4702_v40, %v4703_v21  ;;  %v8961_v7 = vcombine.low %v8245_v60, %v8258_v50  ;;  %v8963_v43 = vcombine.low %v8270_v51, %v8281_v15  ;;  %v8965_v60 = vcombine.low %v8298_v57, %v8310_v1  ;;  %v8967_v50 = vld [vmem:[#allocation12_spill] sm:$0xff]  ;;  %v8971_v57 = vld [vmem:[#allocation6_spill] sm:$0xff] }
 0x170   : > { %v4711_v34 = vsel %vm7523_vm9, %v4709_v24, %v4710_v52  ;;  %v8966_v19 = vcombine.low %v8303_v55, %v8321_v54  ;;  %v8969_v51 = vcombine.low %v8967_v50, %v8968_v23  ;;  %v5248_v15 = vsel %vm1080_vm0, %v5191_v17, 0  ;;  %v8973_v55 = vld [vmem:[#allocation8_spill] sm:$0xff]  ;;  %v8974_v54 = vld [vmem:[#allocation13_spill] sm:$0xff] }
 0x171   : > { %6396 = vmatmul.mubr.msk.bf16.gmra.mrb[20].mxu0 %vm1031_vm6, %v5867_v3  ;;  %v5905_v3 = vcombine.low %v4701_v20, %v4704_v59  ;;  %6442 = vmatpush3.bf16.msra.mxu1 %v5248_v15  ;;  %v8972_v1 = vcombine.low %v8970_v26, %v8971_v57  ;;  %v8975_v6 = vcombine.low %v8973_v55, %v8974_v54 }
 0x172   : > { %6399 = vmatprep.mubr.msk.bf16.mxu0 %vm1031_vm6, %v5868_v29  ;;  %v5889_v29 = vrot.slane %v4635_v49, 9  ;;  %v8980_v5 = vcombine.low %v8391_v56, %v8979_v58  ;;  %v8982_v31 = vcombine.low %v8403_v48, %v8981_v53 }
 0x174   : > { %v4708_v32 = vsel %vm7523_vm9, %v5889_v29, %v4707_v33  ;;  %v8676_v29 = vld [vmem:[%s8885_s4] ss:$0 sm:$0xff] }
 0x175   : > { %6264 = vmatmul.mubr.msk.bf16.gmra.mrb[24].mxu1 %vm1031_vm6, %v6830_v45  ;;  %v5906_v18 = vcombine.low %v4708_v32, %v4711_v34  ;;  %v8978_v45 = vcombine.low %v8976_v63, %v8977_v9 }
 0x176   : > { %6267 = vmatprep.mubr.msk.bf16.mxu1 %vm1031_vm6, %v6831_v4 }
 0x179   : > { %6400 = vmatmul.mubr.msk.bf16.gmra.mrb[24].mxu0 %vm1031_vm6, %v5869_v42 }
 0x17a   : > { %6403 = vmatprep.mubr.msk.bf16.mxu0 %vm1031_vm6, %v5870_v38 }
 0x17d   : > { %6268 = vmatmul.mubr.msk.bf16.gmra.mrb[28].mxu1 %vm1031_vm6, %v6832_v62 }
 0x181   : > { %6404 = vmatmul.mubr.msk.bf16.gmra.mrb[28].mxu0 %vm1031_vm6, %v5871_v2 }
 0x182   : > { %6409 = vmatprep.mubr.msk.bf16.mxu0 %vm1031_vm6, %v5905_v3 }
 0x189   : > { %6410 = vmatmul.mubr.msk.bf16.vlgmr.msra.gmra.mrb[0].mxu0 %vm1031_vm6, %v5906_v18 }
 0x18a   : > { %6413 = vmatprep.mubr.msk.bf16.mxu0 %vm1031_vm6, %v8961_v7 }
 0x191   : > { %6414 = vmatmul.mubr.msk.bf16.gmra.mrb[4].mxu0 %vm1031_vm6, %v8962_v12 }
 0x192   : > { %6417 = vmatprep.mubr.msk.bf16.mxu0 %vm1031_vm6, %v8963_v43 }
 0x199   : > { %6418 = vmatmul.mubr.msk.bf16.gmra.mrb[8].mxu0 %vm1031_vm6, %v8964_v13 }
 0x19a   : > { %6421 = vmatprep.mubr.msk.bf16.mxu0 %vm1031_vm6, %v8965_v60 }
 0x1a1   : > { %6422 = vmatmul.mubr.msk.bf16.gmra.mrb[12].mxu0 %vm1031_vm6, %v8966_v19 }
 0x1a2   : > { %6425 = vmatprep.mubr.msk.bf16.mxu0 %vm1031_vm6, %v8969_v51 }
 0x1a9   : > { %6426 = vmatmul.mubr.msk.bf16.gmra.mrb[16].mxu0 %vm1031_vm6, %v8972_v1 }
 0x1aa   : > { %6429 = vmatprep.mubr.msk.bf16.mxu0 %vm1031_vm6, %v8975_v6 }
 0x1b1   : > { %6430 = vmatmul.mubr.msk.bf16.gmra.mrb[20].mxu0 %vm1031_vm6, %v8978_v45 }
 0x1b2   : > { %6433 = vmatprep.mubr.msk.bf16.mxu0 %vm1031_vm6, %v8980_v5 }
 0x1b9   : > { %6434 = vmatmul.mubr.msk.bf16.gmra.mrb[24].mxu0 %vm1031_vm6, %v8982_v31 }
 0x1ba   : > { %6437 = vmatprep.mubr.msk.bf16.mxu0 %vm1031_vm6, %v5919_v41 }
 0x1c1   : > { %6438 = vmatmul.mubr.msk.bf16.gmra.mrb[28].mxu0 %vm1031_vm6, %v5920_v61 }
 0x218   : > { %v6241_v4 = vpop.f32.mrb[0].mxu1 }
 0x219   : > { %v2194_v22 = vpop.f32.mrb[1].mxu1 }
 0x21a   : > { %v6242_v56 = vpop.f32.mrb[2].mxu1 }
 0x21b   : > { %v2197_v39 = vpop.f32.mrb[3].mxu1 }
 0x220   : > { %v6245_v37 = vpop.f32.mrb[4].mxu1 }
 0x221   : > { %v2210_v44 = vpop.f32.mrb[5].mxu1 }
 0x222   : > { %v6246_v27 = vpop.f32.mrb[6].mxu1 }
 0x223   : > { %v2213_v48 = vpop.f32.mrb[7].mxu1 }
 0x228   : > { %v8625_v42 = vpop.f32.mrb[8].mxu1 }
 0x229   : > { %v8627_v38 = vpop.f32.mrb[9].mxu1 }
 0x22a   : > { %v8629_v35 = vpop.f32.mrb[10].mxu1 }
 0x22b   : > { %v8631_v36 = vpop.f32.mrb[11].mxu1 }
 0x230   : > { %v8633_v41 = vpop.f32.mrb[12].mxu1 }
 0x231   : > { %v8635_v47 = vpop.f32.mrb[13].mxu1 }
 0x232   : > { %v8637_v46 = vpop.f32.mrb[14].mxu1 }
 0x233   : > { %v8639_v61 = vpop.f32.mrb[15].mxu1 }
 0x238   : > { %v8641_v0 = vpop.f32.mrb[16].mxu1 }
 0x239   : > { %v8643_v30 = vpop.f32.mrb[17].mxu1 }
 0x23a   : > { %v8645_v14 = vpop.f32.mrb[18].mxu1 }
 0x23b   : > { %v8647_v16 = vpop.f32.mrb[19].mxu1 }
 0x240   : > { %v8649_v40 = vpop.f32.mrb[20].mxu1 }
 0x241   : > { %v8651_v11 = vpop.f32.mrb[21].mxu1 }
 0x242   : > { %v8653_v21 = vpop.f32.mrb[22].mxu1 }
 0x243   : > { %v8655_v62 = vpop.f32.mrb[23].mxu1 }
 0x248   : > { %v8657_v25 = vpop.f32.mrb[24].mxu1 }
 0x249   : > { %v8659_v8 = vpop.f32.mrb[25].mxu1 }
 0x24a   : > { %v8661_v10 = vpop.f32.mrb[26].mxu1 }
 0x24b   : > { %v8663_v33 = vpop.f32.mrb[27].mxu1 }
 0x250   : > { %v8665_v20 = vpop.f32.mrb[28].mxu1 }
 0x251   : > { %v8667_v59 = vpop.f32.mrb[29].mxu1 }
 0x252   : > { %v8669_v49 = vpop.f32.mrb[30].mxu1 }
 0x253   : > { %v8671_v2 = vpop.f32.mrb[31].mxu1 }
 0x25c   : > { %v6411_v3 = vpop.f32.mrb[0].mxu0 }
 0x25d   : > { %v6475_v24 = vadd.f32 %v6411_v3, %v6241_v4  ;;  %v4945_v28 = vpop.f32.mrb[1].mxu0 }
 0x25e   : > { %v6476_v52 = vadd.f32 %v4945_v28, %v2194_v22  ;;  %v6412_v32 = vpop.f32.mrb[2].mxu0 }
 0x25f   : > { %v5113_v34 = vadd.f32 %v6475_v24, %v8676_v29  ;;  %v6477_v18 = vadd.f32 %v6412_v32, %v6242_v56  ;;  %v4948_v7 = vpop.f32.mrb[3].mxu0 }
 0x260   : > { %v5111_v12 = vadd.f32 %v6476_v52, %v8676_v29  ;;  %v6478_v43 = vadd.f32 %v4948_v7, %v2197_v39 }
 0x261   : > { %v5114_v13 = vadd.f32 %v6477_v18, %v8676_v29  ;;  %v5145_v19 = vmax.f32 %v5113_v34, 0.0 }
 0x262   : > { %v5112_v60 = vadd.f32 %v6478_v43, %v8676_v29  ;;  %v5143_v23 = vmax.f32 %v5111_v12, 0.0 }
 0x263   : > { %v5146_v50 = vmax.f32 %v5114_v13, 0.0 }
 0x264   : > { %v5144_v51 = vmax.f32 %v5112_v60, 0.0  ;;  %v6415_v17 = vpop.f32.mrb[4].mxu0 }
 0x265   : > { %v5176_v15 = vpack.c.bf16 %v5146_v50, %v5145_v19  ;;  %v6479_v26 = vadd.f32 %v6415_v17, %v6245_v37  ;;  %v4961_v57 = vpop.f32.mrb[5].mxu0 }
 0x266   : > { %v5175_v1 = vpack.c.bf16 %v5144_v51, %v5143_v23  ;;  %v6480_v55 = vadd.f32 %v4961_v57, %v2210_v44  ;;  %v6416_v54 = vpop.f32.mrb[6].mxu0 }
 0x267   : > { %v5117_v6 = vadd.f32 %v6479_v26, %v8676_v29  ;;  %v6481_v63 = vadd.f32 %v6416_v54, %v6246_v27  ;;  %v4964_v9 = vpop.f32.mrb[7].mxu0 }
 0x268   : > { %v5115_v45 = vadd.f32 %v6480_v55, %v8676_v29  ;;  %v6482_v58 = vadd.f32 %v4964_v9, %v2213_v48  ;;  %6443 = vmatprep.mubr.msk.bf16.mxu1 %vm1031_vm6, %v5175_v1 }
 0x269   : > { %v5118_v5 = vadd.f32 %v6481_v63, %v8676_v29  ;;  %6444 = vmatmul.mubr.msk.bf16.vlgmr.msra.gmra.mrb[32].mxu1 %vm1031_vm6, %v5176_v15  ;;  %v5149_v31 = vmax.f32 %v5117_v6, 0.0 }
 0x26a   : > { %v5116_v53 = vadd.f32 %v6482_v58, %v8676_v29  ;;  %v5147_v22 = vmax.f32 %v5115_v45, 0.0 }
 0x26b   : > { %v5150_v4 = vmax.f32 %v5118_v5, 0.0 }
 0x26c   : > { %v5148_v56 = vmax.f32 %v5116_v53, 0.0  ;;  %v6419_v39 = vpop.f32.mrb[8].mxu0 }
 0x26d   : > { %v5178_v37 = vpack.c.bf16 %v5150_v4, %v5149_v31  ;;  %v6483_v44 = vadd.f32 %v6419_v39, %v8625_v42  ;;  %v4977_v27 = vpop.f32.mrb[9].mxu0 }
 0x26e   : > { %v5177_v3 = vpack.c.bf16 %v5148_v56, %v5147_v22  ;;  %v6484_v48 = vadd.f32 %v4977_v27, %v8627_v38  ;;  %v6420_v24 = vpop.f32.mrb[10].mxu0 }
 0x26f   : > { %v5121_v28 = vadd.f32 %v6483_v44, %v8676_v29  ;;  %v6485_v52 = vadd.f32 %v6420_v24, %v8629_v35  ;;  %v4980_v32 = vpop.f32.mrb[11].mxu0 }
 0x270   : > { %v5119_v34 = vadd.f32 %v6484_v48, %v8676_v29  ;;  %v6486_v18 = vadd.f32 %v4980_v32, %v8631_v36  ;;  %6447 = vmatprep.mubr.msk.bf16.mxu1 %vm1031_vm6, %v5177_v3 }
 0x271   : > { %v5122_v7 = vadd.f32 %v6485_v52, %v8676_v29  ;;  %6448 = vmatmul.mubr.msk.bf16.gmra.mrb[36].mxu1 %vm1031_vm6, %v5178_v37  ;;  %v5153_v12 = vmax.f32 %v5121_v28, 0.0 }
 0x272   : > { %v5120_v42 = vadd.f32 %v6486_v18, %v8676_v29  ;;  %v5151_v43 = vmax.f32 %v5119_v34, 0.0 }
 0x273   : > { %v5154_v38 = vmax.f32 %v5122_v7, 0.0 }
 0x274   : > { %v5152_v13 = vmax.f32 %v5120_v42, 0.0  ;;  %v6423_v60 = vpop.f32.mrb[12].mxu0 }
 0x275   : > { %v5180_v19 = vpack.c.bf16 %v5154_v38, %v5153_v12  ;;  %v6487_v35 = vadd.f32 %v6423_v60, %v8633_v41  ;;  %v4993_v50 = vpop.f32.mrb[13].mxu0 }
 0x276   : > { %v5179_v23 = vpack.c.bf16 %v5152_v13, %v5151_v43  ;;  %v6488_v36 = vadd.f32 %v4993_v50, %v8635_v47  ;;  %v6424_v51 = vpop.f32.mrb[14].mxu0 }
 0x277   : > { %v5125_v17 = vadd.f32 %v6487_v35, %v8676_v29  ;;  %v6489_v15 = vadd.f32 %v6424_v51, %v8637_v46  ;;  %v4996_v26 = vpop.f32.mrb[15].mxu0 }
 0x278   : > { %v5123_v57 = vadd.f32 %v6488_v36, %v8676_v29  ;;  %v6490_v1 = vadd.f32 %v4996_v26, %v8639_v61  ;;  %6451 = vmatprep.mubr.msk.bf16.mxu1 %vm1031_vm6, %v5179_v23 }
 0x279   : > { %v5126_v55 = vadd.f32 %v6489_v15, %v8676_v29  ;;  %6452 = vmatmul.mubr.msk.bf16.gmra.mrb[40].mxu1 %vm1031_vm6, %v5180_v19  ;;  %v5157_v54 = vmax.f32 %v5125_v17, 0.0 }
 0x27a   : > { %v5124_v41 = vadd.f32 %v6490_v1, %v8676_v29  ;;  %v5155_v6 = vmax.f32 %v5123_v57, 0.0 }
 0x27b   : > { %v5158_v47 = vmax.f32 %v5126_v55, 0.0 }
 0x27c   : > { %v5156_v63 = vmax.f32 %v5124_v41, 0.0  ;;  %v6427_v9 = vpop.f32.mrb[16].mxu0 }
 0x27d   : > { %v5182_v45 = vpack.c.bf16 %v5158_v47, %v5157_v54  ;;  %v6491_v46 = vadd.f32 %v6427_v9, %v8641_v0  ;;  %v5009_v58 = vpop.f32.mrb[17].mxu0 }
 0x27e   : > { %v5181_v5 = vpack.c.bf16 %v5156_v63, %v5155_v6  ;;  %v6492_v61 = vadd.f32 %v5009_v58, %v8643_v30  ;;  %v6428_v53 = vpop.f32.mrb[18].mxu0 }
 0x27f   : > { %v5129_v31 = vadd.f32 %v6491_v46, %v8676_v29  ;;  %v6493_v4 = vadd.f32 %v6428_v53, %v8645_v14  ;;  %v5012_v22 = vpop.f32.mrb[19].mxu0 }
 0x280   : > { %v5127_v56 = vadd.f32 %v6492_v61, %v8676_v29  ;;  %v6494_v39 = vadd.f32 %v5012_v22, %v8647_v16  ;;  %6455 = vmatprep.mubr.msk.bf16.mxu1 %vm1031_vm6, %v5181_v5 }
 0x281   : > { %v5130_v37 = vadd.f32 %v6493_v4, %v8676_v29  ;;  %6456 = vmatmul.mubr.msk.bf16.gmra.mrb[44].mxu1 %vm1031_vm6, %v5182_v45  ;;  %v5161_v44 = vmax.f32 %v5129_v31, 0.0 }
 0x282   : > { %v5128_v0 = vadd.f32 %v6494_v39, %v8676_v29  ;;  %v5159_v27 = vmax.f32 %v5127_v56, 0.0 }
 0x283   : > { %v5162_v30 = vmax.f32 %v5130_v37, 0.0 }
 0x284   : > { %v5160_v3 = vmax.f32 %v5128_v0, 0.0  ;;  %v6431_v48 = vpop.f32.mrb[20].mxu0 }
 0x285   : > { %v5184_v24 = vpack.c.bf16 %v5162_v30, %v5161_v44  ;;  %v6495_v14 = vadd.f32 %v6431_v48, %v8649_v40  ;;  %v5025_v28 = vpop.f32.mrb[21].mxu0 }
 0x286   : > { %v5183_v52 = vpack.c.bf16 %v5160_v3, %v5159_v27  ;;  %v6496_v16 = vadd.f32 %v5025_v28, %v8651_v11  ;;  %v6432_v32 = vpop.f32.mrb[22].mxu0 }
 0x287   : > { %v5133_v34 = vadd.f32 %v6495_v14, %v8676_v29  ;;  %v6497_v18 = vadd.f32 %v6432_v32, %v8653_v21  ;;  %v5028_v7 = vpop.f32.mrb[23].mxu0 }
 0x288   : > { %v5131_v42 = vadd.f32 %v6496_v16, %v8676_v29  ;;  %v6498_v12 = vadd.f32 %v5028_v7, %v8655_v62  ;;  %6459 = vmatprep.mubr.msk.bf16.mxu1 %vm1031_vm6, %v5183_v52 }
 0x289   : > { %v5134_v38 = vadd.f32 %v6497_v18, %v8676_v29  ;;  %6460 = vmatmul.mubr.msk.bf16.gmra.mrb[48].mxu1 %vm1031_vm6, %v5184_v24  ;;  %v5165_v43 = vmax.f32 %v5133_v34, 0.0 }
 0x28a   : > { %v5132_v40 = vadd.f32 %v6498_v12, %v8676_v29  ;;  %v5163_v13 = vmax.f32 %v5131_v42, 0.0 }
 0x28b   : > { %v5166_v11 = vmax.f32 %v5134_v38, 0.0 }
 0x28c   : > { %v5164_v60 = vmax.f32 %v5132_v40, 0.0  ;;  %v6435_v19 = vpop.f32.mrb[24].mxu0 }
 0x28d   : > { %v5186_v35 = vpack.c.bf16 %v5166_v11, %v5165_v43  ;;  %v6499_v21 = vadd.f32 %v6435_v19, %v8657_v25  ;;  %v5041_v50 = vpop.f32.mrb[25].mxu0 }
 0x28e   : > { %v5185_v23 = vpack.c.bf16 %v5164_v60, %v5163_v13  ;;  %v6500_v62 = vadd.f32 %v5041_v50, %v8659_v8  ;;  %v6436_v36 = vpop.f32.mrb[26].mxu0 }
 0x28f   : > { %v5137_v51 = vadd.f32 %v6499_v21, %v8676_v29  ;;  %v6501_v17 = vadd.f32 %v6436_v36, %v8661_v10  ;;  %v5044_v15 = vpop.f32.mrb[27].mxu0 }
 0x290   : > { %v5135_v26 = vadd.f32 %v6500_v62, %v8676_v29  ;;  %v6502_v57 = vadd.f32 %v5044_v15, %v8663_v33  ;;  %6463 = vmatprep.mubr.msk.bf16.mxu1 %vm1031_vm6, %v5185_v23 }
 0x291   : > { %v5138_v1 = vadd.f32 %v6501_v17, %v8676_v29  ;;  %6464 = vmatmul.mubr.msk.bf16.gmra.mrb[52].mxu1 %vm1031_vm6, %v5186_v35  ;;  %v5169_v55 = vmax.f32 %v5137_v51, 0.0 }
 0x292   : > { %v5136_v25 = vadd.f32 %v6502_v57, %v8676_v29  ;;  %v5167_v41 = vmax.f32 %v5135_v26, 0.0 }
 0x293   : > { %v5170_v8 = vmax.f32 %v5138_v1, 0.0 }
 0x294   : > { %v5168_v54 = vmax.f32 %v5136_v25, 0.0  ;;  %v6439_v47 = vpop.f32.mrb[28].mxu0 }
 0x295   : > { %v5188_v6 = vpack.c.bf16 %v5170_v8, %v5169_v55  ;;  %v6503_v10 = vadd.f32 %v6439_v47, %v8665_v20  ;;  %v5057_v63 = vpop.f32.mrb[29].mxu0 }
 0x296   : > { %v5187_v9 = vpack.c.bf16 %v5168_v54, %v5167_v41  ;;  %v6504_v33 = vadd.f32 %v5057_v63, %v8667_v59  ;;  %v6440_v45 = vpop.f32.mrb[30].mxu0 }
 0x297   : > { %v5141_v46 = vadd.f32 %v6503_v10, %v8676_v29  ;;  %v6505_v58 = vadd.f32 %v6440_v45, %v8669_v49  ;;  %v5060_v5 = vpop.f32.mrb[31].mxu0 }
 0x298   : > { %v5139_v61 = vadd.f32 %v6504_v33, %v8676_v29  ;;  %v6506_v53 = vadd.f32 %v5060_v5, %v8671_v2  ;;  %6467 = vmatprep.mubr.msk.bf16.mxu1 %vm1031_vm6, %v5187_v9  ;;  %v8756_v2 = vld [vmem:[%s8887_s6] ss:$0 sm:$0xff] }
 0x299   : > { %v5142_v20 = vadd.f32 %v6505_v58, %v8676_v29  ;;  %6468 = vmatmul.mubr.msk.bf16.gmra.mrb[56].mxu1 %vm1031_vm6, %v5188_v6  ;;  %v5173_v31 = vmax.f32 %v5141_v46, 0.0 }
 0x29a   : > { %v5140_v59 = vadd.f32 %v6506_v53, %v8676_v29  ;;  %v5171_v22 = vmax.f32 %v5139_v61, 0.0 }
 0x29b   : > { %v5174_v4 = vmax.f32 %v5142_v20, 0.0 }
 0x29c   : > { %v5172_v56 = vmax.f32 %v5140_v59, 0.0 }
 0x29d   : > { %v5190_v49 = vpack.c.bf16 %v5174_v4, %v5173_v31 }
 0x29e   : > { %v5189_v39 = vpack.c.bf16 %v5172_v56, %v5171_v22 }
 0x2a0   : > { %6471 = vmatprep.mubr.msk.bf16.mxu1 %vm1031_vm6, %v5189_v39 }
 0x2a1   : > { %6472 = vmatmul.mubr.msk.bf16.gmra.mrb[60].mxu1 %vm1031_vm6, %v5190_v49 }
 0x33c   : > { %v6445_v37 = vpop.f32.mrb[32].mxu1 }
 0x33d   : > { %v5293_v29 = vadd.f32 %v6445_v37, %v8756_v2  ;;  %v5284_v0 = vpop.f32.mrb[33].mxu1 }
 0x33e   : > { %v5285_v44 = vadd.f32 %v8756_v2, %v5284_v0  ;;  %v6446_v30 = vpop.f32.mrb[34].mxu1 }
 0x33f   : > { %5413 = vst [vmem:[%s8760_s15 + $0x10] sm:$0xff] %v5293_v29  ;;  %v5296_v27 = vadd.f32 %v6446_v30, %v8756_v2  ;;  %v5287_v3 = vpop.f32.mrb[35].mxu1 }
 0x340   : > { %5411 = vst [vmem:[%s8760_s15] sm:$0xff] %v5285_v44  ;;  %v5288_v48 = vadd.f32 %v8756_v2, %v5287_v3 }
 0x341   : > { %5414 = vst [vmem:[%s8760_s15 + $0x18] sm:$0xff] %v5296_v27 }
 0x342   : > { %5412 = vst [vmem:[%s8760_s15 + $0x8] sm:$0xff] %v5288_v48 }
 0x344   : > { %v6449_v24 = vpop.f32.mrb[36].mxu1 }
 0x345   : > { %v5309_v14 = vadd.f32 %v6449_v24, %v8756_v2  ;;  %v5300_v28 = vpop.f32.mrb[37].mxu1 }
 0x346   : > { %v5301_v52 = vadd.f32 %v8756_v2, %v5300_v28  ;;  %v6450_v16 = vpop.f32.mrb[38].mxu1 }
 0x347   : > { %5417 = vst [vmem:[%s8760_s15 + $0x30] sm:$0xff] %v5309_v14  ;;  %v5312_v32 = vadd.f32 %v6450_v16, %v8756_v2  ;;  %v5303_v34 = vpop.f32.mrb[39].mxu1 }
 0x348   : > { %5415 = vst [vmem:[%s8760_s15 + $0x20] sm:$0xff] %v5301_v52  ;;  %v5304_v18 = vadd.f32 %v8756_v2, %v5303_v34 }
 0x349   : > { %5418 = vst [vmem:[%s8760_s15 + $0x38] sm:$0xff] %v5312_v32 }
 0x34a   : > { %5416 = vst [vmem:[%s8760_s15 + $0x28] sm:$0xff] %v5304_v18 }
 0x34c   : > { %v6453_v7 = vpop.f32.mrb[40].mxu1 }
 0x34d   : > { %v5325_v42 = vadd.f32 %v6453_v7, %v8756_v2  ;;  %v5316_v12 = vpop.f32.mrb[41].mxu1 }
 0x34e   : > { %v5317_v38 = vadd.f32 %v8756_v2, %v5316_v12  ;;  %v6454_v40 = vpop.f32.mrb[42].mxu1 }
 0x34f   : > { %5421 = vst [vmem:[%s8760_s15 + $0x50] sm:$0xff] %v5325_v42  ;;  %v5328_v43 = vadd.f32 %v6454_v40, %v8756_v2  ;;  %v5319_v11 = vpop.f32.mrb[43].mxu1 }
 0x350   : > { %5419 = vst [vmem:[%s8760_s15 + $0x40] sm:$0xff] %v5317_v38  ;;  %v5320_v13 = vadd.f32 %v8756_v2, %v5319_v11 }
 0x351   : > { %5422 = vst [vmem:[%s8760_s15 + $0x58] sm:$0xff] %v5328_v43 }
 0x352   : > { %5420 = vst [vmem:[%s8760_s15 + $0x48] sm:$0xff] %v5320_v13 }
 0x354   : > { %v6457_v60 = vpop.f32.mrb[44].mxu1 }
 0x355   : > { %v5341_v19 = vadd.f32 %v6457_v60, %v8756_v2  ;;  %v5332_v35 = vpop.f32.mrb[45].mxu1 }
 0x356   : > { %v5333_v21 = vadd.f32 %v8756_v2, %v5332_v35  ;;  %v6458_v50 = vpop.f32.mrb[46].mxu1 }
 0x357   : > { %5425 = vst [vmem:[%s8760_s15 + $0x70] sm:$0xff] %v5341_v19  ;;  %v5344_v23 = vadd.f32 %v6458_v50, %v8756_v2  ;;  %v5335_v62 = vpop.f32.mrb[47].mxu1 }
 0x358   : > { %5423 = vst [vmem:[%s8760_s15 + $0x60] sm:$0xff] %v5333_v21  ;;  %v5336_v36 = vadd.f32 %v8756_v2, %v5335_v62 }
 0x359   : > { %5426 = vst [vmem:[%s8760_s15 + $0x78] sm:$0xff] %v5344_v23 }
 0x35a   : > { %5424 = vst [vmem:[%s8760_s15 + $0x68] sm:$0xff] %v5336_v36 }
 0x35c   : > { %v6461_v51 = vpop.f32.mrb[48].mxu1 }
 0x35d   : > { %v5357_v17 = vadd.f32 %v6461_v51, %v8756_v2  ;;  %v5348_v15 = vpop.f32.mrb[49].mxu1 }
 0x35e   : > { %v5349_v26 = vadd.f32 %v8756_v2, %v5348_v15  ;;  %v6462_v57 = vpop.f32.mrb[50].mxu1 }
 0x35f   : > { %5429 = vst [vmem:[%s8760_s15 + $0x90] sm:$0xff] %v5357_v17  ;;  %v5360_v1 = vadd.f32 %v6462_v57, %v8756_v2  ;;  %v5351_v25 = vpop.f32.mrb[51].mxu1 }
 0x360   : > { %5427 = vst [vmem:[%s8760_s15 + $0x80] sm:$0xff] %v5349_v26  ;;  %v5352_v55 = vadd.f32 %v8756_v2, %v5351_v25 }
 0x361   : > { %5430 = vst [vmem:[%s8760_s15 + $0x98] sm:$0xff] %v5360_v1 }
 0x362   : > { %5428 = vst [vmem:[%s8760_s15 + $0x88] sm:$0xff] %v5352_v55 }
 0x364   : > { %v6465_v8 = vpop.f32.mrb[52].mxu1 }
 0x365   : > { %v5373_v41 = vadd.f32 %v6465_v8, %v8756_v2  ;;  %v5364_v54 = vpop.f32.mrb[53].mxu1 }
 0x366   : > { %v5365_v47 = vadd.f32 %v8756_v2, %v5364_v54  ;;  %v6466_v6 = vpop.f32.mrb[54].mxu1 }
 0x367   : > { %5433 = vst [vmem:[%s8760_s15 + $0xb0] sm:$0xff] %v5373_v41  ;;  %v5376_v10 = vadd.f32 %v6466_v6, %v8756_v2  ;;  %v5367_v63 = vpop.f32.mrb[55].mxu1 }
 0x368   : > { %5431 = vst [vmem:[%s8760_s15 + $0xa0] sm:$0xff] %v5365_v47  ;;  %v5368_v9 = vadd.f32 %v8756_v2, %v5367_v63 }
 0x369   : > { %5434 = vst [vmem:[%s8760_s15 + $0xb8] sm:$0xff] %v5376_v10 }
 0x36a   : > { %5432 = vst [vmem:[%s8760_s15 + $0xa8] sm:$0xff] %v5368_v9 }
 0x36c   : > { %v6469_v33 = vpop.f32.mrb[56].mxu1 }
 0x36d   : > { %v5389_v45 = vadd.f32 %v6469_v33, %v8756_v2  ;;  %v5380_v46 = vpop.f32.mrb[57].mxu1 }
 0x36e   : > { %v5381_v58 = vadd.f32 %v8756_v2, %v5380_v46  ;;  %v6470_v5 = vpop.f32.mrb[58].mxu1 }
 0x36f   : > { %5437 = vst [vmem:[%s8760_s15 + $0xd0] sm:$0xff] %v5389_v45  ;;  %v5392_v61 = vadd.f32 %v6470_v5, %v8756_v2  ;;  %v5383_v53 = vpop.f32.mrb[59].mxu1 }
 0x370   : > { %5435 = vst [vmem:[%s8760_s15 + $0xc0] sm:$0xff] %v5381_v58  ;;  %v5384_v20 = vadd.f32 %v8756_v2, %v5383_v53 }
 0x371   : > { %5438 = vst [vmem:[%s8760_s15 + $0xd8] sm:$0xff] %v5392_v61 }
 0x372   : > { %5436 = vst [vmem:[%s8760_s15 + $0xc8] sm:$0xff] %v5384_v20 }
 0x374   : > { %v6473_v59 = vpop.f32.mrb[60].mxu1 }
 0x375   : > { %v5405_v31 = vadd.f32 %v6473_v59, %v8756_v2  ;;  %v5396_v4 = vpop.f32.mrb[61].mxu1 }
 0x376   : > { %v5397_v22 = vadd.f32 %v8756_v2, %v5396_v4  ;;  %v6474_v56 = vpop.f32.mrb[62].mxu1 }
 0x377   : > { %5441 = vst [vmem:[%s8760_s15 + $0xf0] sm:$0xff] %v5405_v31  ;;  %v5408_v49 = vadd.f32 %v6474_v56, %v8756_v2  ;;  %v5399_v39 = vpop.f32.mrb[63].mxu1 }
 0x378   : > { %5439 = vst [vmem:[%s8760_s15 + $0xe0] sm:$0xff] %v5397_v22  ;;  %v5400_v37 = vadd.f32 %v8756_v2, %v5399_v39 }
 0x379   : > { %5442 = vst [vmem:[%s8760_s15 + $0xf8] sm:$0xff] %v5408_v49 }
 0x37a   : > { %5440 = vst [vmem:[%s8760_s15 + $0xe8] sm:$0xff] %v5400_v37 }
 0x37b   : > { %6899 = shalt.err (!%p6896_p5)
}
 0x37c   : > { %s6900_s22 = scalar_lea.hbm %s8825_s20, 4096  ;;  %s6904_s15 = scalar_lea.hbm %s8888_s7, 8192 }
 0x37d   : > { %p6901_p6 = scmp.ne.s32.totalorder %s8825_s20, %s6900_s22  ;;  %p6905_p10 = scmp.lt.u32.totalorder %s8825_s20, %s8888_s7 }
 0x37e   : > { %p6906_p11 = scmp.lt.u32.totalorder %s6904_s15, %s6900_s22  ;;  %p6908_p13 = scmp.lt.u32.totalorder %s6900_s22, %s8825_s20 }
 0x37f   : > { %p6902_p7 = pnand %p6901_p6, %p7049_p4 }
 0x380   : > { %p6907_p12 = por %p6906_p11, %p6905_p10 }
 0x381   : > { %p6903_p9 = pneg %p6902_p7 }
 0x382   : > { %p6909_p0 = por %p6908_p13, %p6907_p12 }
 0x384   : > { %p6910_p1 = pnand %p6909_p0, %p6903_p9 }
 0x386   : > { %6913 = shalt.err (!%p6910_p1)
}
 0x387   : > { %s6967_s19 = smov 128   ;;  %s6968_s21 = smov 8  }
 0x388   : > { %6743 = dma.vmem_to_hbm [thread:$0]  (%p7049_p4), %s8827_s17, 4096, %s8825_s20, %s8835_s27, %s6967_s19, %s6967_s19, %s6968_s21  }
 0x389 PF: > { %p6750_p2 = scmp.ge.s32.totalorder %s6964_s29, 2  ;;  %s5475_s23 = sand.u32 1, %s6944_s24  }
 0x38a   : > { %s5476_s30 = scalar_lea.sflag [#allocation4], %s5475_s23 }
 0x38b   : > { %p6746_p3 = pnand %p6750_p2, %p7056_p8 }
 0x38d   : > { %6939 = dma.done.wait (!%p6746_p3), %s5476_s30, 4096  }
 0x38e   : > { %6941 = vsyncadd (!%p6746_p3), %s5476_s30, 4294963200  ;;  %s20_s29 = sadd.s32 1, %s6964_s29   ;;  %s8983_s24 = smov %s6948_s25 }
 0x38f   : > { %p17_p5 = scmp.ge.s32.totalorder %s20_s29, 4   ;;  %s8984_s25 = smov %s6952_s26 }
 0x390   : > { %s8985_s26 = smov %s7062_s14  ;;  %s8986_s27 = smov %s6960_s28 }
 0x391   : > { %s8987_s28 = smov %s8989_s9  ;;  %19 = sbr.rel (!%p17_p5) target bundleno = 4 (0x4), region = 101 }
 0x398   :  { %5481 = vsyncpa [#allocation4], 1 }
 0x399   :  { %5483 = vsyncpa [#allocation4 + $0x1], 1 }

</bundles_post_ra>
